<compile_context>
chip_gen: v5e
topology: v5e:2x2
jax: 0.10.0
libtpu: 0.0.40
codegen_flags: <defaults>
</compile_context>

<pallas_src>
import functools

import jax
import jax.numpy as jnp
from jax.experimental import pallas as pl
from jax.experimental.pallas import tpu as pltpu


# --------------------------------------------------------------------------
# Shared in-kernel helpers
# --------------------------------------------------------------------------

def _ln(x, g, b, eps=1e-6):
    # LayerNorm in f32. eps=1e-6 matches timm/MAE.
    mu = jnp.mean(x, axis=-1, keepdims=True)
    var = jnp.mean((x - mu) ** 2, axis=-1, keepdims=True)
    return (x - mu) * jax.lax.rsqrt(var + eps) * g + b


_PARALLEL_1D = pltpu.CompilerParams(dimension_semantics=("parallel",))


# --------------------------------------------------------------------------
# Fused multi-layer transformer stack (blocks + pos add + final LayerNorm)
# --------------------------------------------------------------------------

def _stack_block_kernel(x_ref, pos_ref,
                        ln1g_ref, ln1b_ref, qkvw_ref, qkvb_ref,
                        projw_ref, projb_ref, ln2g_ref, ln2b_ref,
                        fc1w_ref, fc1b_ref, fc2w_ref, fc2b_ref,
                        fng_ref, fnb_ref,
                        o_ref, acc_ref, *, heads, scale):
    """One pre-norm transformer block per grid step along the layer axis.

    grid = (batch_tiles, depth); the residual stream lives in acc_ref (f32
    VMEM) across the whole layer sweep; per-layer weights are streamed.
    """
    layer = pl.program_id(1)
    n_layers = pl.num_programs(1)
    Bt, N, D = acc_ref.shape
    Dh = D // heads
    M = Bt * N

    @pl.when(layer == 0)
    def _():
        # init residual stream (+ fused positional-embed add)
        acc_ref[...] = x_ref[...].astype(jnp.float32) + pos_ref[...]

    x = acc_ref[...].reshape(M, D)                          # f32 (M, D)

    # ---- attention: LN1 -> fused QKV -> per-head softmax(QK^T)V folded into proj ----
    h = _ln(x, ln1g_ref[0], ln1b_ref[0])
    qkv = jnp.dot(h.astype(jnp.bfloat16), qkvw_ref[0],
                  preferred_element_type=jnp.float32) + qkvb_ref[0]      # (M, 3D)
    # lane-aligned (0 / D / 2D) slices; 1/sqrt(Dh) folded into q
    q = (qkv[:, :D] * scale).reshape(Bt, N, D)
    k = qkv[:, D:2 * D].reshape(Bt, N, D)
    v = qkv[:, 2 * D:].reshape(Bt, N, D)
    pw = projw_ref[0]                                       # (D, D) bf16

    attn_proj = jnp.zeros((M, D), jnp.float32)
    for hh in range(heads):                                 # static unroll
        sl = slice(hh * Dh, (hh + 1) * Dh)
        q_h = q[..., sl].astype(jnp.bfloat16)               # (Bt, N, Dh)
        k_h = k[..., sl].astype(jnp.bfloat16)
        v_h = v[..., sl].astype(jnp.bfloat16)
        s = jnp.einsum('bqd,bkd->bqk', q_h, k_h,
                       preferred_element_type=jnp.float32)  # (Bt, N, N)
        s = s - jnp.max(s, axis=-1, keepdims=True)
        p = jnp.exp(s)
        p = p * pl.reciprocal(jnp.sum(p, axis=-1, keepdims=True), approx=True)
        o_h = jnp.einsum('bqk,bkd->bqd', p.astype(jnp.bfloat16), v_h,
                         preferred_element_type=jnp.float32)             # (Bt, N, Dh)
        # head-concat folded into projection: sublane-aligned 32-row slice of proj_w
        attn_proj = attn_proj + jnp.dot(
            o_h.reshape(M, Dh).astype(jnp.bfloat16), pw[sl, :],
            preferred_element_type=jnp.float32)
    x = x + attn_proj + projb_ref[0]                        # residual (in VMEM)

    # ---- MLP: LN2 -> fc1 -> GELU -> fc2 ----
    h2 = _ln(x, ln2g_ref[0], ln2b_ref[0])
    m = jnp.dot(h2.astype(jnp.bfloat16), fc1w_ref[0],
                preferred_element_type=jnp.float32) + fc1b_ref[0]
    # TODO(synk): PyTorch nn.GELU default is exact-erf; tanh approximation used here.
    m = jax.nn.gelu(m, approximate=True)
    m = jnp.dot(m.astype(jnp.bfloat16), fc2w_ref[0],
                preferred_element_type=jnp.float32) + fc2b_ref[0]
    x = x + m                                               # residual (in VMEM)

    acc_ref[...] = x.reshape(Bt, N, D)

    @pl.when(layer == n_layers - 1)
    def _():
        # final LayerNorm fused into the last layer step
        o_ref[...] = _ln(x, fng_ref[...], fnb_ref[...]).reshape(
            Bt, N, D).astype(o_ref.dtype)


def _pick_bt(B):
    """Batch rows per grid step; keep >=2 parallel grid steps for v7x megacore."""
    for bt in (8, 4, 2):
        if B % bt == 0 and B // bt >= 2:
            return bt
    return 1


def transformer_stack_pallas(x, bp, heads, pos, norm_g, norm_b, *,
                             out_dtype=jnp.bfloat16):
    """x: (B, N, D); bp: dict of stacked (depth, ...) block params."""
    B, N, D = x.shape
    depth = bp["qkv_w"].shape[0]
    Dh = D // heads
    bt = _pick_bt(B)
    if pos is None:
        pos = jnp.zeros((1, N, D), jnp.float32)
    pos = pos.reshape(1, N, D).astype(jnp.float32)
    ng = norm_g.reshape(1, D)
    nb = norm_b.reshape(1, D)

    tok_spec = pl.BlockSpec((bt, N, D), lambda b, l: (b, 0, 0))

    def lspec(a):                       # per-layer streamed weight block
        nd = a.ndim
        return pl.BlockSpec((1,) + a.shape[1:],
                            lambda b, l, _n=nd: (l,) + (0,) * (_n - 1))

    def cspec(a):                       # constant (layer-independent) block
        nd = a.ndim
        return pl.BlockSpec(a.shape, lambda b, l, _n=nd: (0,) * _n)

    layer_args = [bp["ln1_g"], bp["ln1_b"], bp["qkv_w"], bp["qkv_b"],
                  bp["proj_w"], bp["proj_b"], bp["ln2_g"], bp["ln2_b"],
                  bp["fc1_w"], bp["fc1_b"], bp["fc2_w"], bp["fc2_b"]]
    in_specs = ([tok_spec, cspec(pos)]
                + [lspec(a) for a in layer_args]
                + [cspec(ng), cspec(nb)])

    return pl.pallas_call(
        functools.partial(_stack_block_kernel, heads=heads, scale=1.0 / (Dh ** 0.5)),
        out_shape=jax.ShapeDtypeStruct((B, N, D), out_dtype),
        grid=(B // bt, depth),
        in_specs=in_specs,
        out_specs=tok_spec,
        scratch_shapes=[pltpu.VMEM((bt, N, D), jnp.float32)],
        compiler_params=pltpu.CompilerParams(
            dimension_semantics=("parallel", "arbitrary")),
    )(x, pos, *layer_args, ng, nb)


# --------------------------------------------------------------------------
# Other Pallas kernels
# --------------------------------------------------------------------------

def _patch_embed_kernel(x_ref, w_ref, b_ref, pos_ref, o_ref):
    x = x_ref[0].astype(jnp.bfloat16)                      # (L, pdim)
    o = jnp.dot(x, w_ref[...], preferred_element_type=jnp.float32)
    o_ref[0] = (o + b_ref[...] + pos_ref[...]).astype(o_ref.dtype)


def patch_embed_pallas(patches, w, b, pos, out_dtype=jnp.bfloat16):
    """patches: (B, L, pdim) -> (B, L, D) bf16; pos-embed add fused into epilogue."""
    B, L, pdim = patches.shape
    D = w.shape[1]
    return pl.pallas_call(
        _patch_embed_kernel,
        out_shape=jax.ShapeDtypeStruct((B, L, D), out_dtype),
        grid=(B,),
        in_specs=[pl.BlockSpec((1, L, pdim), lambda i: (i, 0, 0)),
                  pl.BlockSpec(w.shape, lambda i: (0, 0)),
                  pl.BlockSpec((1, D), lambda i: (0, 0)),
                  pl.BlockSpec((L, D), lambda i: (0, 0))],
        out_specs=pl.BlockSpec((1, L, D), lambda i: (i, 0, 0)),
        compiler_params=_PARALLEL_1D,
    )(patches, w, b.reshape(1, D), pos.reshape(L, D))


def _linear_kernel(x_ref, w_ref, b_ref, o_ref):
    o = jnp.dot(x_ref[...].astype(jnp.bfloat16), w_ref[...],
                preferred_element_type=jnp.float32) + b_ref[...]
    o_ref[...] = o.astype(o_ref.dtype)


def _linear_nobias_kernel(x_ref, w_ref, o_ref):
    o = jnp.dot(x_ref[...].astype(jnp.bfloat16), w_ref[...],
                preferred_element_type=jnp.float32)
    o_ref[...] = o.astype(o_ref.dtype)


def linear_pallas(x2d, w, b=None, out_dtype=jnp.float32):
    """x2d: (M, K), w: (K, N) bf16, b: (N,) or None -> (M, N)."""
    M = x2d.shape[0]
    N = w.shape[1]
    if b is None:
        return pl.pallas_call(
            _linear_nobias_kernel,
            out_shape=jax.ShapeDtypeStruct((M, N), out_dtype))(x2d, w)
    return pl.pallas_call(
        _linear_kernel,
        out_shape=jax.ShapeDtypeStruct((M, N), out_dtype))(x2d, w, b.reshape(1, N))


def _mae_loss_kernel(pred_ref, tgt_ref, mask_ref, o_ref, *, norm_pix):
    pred = pred_ref[...].astype(jnp.float32)               # (B, L, P)
    tgt = tgt_ref[...].astype(jnp.float32)
    if norm_pix:
        P = tgt.shape[-1]
        mean = jnp.mean(tgt, axis=-1, keepdims=True)
        # unbiased variance (matches torch.var default used by the MAE reference)
        var = jnp.sum((tgt - mean) ** 2, axis=-1, keepdims=True) / (P - 1)
        tgt = (tgt - mean) * jax.lax.rsqrt(var + 1e-6)
    per_patch = jnp.mean((pred - tgt) ** 2, axis=-1)       # (B, L)
    m = mask_ref[...].astype(jnp.float32)
    o_ref[0, 0] = jnp.sum(per_patch * m) / jnp.sum(m)


def mae_loss_pallas(pred, target, mask, norm_pix=True):
    out = pl.pallas_call(
        functools.partial(_mae_loss_kernel, norm_pix=norm_pix),
        out_shape=jax.ShapeDtypeStruct((1, 1), jnp.float32),
        in_specs=[pl.BlockSpec(memory_space=pltpu.MemorySpace.VMEM)] * 3,
        out_specs=pl.BlockSpec(memory_space=pltpu.MemorySpace.SMEM),
    )(pred, target, mask)
    return out[0, 0]


def _cos_head_kernel(e_ref, w_ref, o_ref, *, temperature):
    e = e_ref[...].astype(jnp.float32)                     # (B, D)
    w = w_ref[...].astype(jnp.float32)                     # (C_pad, D)
    e = e * jax.lax.rsqrt(jnp.maximum(jnp.sum(e * e, -1, keepdims=True), 1e-24))
    w = w * jax.lax.rsqrt(jnp.maximum(jnp.sum(w * w, -1, keepdims=True), 1e-24))
    logits = jax.lax.dot_general(e.astype(jnp.bfloat16), w.astype(jnp.bfloat16),
                                 (((1,), (1,)), ((), ())),
                                 preferred_element_type=jnp.float32)
    o_ref[...] = (temperature * logits).astype(o_ref.dtype)


def cos_head_pallas(embed, fc_w_pad, temperature, num_classes):
    """embed: (B, D); fc_w_pad: (C_pad, D) padded once at init (lane-dense)."""
    B = embed.shape[0]
    C_pad = fc_w_pad.shape[0]
    out = pl.pallas_call(
        functools.partial(_cos_head_kernel, temperature=temperature),
        out_shape=jax.ShapeDtypeStruct((B, C_pad), jnp.float32),
    )(embed, fc_w_pad)
    return out[:, :num_classes]


# --------------------------------------------------------------------------
# MAE ViT backbone (scaled-down "tiny") in JAX glue around the Pallas kernels
# --------------------------------------------------------------------------

CFG = dict(
    img_size=32, patch=8, in_chans=3,
    embed_dim=128, depth=2, heads=4, mlp_hidden=256,
    dec_dim=128, dec_depth=2, dec_heads=4, dec_mlp=256,    # lane-dense dims
    mask_ratio=0.75,
    num_classes=16, temperature=16.0, mode="ft_cos",
    norm_pix_loss=True,
)


def init_params(key, cfg):
    D = cfg["embed_dim"]
    P = cfg["patch"]
    C = cfg["in_chans"]
    L = (cfg["img_size"] // P) ** 2
    pdim = C * P * P
    dD = cfg["dec_dim"]
    ks = iter(jax.random.split(key, 64))

    def nrm(shape, s=0.02, dtype=jnp.float32):
        return (s * jax.random.normal(next(ks), shape)).astype(dtype)

    def zeros(shape):
        return jnp.zeros(shape, jnp.float32)

    def ones(shape):
        return jnp.ones(shape, jnp.float32)

    bf16 = jnp.bfloat16

    def block_stack(depth, dim, hidden):
        # per-layer params stacked along a leading depth axis (streamed in-kernel)
        return {
            "ln1_g": ones((depth, 1, dim)), "ln1_b": zeros((depth, 1, dim)),
            "qkv_w": nrm((depth, dim, 3 * dim), dtype=bf16),
            "qkv_b": zeros((depth, 1, 3 * dim)),
            "proj_w": nrm((depth, dim, dim), dtype=bf16),
            "proj_b": zeros((depth, 1, dim)),
            "ln2_g": ones((depth, 1, dim)), "ln2_b": zeros((depth, 1, dim)),
            "fc1_w": nrm((depth, dim, hidden), dtype=bf16),
            "fc1_b": zeros((depth, 1, hidden)),
            "fc2_w": nrm((depth, hidden, dim), dtype=bf16),
            "fc2_b": zeros((depth, 1, dim)),
        }

    nclass = cfg["num_classes"]
    c_pad = ((nclass + 127) // 128) * 128
    fc_w = nrm((nclass, D), dtype=bf16)
    fc_w_pad = jnp.zeros((c_pad, D), bf16).at[:nclass].set(fc_w)

    params = {
        # patch embed (Conv2d k=stride=patch) as a (C*P*P, D) matmul
        "patch_w": nrm((pdim, D), dtype=bf16), "patch_b": zeros((D,)),
        "cls": nrm((1, 1, D)),
        # TODO(synk): real MAE uses fixed sin-cos pos-embed; random init used here.
        "pos": nrm((1, L + 1, D)),
        "blocks": block_stack(cfg["depth"], D, cfg["mlp_hidden"]),
        "norm_g": ones((D,)), "norm_b": zeros((D,)),
        "dec_embed_w": nrm((D, dD), dtype=bf16), "dec_embed_b": zeros((dD,)),
        "mask_token": nrm((1, 1, dD)),
        "dec_pos": nrm((1, L + 1, dD)),
        "dec_blocks": block_stack(cfg["dec_depth"], dD, cfg["dec_mlp"]),
        "dec_norm_g": ones((dD,)), "dec_norm_b": zeros((dD,)),
        "dec_pred_w": nrm((dD, pdim), dtype=bf16), "dec_pred_b": zeros((pdim,)),
        # MYNET.fc : Linear(num_features, num_classes, bias=False)
        "fc_w": fc_w,
        # lane-dense padded / transposed copies built once at init (not per forward)
        "fc_w_pad": fc_w_pad,                       # (C_pad, D) for cosine head
        "fc_w_pad_t": jnp.transpose(fc_w_pad),      # (D, C_pad) for dot head
    }
    return params


def patchify_nchw(imgs, p):
    """MAE patchify: (B,C,H,W) -> (B, L, p*p*C) with (p,q,c) ordering."""
    B, C, H, W = imgs.shape
    h, w = H // p, W // p
    x = imgs.reshape(B, C, h, p, w, p)
    x = jnp.einsum("bchpwq->bhwpqc", x)
    return x.reshape(B, h * w, p * p * C)


def patches_conv_order(imgs, p):
    """Patch extraction matching Conv2d weight flattening order (c,p,q)."""
    B, C, H, W = imgs.shape
    h, w = H // p, W // p
    x = imgs.reshape(B, C, h, p, w, p)
    x = jnp.transpose(x, (0, 2, 4, 1, 3, 5))     # b h w c p q
    return x.reshape(B, h * w, C * p * p)


def forward_encoder(imgs, params, cfg, mask_key):
    B = imgs.shape[0]
    D = cfg["embed_dim"]
    P = cfg["patch"]
    patches = patches_conv_order(imgs, P)                  # (B, L, C*P*P)
    L = patches.shape[1]
    # patch-embed matmul with the (non-cls) pos-embed add fused in; bf16 out
    x = patch_embed_pallas(patches, params["patch_w"], params["patch_b"],
                           params["pos"][:, 1:, :])

    # random masking (glue: argsort + gathers stay in plain JAX)
    len_keep = int(L * (1.0 - cfg["mask_ratio"]))
    noise = jax.random.uniform(mask_key, (B, L))
    ids_shuffle = jnp.argsort(noise, axis=1)
    ids_restore = jnp.argsort(ids_shuffle, axis=1)
    ids_keep = ids_shuffle[:, :len_keep]
    x_masked = jnp.take_along_axis(x, ids_keep[:, :, None], axis=1)
    mask = jnp.ones((B, L), jnp.float32)
    mask = mask.at[:, :len_keep].set(0.0)
    mask = jnp.take_along_axis(mask, ids_restore, axis=1)

    cls = jnp.broadcast_to((params["cls"] + params["pos"][:, :1, :]).astype(x.dtype),
                           (B, 1, D))
    x = jnp.concatenate([cls, x_masked], axis=1)           # (B, N, D) bf16

    # fused encoder stack: all blocks + final LayerNorm in one pallas_call
    latent = transformer_stack_pallas(
        x, params["blocks"], cfg["heads"], pos=None,
        norm_g=params["norm_g"], norm_b=params["norm_b"],
        out_dtype=jnp.float32)                              # f32: user-visible embed
    return latent, mask, ids_restore


def forward_decoder(latent, ids_restore, params, cfg):
    B, Nv, D = latent.shape
    dD = cfg["dec_dim"]
    L = ids_restore.shape[1]
    x = linear_pallas(latent.reshape(B * Nv, D),
                      params["dec_embed_w"], params["dec_embed_b"],
                      out_dtype=jnp.bfloat16).reshape(B, Nv, dD)
    n_mask = L + 1 - Nv
    mask_tokens = jnp.broadcast_to(params["mask_token"].astype(x.dtype),
                                   (B, n_mask, dD))
    x_ = jnp.concatenate([x[:, 1:, :], mask_tokens], axis=1)          # (B, L, dD)
    x_ = jnp.take_along_axis(x_, ids_restore[:, :, None], axis=1)     # unshuffle
    x = jnp.concatenate([x[:, :1, :], x_], axis=1)                    # re-prepend cls

    # fused decoder stack: dec_pos add (layer 0) + blocks + final LayerNorm
    x = transformer_stack_pallas(
        x, params["dec_blocks"], cfg["dec_heads"], pos=params["dec_pos"],
        norm_g=params["dec_norm_g"], norm_b=params["dec_norm_b"],
        out_dtype=jnp.bfloat16)

    # drop cls row via a cheap XLA slice on the HBM output (no in-kernel shift)
    x = x[:, 1:, :].reshape(B * L, dD)
    pred = linear_pallas(x, params["dec_pred_w"], params["dec_pred_b"],
                         out_dtype=jnp.float32)
    return pred.reshape(B, L, -1)                                     # (B, L, pdim)


def mynet_forward(imgs, params, mask_key, cfg):
    """MYNET.forward: returns (loss, embed, x)."""
    latent, mask, ids_restore = forward_encoder(imgs, params, cfg, mask_key)
    pred = forward_decoder(latent, ids_restore, params, cfg)
    target = patchify_nchw(imgs, cfg["patch"])
    loss = mae_loss_pallas(pred, target, mask, norm_pix=cfg["norm_pix_loss"])

    # embed: encoder cls-token feature (B, num_features)
    embed = latent[:, 0, :]

    if "cos" in cfg["mode"]:
        x = cos_head_pallas(embed, params["fc_w_pad"], cfg["temperature"],
                            cfg["num_classes"])
    elif "dot" in cfg["mode"]:
        x = linear_pallas(embed, params["fc_w_pad_t"], None)[:, :cfg["num_classes"]]
    else:
        x = embed
    return loss, embed, x


# --------------------------------------------------------------------------
# Driver
# --------------------------------------------------------------------------

if __name__ == "__main__":
    key = jax.random.PRNGKey(0)
    pkey, xkey, mkey = jax.random.split(key, 3)

    params = init_params(pkey, CFG)
    # input: NCHW image batch (B=2, C=3, H=W=32), cifar-style.
    imgs = jax.random.normal(
        xkey, (2, CFG["in_chans"], CFG["img_size"], CFG["img_size"]),
        dtype=jnp.float32)

    fwd = jax.jit(lambda im, pr, mk: mynet_forward(im, pr, mk, CFG))
    loss, embed, logits = fwd(imgs, params, mkey)
    jax.block_until_ready((loss, embed, logits))

    assert loss.shape == ()
    assert embed.shape == (2, CFG["embed_dim"])
    assert logits.shape == (2, CFG["num_classes"])
    assert bool(jnp.isfinite(loss)) and bool(jnp.all(jnp.isfinite(logits)))
    print("KERNEL_OK")
</pallas_src>

<mosaic_0001>
module attributes {stable_mosaic.version = 11 : i64} {
  func.func @_patch_embed_kernel(%arg0: i32, %arg1: memref<1x16x192xf32, #tpu.memory_space<vmem>>, %arg2: memref<192x128xbf16, #tpu.memory_space<vmem>>, %arg3: memref<1x128xf32, #tpu.memory_space<vmem>>, %arg4: memref<16x128xf32, #tpu.memory_space<vmem>>, %arg5: memref<1x16x128xbf16, #tpu.memory_space<vmem>>) attributes {dimension_semantics = [#tpu.dimension_semantics<parallel>], iteration_bounds = array<i64: 2>, scalar_prefetch = 0 : i64, scratch_operands = 0 : i64, tpu.core_type = #tpu.core_type<tc>, window_params = [{transform_indices = @transform_0, window_bounds = array<i64: 1, 16, 192>}, {pipeline_mode = #tpu.pipeline_mode<synchronous>, transform_indices = @transform_1, window_bounds = array<i64: 192, 128>}, {pipeline_mode = #tpu.pipeline_mode<synchronous>, transform_indices = @transform_2, window_bounds = array<i64: 1, 128>}, {pipeline_mode = #tpu.pipeline_mode<synchronous>, transform_indices = @transform_3, window_bounds = array<i64: 16, 128>}, {transform_indices = @transform_4, window_bounds = array<i64: 1, 16, 128>}]} {
    %c0 = arith.constant 0 : index
    %c0_0 = arith.constant 0 : index
    %c0_1 = arith.constant 0 : index
    %0 = vector.load %arg1[%c0, %c0_0, %c0_1] : memref<1x16x192xf32, #tpu.memory_space<vmem>>, vector<1x16x192xf32>
    %1 = vector.shape_cast %0 : vector<1x16x192xf32> to vector<16x192xf32>
    %2 = arith.truncf %1 : vector<16x192xf32> to vector<16x192xbf16>
    %c0_2 = arith.constant 0 : index
    %c0_3 = arith.constant 0 : index
    %3 = vector.load %arg2[%c0_2, %c0_3] : memref<192x128xbf16, #tpu.memory_space<vmem>>, vector<192x128xbf16>
    %cst = arith.constant dense<0.000000e+00> : vector<16x128xf32>
    %4 = tpu.matmul %2, %3, %cst {dimension_numbers = #tpu.dot_dimension_numbers<[1], [0], [0], [1], [0, 0, 1, 1], [], []>} : vector<16x192xbf16>, vector<192x128xbf16>, vector<16x128xf32> -> vector<16x128xf32>
    %c0_4 = arith.constant 0 : index
    %c0_5 = arith.constant 0 : index
    %5 = vector.load %arg3[%c0_4, %c0_5] : memref<1x128xf32, #tpu.memory_space<vmem>>, vector<1x128xf32>
    %6 = vector.broadcast %5 : vector<1x128xf32> to vector<16x128xf32>
    %7 = arith.addf %4, %6 : vector<16x128xf32>
    %c0_6 = arith.constant 0 : index
    %c0_7 = arith.constant 0 : index
    %8 = vector.load %arg4[%c0_6, %c0_7] : memref<16x128xf32, #tpu.memory_space<vmem>>, vector<16x128xf32>
    %9 = arith.addf %7, %8 : vector<16x128xf32>
    %10 = arith.truncf %9 : vector<16x128xf32> to vector<16x128xbf16>
    %c0_8 = arith.constant 0 : index
    %c0_9 = arith.constant 0 : index
    %c0_10 = arith.constant 0 : index
    %11 = vector.load %arg5[%c0_8, %c0_9, %c0_10] : memref<1x16x128xbf16, #tpu.memory_space<vmem>>, vector<1x16x128xbf16>
    %12 = vector.shape_cast %11 : vector<1x16x128xbf16> to vector<16x128xbf16>
    %13 = vector.shape_cast %10 : vector<16x128xbf16> to vector<1x16x128xbf16>
    tpu.vector_store %arg5[%c0_8, %c0_9, %c0_10], %13 {strides = array<i32>} : memref<1x16x128xbf16, #tpu.memory_space<vmem>>, vector<1x16x128xbf16>,
    return
  }
  func.func @transform_0(%arg0: i32) -> (i32, i32, i32) {
    %c0_i32 = arith.constant 0 : i32
    %c0_i32_0 = arith.constant 0 : i32
    %c0_i32_1 = arith.constant 0 : i32
    return %arg0, %c0_i32, %c0_i32_0 : i32, i32, i32
  }
  func.func @transform_1(%arg0: i32) -> (i32, i32) {
    %c0_i32 = arith.constant 0 : i32
    %c0_i32_0 = arith.constant 0 : i32
    %c0_i32_1 = arith.constant 0 : i32
    return %c0_i32, %c0_i32_0 : i32, i32
  }
  func.func @transform_2(%arg0: i32) -> (i32, i32) {
    %c0_i32 = arith.constant 0 : i32
    %c0_i32_0 = arith.constant 0 : i32
    %c0_i32_1 = arith.constant 0 : i32
    return %c0_i32, %c0_i32_0 : i32, i32
  }
  func.func @transform_3(%arg0: i32) -> (i32, i32) {
    %c0_i32 = arith.constant 0 : i32
    %c0_i32_0 = arith.constant 0 : i32
    %c0_i32_1 = arith.constant 0 : i32
    return %c0_i32, %c0_i32_0 : i32, i32
  }
  func.func @transform_4(%arg0: i32) -> (i32, i32, i32) {
    %c0_i32 = arith.constant 0 : i32
    %c0_i32_0 = arith.constant 0 : i32
    %c0_i32_1 = arith.constant 0 : i32
    return %arg0, %c0_i32, %c0_i32_0 : i32, i32, i32
  }
}

module attributes {stable_mosaic.version = 11 : i64} {
  func.func @_linear_kernel(%arg0: memref<10x128xf32, #tpu.memory_space<vmem>>, %arg1: memref<128x128xbf16, #tpu.memory_space<vmem>>, %arg2: memref<1x128xf32, #tpu.memory_space<vmem>>, %arg3: memref<10x128xbf16, #tpu.memory_space<vmem>>) attributes {dimension_semantics = [], scalar_prefetch = 0 : i64, scratch_operands = 0 : i64, tpu.core_type = #tpu.core_type<tc>} {
    %c0 = arith.constant 0 : index
    %c0_0 = arith.constant 0 : index
    %0 = vector.load %arg0[%c0, %c0_0] : memref<10x128xf32, #tpu.memory_space<vmem>>, vector<10x128xf32>
    %1 = arith.truncf %0 : vector<10x128xf32> to vector<10x128xbf16>
    %c0_1 = arith.constant 0 : index
    %c0_2 = arith.constant 0 : index
    %2 = vector.load %arg1[%c0_1, %c0_2] : memref<128x128xbf16, #tpu.memory_space<vmem>>, vector<128x128xbf16>
    %cst = arith.constant dense<0.000000e+00> : vector<10x128xf32>
    %3 = tpu.matmul %1, %2, %cst {dimension_numbers = #tpu.dot_dimension_numbers<[1], [0], [0], [1], [0, 0, 1, 1], [], []>} : vector<10x128xbf16>, vector<128x128xbf16>, vector<10x128xf32> -> vector<10x128xf32>
    %c0_3 = arith.constant 0 : index
    %c0_4 = arith.constant 0 : index
    %4 = vector.load %arg2[%c0_3, %c0_4] : memref<1x128xf32, #tpu.memory_space<vmem>>, vector<1x128xf32>
    %5 = vector.broadcast %4 : vector<1x128xf32> to vector<10x128xf32>
    %6 = arith.addf %3, %5 : vector<10x128xf32>
    %7 = arith.truncf %6 : vector<10x128xf32> to vector<10x128xbf16>
    %c0_5 = arith.constant 0 : index
    %c0_6 = arith.constant 0 : index
    %8 = vector.load %arg3[%c0_5, %c0_6] : memref<10x128xbf16, #tpu.memory_space<vmem>>, vector<10x128xbf16>
    tpu.vector_store %arg3[%c0_5, %c0_6], %7 {strides = array<i32>} : memref<10x128xbf16, #tpu.memory_space<vmem>>, vector<10x128xbf16>,
    return
  }
}

module attributes {stable_mosaic.version = 11 : i64} {
  func.func @_stack_block_kernel(%arg0: i32, %arg1: i32, %arg2: memref<1x5x128xbf16, #tpu.memory_space<vmem>>, %arg3: memref<1x5x128xf32, #tpu.memory_space<vmem>>, %arg4: memref<1x1x128xf32, #tpu.memory_space<vmem>>, %arg5: memref<1x1x128xf32, #tpu.memory_space<vmem>>, %arg6: memref<1x128x384xbf16, #tpu.memory_space<vmem>>, %arg7: memref<1x1x384xf32, #tpu.memory_space<vmem>>, %arg8: memref<1x128x128xbf16, #tpu.memory_space<vmem>>, %arg9: memref<1x1x128xf32, #tpu.memory_space<vmem>>, %arg10: memref<1x1x128xf32, #tpu.memory_space<vmem>>, %arg11: memref<1x1x128xf32, #tpu.memory_space<vmem>>, %arg12: memref<1x128x256xbf16, #tpu.memory_space<vmem>>, %arg13: memref<1x1x256xf32, #tpu.memory_space<vmem>>, %arg14: memref<1x256x128xbf16, #tpu.memory_space<vmem>>, %arg15: memref<1x1x128xf32, #tpu.memory_space<vmem>>, %arg16: memref<1x128xf32, #tpu.memory_space<vmem>>, %arg17: memref<1x128xf32, #tpu.memory_space<vmem>>, %arg18: memref<1x5x128xf32, #tpu.memory_space<vmem>>, %arg19: memref<1x5x128xf32, #tpu.memory_space<vmem>>) attributes {dimension_semantics = [#tpu.dimension_semantics<parallel>, #tpu.dimension_semantics<arbitrary>], iteration_bounds = array<i64: 2, 2>, scalar_prefetch = 0 : i64, scratch_operands = 1 : i64, tpu.core_type = #tpu.core_type<tc>, window_params = [{transform_indices = @transform_0, window_bounds = array<i64: 1, 5, 128>}, {pipeline_mode = #tpu.pipeline_mode<synchronous>, transform_indices = @transform_1, window_bounds = array<i64: 1, 5, 128>}, {transform_indices = @transform_2, window_bounds = array<i64: 1, 1, 128>}, {transform_indices = @transform_3, window_bounds = array<i64: 1, 1, 128>}, {transform_indices = @transform_4, window_bounds = array<i64: 1, 128, 384>}, {transform_indices = @transform_5, window_bounds = array<i64: 1, 1, 384>}, {transform_indices = @transform_6, window_bounds = array<i64: 1, 128, 128>}, {transform_indices = @transform_7, window_bounds = array<i64: 1, 1, 128>}, {transform_indices = @transform_8, window_bounds = array<i64: 1, 1, 128>}, {transform_indices = @transform_9, window_bounds = array<i64: 1, 1, 128>}, {transform_indices = @transform_10, window_bounds = array<i64: 1, 128, 256>}, {transform_indices = @transform_11, window_bounds = array<i64: 1, 1, 256>}, {transform_indices = @transform_12, window_bounds = array<i64: 1, 256, 128>}, {transform_indices = @transform_13, window_bounds = array<i64: 1, 1, 128>}, {pipeline_mode = #tpu.pipeline_mode<synchronous>, transform_indices = @transform_14, window_bounds = array<i64: 1, 128>}, {pipeline_mode = #tpu.pipeline_mode<synchronous>, transform_indices = @transform_15, window_bounds = array<i64: 1, 128>}, {transform_indices = @transform_16, window_bounds = array<i64: 1, 5, 128>}]} {
    %c0_i32 = arith.constant 0 : i32
    %0 = arith.cmpi eq, %arg1, %c0_i32 : i32
    %1 = arith.extui %0 : i1 to i32
    %c0_i32_0 = arith.constant 0 : i32
    %2 = arith.cmpi ne, %1, %c0_i32_0 : i32
    scf.if %2 {
      %c0_81 = arith.constant 0 : index
      %c0_82 = arith.constant 0 : index
      %c0_83 = arith.constant 0 : index
      %212 = vector.load %arg2[%c0_81, %c0_82, %c0_83] : memref<1x5x128xbf16, #tpu.memory_space<vmem>>, vector<1x5x128xbf16>
      %213 = arith.extf %212 : vector<1x5x128xbf16> to vector<1x5x128xf32>
      %c0_84 = arith.constant 0 : index
      %c0_85 = arith.constant 0 : index
      %c0_86 = arith.constant 0 : index
      %214 = vector.load %arg3[%c0_84, %c0_85, %c0_86] : memref<1x5x128xf32, #tpu.memory_space<vmem>>, vector<1x5x128xf32>
      %215 = arith.addf %213, %214 : vector<1x5x128xf32>
      %c0_87 = arith.constant 0 : index
      %c0_88 = arith.constant 0 : index
      %c0_89 = arith.constant 0 : index
      %216 = vector.load %arg19[%c0_87, %c0_88, %c0_89] : memref<1x5x128xf32, #tpu.memory_space<vmem>>, vector<1x5x128xf32>
      tpu.vector_store %arg19[%c0_87, %c0_88, %c0_89], %215 {strides = array<i32>} : memref<1x5x128xf32, #tpu.memory_space<vmem>>, vector<1x5x128xf32>,
    } else {
    }
    %c0 = arith.constant 0 : index
    %c0_1 = arith.constant 0 : index
    %c0_2 = arith.constant 0 : index
    %3 = vector.load %arg19[%c0, %c0_1, %c0_2] : memref<1x5x128xf32, #tpu.memory_space<vmem>>, vector<1x5x128xf32>
    %4 = vector.shape_cast %3 : vector<1x5x128xf32> to vector<5x128xf32>
    %c0_3 = arith.constant 0 : index
    %c0_4 = arith.constant 0 : index
    %c0_5 = arith.constant 0 : index
    %5 = vector.load %arg4[%c0_3, %c0_4, %c0_5] : memref<1x1x128xf32, #tpu.memory_space<vmem>>, vector<1x1x128xf32>
    %6 = vector.shape_cast %5 : vector<1x1x128xf32> to vector<1x128xf32>
    %c0_6 = arith.constant 0 : index
    %c0_7 = arith.constant 0 : index
    %c0_8 = arith.constant 0 : index
    %7 = vector.load %arg5[%c0_6, %c0_7, %c0_8] : memref<1x1x128xf32, #tpu.memory_space<vmem>>, vector<1x1x128xf32>
    %8 = vector.shape_cast %7 : vector<1x1x128xf32> to vector<1x128xf32>
    %cst = arith.constant dense<0.000000e+00> : vector<5xf32>
    %9 = vector.multi_reduction <add>, %4, %cst [1] : vector<5x128xf32> to vector<5xf32>
    %10 = vector.shape_cast %9 : vector<5xf32> to vector<5x1xf32>
    %cst_9 = arith.constant 1.280000e+02 : f32
    %11 = vector.broadcast %cst_9 : f32 to vector<5x1xf32>
    %12 = arith.divf %10, %11 : vector<5x1xf32>
    %13 = vector.broadcast %12 : vector<5x1xf32> to vector<5x128xf32>
    %14 = arith.subf %4, %13 : vector<5x128xf32>
    %15 = arith.mulf %14, %14 : vector<5x128xf32>
    %cst_10 = arith.constant dense<0.000000e+00> : vector<5xf32>
    %16 = vector.multi_reduction <add>, %15, %cst_10 [1] : vector<5x128xf32> to vector<5xf32>
    %17 = vector.shape_cast %16 : vector<5xf32> to vector<5x1xf32>
    %cst_11 = arith.constant 1.280000e+02 : f32
    %18 = vector.broadcast %cst_11 : f32 to vector<5x1xf32>
    %19 = arith.divf %17, %18 : vector<5x1xf32>
    %20 = vector.broadcast %12 : vector<5x1xf32> to vector<5x128xf32>
    %21 = arith.subf %4, %20 : vector<5x128xf32>
    %cst_12 = arith.constant 9.99999997E-7 : f32
    %22 = vector.broadcast %cst_12 : f32 to vector<5x1xf32>
    %23 = arith.addf %19, %22 : vector<5x1xf32>
    %24 = math.rsqrt %23 : vector<5x1xf32>
    %25 = vector.broadcast %24 : vector<5x1xf32> to vector<5x128xf32>
    %26 = arith.mulf %21, %25 : vector<5x128xf32>
    %27 = vector.broadcast %6 : vector<1x128xf32> to vector<5x128xf32>
    %28 = arith.mulf %26, %27 : vector<5x128xf32>
    %29 = vector.broadcast %8 : vector<1x128xf32> to vector<5x128xf32>
    %30 = arith.addf %28, %29 : vector<5x128xf32>
    %31 = arith.truncf %30 : vector<5x128xf32> to vector<5x128xbf16>
    %c0_13 = arith.constant 0 : index
    %c0_14 = arith.constant 0 : index
    %c0_15 = arith.constant 0 : index
    %32 = vector.load %arg6[%c0_13, %c0_14, %c0_15] : memref<1x128x384xbf16, #tpu.memory_space<vmem>>, vector<1x128x384xbf16>
    %33 = vector.shape_cast %32 : vector<1x128x384xbf16> to vector<128x384xbf16>
    %cst_16 = arith.constant dense<0.000000e+00> : vector<5x384xf32>
    %34 = tpu.matmul %31, %33, %cst_16 {dimension_numbers = #tpu.dot_dimension_numbers<[1], [0], [0], [1], [0, 0, 1, 1], [], []>} : vector<5x128xbf16>, vector<128x384xbf16>, vector<5x384xf32> -> vector<5x384xf32>
    %c0_17 = arith.constant 0 : index
    %c0_18 = arith.constant 0 : index
    %c0_19 = arith.constant 0 : index
    %35 = vector.load %arg7[%c0_17, %c0_18, %c0_19] : memref<1x1x384xf32, #tpu.memory_space<vmem>>, vector<1x1x384xf32>
    %36 = vector.shape_cast %35 : vector<1x1x384xf32> to vector<1x384xf32>
    %37 = vector.broadcast %36 : vector<1x384xf32> to vector<5x384xf32>
    %38 = arith.addf %34, %37 : vector<5x384xf32>
    %39 = vector.extract_strided_slice %38 {offsets = [0, 0], sizes = [5, 128], strides = [1, 1]} : vector<5x384xf32> to vector<5x128xf32>
    %cst_20 = arith.constant 0.176776692 : f32
    %40 = vector.broadcast %cst_20 : f32 to vector<5x128xf32>
    %41 = arith.mulf %39, %40 : vector<5x128xf32>
    %42 = vector.shape_cast %41 : vector<5x128xf32> to vector<1x5x128xf32>
    %43 = vector.extract_strided_slice %38 {offsets = [0, 128], sizes = [5, 128], strides = [1, 1]} : vector<5x384xf32> to vector<5x128xf32>
    %44 = vector.shape_cast %43 : vector<5x128xf32> to vector<1x5x128xf32>
    %45 = vector.extract_strided_slice %38 {offsets = [0, 256], sizes = [5, 128], strides = [1, 1]} : vector<5x384xf32> to vector<5x128xf32>
    %46 = vector.shape_cast %45 : vector<5x128xf32> to vector<1x5x128xf32>
    %c0_21 = arith.constant 0 : index
    %c0_22 = arith.constant 0 : index
    %c0_23 = arith.constant 0 : index
    %47 = vector.load %arg8[%c0_21, %c0_22, %c0_23] : memref<1x128x128xbf16, #tpu.memory_space<vmem>>, vector<1x128x128xbf16>
    %48 = vector.shape_cast %47 : vector<1x128x128xbf16> to vector<128x128xbf16>
    %cst_24 = arith.constant 0.000000e+00 : f32
    %49 = vector.broadcast %cst_24 : f32 to vector<5x128xf32>
    %50 = vector.extract_strided_slice %42 {offsets = [0, 0, 0], sizes = [1, 5, 32], strides = [1, 1, 1]} : vector<1x5x128xf32> to vector<1x5x32xf32>
    %51 = arith.truncf %50 : vector<1x5x32xf32> to vector<1x5x32xbf16>
    %52 = vector.extract_strided_slice %44 {offsets = [0, 0, 0], sizes = [1, 5, 32], strides = [1, 1, 1]} : vector<1x5x128xf32> to vector<1x5x32xf32>
    %53 = arith.truncf %52 : vector<1x5x32xf32> to vector<1x5x32xbf16>
    %54 = vector.extract_strided_slice %46 {offsets = [0, 0, 0], sizes = [1, 5, 32], strides = [1, 1, 1]} : vector<1x5x128xf32> to vector<1x5x32xf32>
    %55 = arith.truncf %54 : vector<1x5x32xf32> to vector<1x5x32xbf16>
    "tpu.trace_start"() <{level = 10 : i32, message = "bqd,bkd->bqk"}> : () -> ()
    %cst_25 = arith.constant dense<0.000000e+00> : vector<1x5x5xf32>
    %56 = tpu.matmul %51, %53, %cst_25 {dimension_numbers = #tpu.dot_dimension_numbers<[2], [2], [1], [1], [0, 0, 0, 1, 1, 1], [0], [0]>} : vector<1x5x32xbf16>, vector<1x5x32xbf16>, vector<1x5x5xf32> -> vector<1x5x5xf32>
    "tpu.trace_stop"() : () -> ()
    %cst_26 = arith.constant dense<0xFF800000> : vector<1x5xf32>
    %57 = vector.multi_reduction <maximumf>, %56, %cst_26 [2] : vector<1x5x5xf32> to vector<1x5xf32>
    %58 = vector.shape_cast %57 : vector<1x5xf32> to vector<1x5x1xf32>
    %59 = vector.broadcast %58 : vector<1x5x1xf32> to vector<1x5x5xf32>
    %60 = arith.subf %56, %59 : vector<1x5x5xf32>
    %61 = math.exp %60 : vector<1x5x5xf32>
    %cst_27 = arith.constant dense<0.000000e+00> : vector<1x5xf32>
    %62 = vector.multi_reduction <add>, %61, %cst_27 [2] : vector<1x5x5xf32> to vector<1x5xf32>
    %63 = vector.shape_cast %62 : vector<1x5xf32> to vector<1x5x1xf32>
    %64 = tpu.reciprocal %63 {approx = true} : vector<1x5x1xf32> -> vector<1x5x1xf32>
    %65 = vector.broadcast %64 : vector<1x5x1xf32> to vector<1x5x5xf32>
    %66 = arith.mulf %61, %65 : vector<1x5x5xf32>
    %67 = arith.truncf %66 : vector<1x5x5xf32> to vector<1x5x5xbf16>
    "tpu.trace_start"() <{level = 10 : i32, message = "bqk,bkd->bqd"}> : () -> ()
    %cst_28 = arith.constant dense<0.000000e+00> : vector<1x5x32xf32>
    %68 = tpu.matmul %67, %55, %cst_28 {dimension_numbers = #tpu.dot_dimension_numbers<[2], [1], [1], [2], [0, 0, 0, 1, 1, 2], [0], [0]>} : vector<1x5x5xbf16>, vector<1x5x32xbf16>, vector<1x5x32xf32> -> vector<1x5x32xf32>
    "tpu.trace_stop"() : () -> ()
    %69 = vector.shape_cast %68 : vector<1x5x32xf32> to vector<5x32xf32>
    %70 = arith.truncf %69 : vector<5x32xf32> to vector<5x32xbf16>
    %71 = vector.extract_strided_slice %48 {offsets = [0, 0], sizes = [32, 128], strides = [1, 1]} : vector<128x128xbf16> to vector<32x128xbf16>
    %cst_29 = arith.constant dense<0.000000e+00> : vector<5x128xf32>
    %72 = tpu.matmul %70, %71, %cst_29 {dimension_numbers = #tpu.dot_dimension_numbers<[1], [0], [0], [1], [0, 0, 1, 1], [], []>} : vector<5x32xbf16>, vector<32x128xbf16>, vector<5x128xf32> -> vector<5x128xf32>
    %73 = arith.addf %49, %72 : vector<5x128xf32>
    %74 = vector.extract_strided_slice %42 {offsets = [0, 0, 32], sizes = [1, 5, 32], strides = [1, 1, 1]} : vector<1x5x128xf32> to vector<1x5x32xf32>
    %75 = arith.truncf %74 : vector<1x5x32xf32> to vector<1x5x32xbf16>
    %76 = vector.extract_strided_slice %44 {offsets = [0, 0, 32], sizes = [1, 5, 32], strides = [1, 1, 1]} : vector<1x5x128xf32> to vector<1x5x32xf32>
    %77 = arith.truncf %76 : vector<1x5x32xf32> to vector<1x5x32xbf16>
    %78 = vector.extract_strided_slice %46 {offsets = [0, 0, 32], sizes = [1, 5, 32], strides = [1, 1, 1]} : vector<1x5x128xf32> to vector<1x5x32xf32>
    %79 = arith.truncf %78 : vector<1x5x32xf32> to vector<1x5x32xbf16>
    "tpu.trace_start"() <{level = 10 : i32, message = "bqd,bkd->bqk"}> : () -> ()
    %cst_30 = arith.constant dense<0.000000e+00> : vector<1x5x5xf32>
    %80 = tpu.matmul %75, %77, %cst_30 {dimension_numbers = #tpu.dot_dimension_numbers<[2], [2], [1], [1], [0, 0, 0, 1, 1, 1], [0], [0]>} : vector<1x5x32xbf16>, vector<1x5x32xbf16>, vector<1x5x5xf32> -> vector<1x5x5xf32>
    "tpu.trace_stop"() : () -> ()
    %cst_31 = arith.constant dense<0xFF800000> : vector<1x5xf32>
    %81 = vector.multi_reduction <maximumf>, %80, %cst_31 [2] : vector<1x5x5xf32> to vector<1x5xf32>
    %82 = vector.shape_cast %81 : vector<1x5xf32> to vector<1x5x1xf32>
    %83 = vector.broadcast %82 : vector<1x5x1xf32> to vector<1x5x5xf32>
    %84 = arith.subf %80, %83 : vector<1x5x5xf32>
    %85 = math.exp %84 : vector<1x5x5xf32>
    %cst_32 = arith.constant dense<0.000000e+00> : vector<1x5xf32>
    %86 = vector.multi_reduction <add>, %85, %cst_32 [2] : vector<1x5x5xf32> to vector<1x5xf32>
    %87 = vector.shape_cast %86 : vector<1x5xf32> to vector<1x5x1xf32>
    %88 = tpu.reciprocal %87 {approx = true} : vector<1x5x1xf32> -> vector<1x5x1xf32>
    %89 = vector.broadcast %88 : vector<1x5x1xf32> to vector<1x5x5xf32>
    %90 = arith.mulf %85, %89 : vector<1x5x5xf32>
    %91 = arith.truncf %90 : vector<1x5x5xf32> to vector<1x5x5xbf16>
    "tpu.trace_start"() <{level = 10 : i32, message = "bqk,bkd->bqd"}> : () -> ()
    %cst_33 = arith.constant dense<0.000000e+00> : vector<1x5x32xf32>
    %92 = tpu.matmul %91, %79, %cst_33 {dimension_numbers = #tpu.dot_dimension_numbers<[2], [1], [1], [2], [0, 0, 0, 1, 1, 2], [0], [0]>} : vector<1x5x5xbf16>, vector<1x5x32xbf16>, vector<1x5x32xf32> -> vector<1x5x32xf32>
    "tpu.trace_stop"() : () -> ()
    %93 = vector.shape_cast %92 : vector<1x5x32xf32> to vector<5x32xf32>
    %94 = arith.truncf %93 : vector<5x32xf32> to vector<5x32xbf16>
    %95 = vector.extract_strided_slice %48 {offsets = [32, 0], sizes = [32, 128], strides = [1, 1]} : vector<128x128xbf16> to vector<32x128xbf16>
    %cst_34 = arith.constant dense<0.000000e+00> : vector<5x128xf32>
    %96 = tpu.matmul %94, %95, %cst_34 {dimension_numbers = #tpu.dot_dimension_numbers<[1], [0], [0], [1], [0, 0, 1, 1], [], []>} : vector<5x32xbf16>, vector<32x128xbf16>, vector<5x128xf32> -> vector<5x128xf32>
    %97 = arith.addf %73, %96 : vector<5x128xf32>
    %98 = vector.extract_strided_slice %42 {offsets = [0, 0, 64], sizes = [1, 5, 32], strides = [1, 1, 1]} : vector<1x5x128xf32> to vector<1x5x32xf32>
    %99 = arith.truncf %98 : vector<1x5x32xf32> to vector<1x5x32xbf16>
    %100 = vector.extract_strided_slice %44 {offsets = [0, 0, 64], sizes = [1, 5, 32], strides = [1, 1, 1]} : vector<1x5x128xf32> to vector<1x5x32xf32>
    %101 = arith.truncf %100 : vector<1x5x32xf32> to vector<1x5x32xbf16>
    %102 = vector.extract_strided_slice %46 {offsets = [0, 0, 64], sizes = [1, 5, 32], strides = [1, 1, 1]} : vector<1x5x128xf32> to vector<1x5x32xf32>
    %103 = arith.truncf %102 : vector<1x5x32xf32> to vector<1x5x32xbf16>
    "tpu.trace_start"() <{level = 10 : i32, message = "bqd,bkd->bqk"}> : () -> ()
    %cst_35 = arith.constant dense<0.000000e+00> : vector<1x5x5xf32>
    %104 = tpu.matmul %99, %101, %cst_35 {dimension_numbers = #tpu.dot_dimension_numbers<[2], [2], [1], [1], [0, 0, 0, 1, 1, 1], [0], [0]>} : vector<1x5x32xbf16>, vector<1x5x32xbf16>, vector<1x5x5xf32> -> vector<1x5x5xf32>
    "tpu.trace_stop"() : () -> ()
    %cst_36 = arith.constant dense<0xFF800000> : vector<1x5xf32>
    %105 = vector.multi_reduction <maximumf>, %104, %cst_36 [2] : vector<1x5x5xf32> to vector<1x5xf32>
    %106 = vector.shape_cast %105 : vector<1x5xf32> to vector<1x5x1xf32>
    %107 = vector.broadcast %106 : vector<1x5x1xf32> to vector<1x5x5xf32>
    %108 = arith.subf %104, %107 : vector<1x5x5xf32>
    %109 = math.exp %108 : vector<1x5x5xf32>
    %cst_37 = arith.constant dense<0.000000e+00> : vector<1x5xf32>
    %110 = vector.multi_reduction <add>, %109, %cst_37 [2] : vector<1x5x5xf32> to vector<1x5xf32>
    %111 = vector.shape_cast %110 : vector<1x5xf32> to vector<1x5x1xf32>
    %112 = tpu.reciprocal %111 {approx = true} : vector<1x5x1xf32> -> vector<1x5x1xf32>
    %113 = vector.broadcast %112 : vector<1x5x1xf32> to vector<1x5x5xf32>
    %114 = arith.mulf %109, %113 : vector<1x5x5xf32>
    %115 = arith.truncf %114 : vector<1x5x5xf32> to vector<1x5x5xbf16>
    "tpu.trace_start"() <{level = 10 : i32, message = "bqk,bkd->bqd"}> : () -> ()
    %cst_38 = arith.constant dense<0.000000e+00> : vector<1x5x32xf32>
    %116 = tpu.matmul %115, %103, %cst_38 {dimension_numbers = #tpu.dot_dimension_numbers<[2], [1], [1], [2], [0, 0, 0, 1, 1, 2], [0], [0]>} : vector<1x5x5xbf16>, vector<1x5x32xbf16>, vector<1x5x32xf32> -> vector<1x5x32xf32>
    "tpu.trace_stop"() : () -> ()
    %117 = vector.shape_cast %116 : vector<1x5x32xf32> to vector<5x32xf32>
    %118 = arith.truncf %117 : vector<5x32xf32> to vector<5x32xbf16>
    %119 = vector.extract_strided_slice %48 {offsets = [64, 0], sizes = [32, 128], strides = [1, 1]} : vector<128x128xbf16> to vector<32x128xbf16>
    %cst_39 = arith.constant dense<0.000000e+00> : vector<5x128xf32>
    %120 = tpu.matmul %118, %119, %cst_39 {dimension_numbers = #tpu.dot_dimension_numbers<[1], [0], [0], [1], [0, 0, 1, 1], [], []>} : vector<5x32xbf16>, vector<32x128xbf16>, vector<5x128xf32> -> vector<5x128xf32>
    %121 = arith.addf %97, %120 : vector<5x128xf32>
    %122 = vector.extract_strided_slice %42 {offsets = [0, 0, 96], sizes = [1, 5, 32], strides = [1, 1, 1]} : vector<1x5x128xf32> to vector<1x5x32xf32>
    %123 = arith.truncf %122 : vector<1x5x32xf32> to vector<1x5x32xbf16>
    %124 = vector.extract_strided_slice %44 {offsets = [0, 0, 96], sizes = [1, 5, 32], strides = [1, 1, 1]} : vector<1x5x128xf32> to vector<1x5x32xf32>
    %125 = arith.truncf %124 : vector<1x5x32xf32> to vector<1x5x32xbf16>
    %126 = vector.extract_strided_slice %46 {offsets = [0, 0, 96], sizes = [1, 5, 32], strides = [1, 1, 1]} : vector<1x5x128xf32> to vector<1x5x32xf32>
    %127 = arith.truncf %126 : vector<1x5x32xf32> to vector<1x5x32xbf16>
    "tpu.trace_start"() <{level = 10 : i32, message = "bqd,bkd->bqk"}> : () -> ()
    %cst_40 = arith.constant dense<0.000000e+00> : vector<1x5x5xf32>
    %128 = tpu.matmul %123, %125, %cst_40 {dimension_numbers = #tpu.dot_dimension_numbers<[2], [2], [1], [1], [0, 0, 0, 1, 1, 1], [0], [0]>} : vector<1x5x32xbf16>, vector<1x5x32xbf16>, vector<1x5x5xf32> -> vector<1x5x5xf32>
    "tpu.trace_stop"() : () -> ()
    %cst_41 = arith.constant dense<0xFF800000> : vector<1x5xf32>
    %129 = vector.multi_reduction <maximumf>, %128, %cst_41 [2] : vector<1x5x5xf32> to vector<1x5xf32>
    %130 = vector.shape_cast %129 : vector<1x5xf32> to vector<1x5x1xf32>
    %131 = vector.broadcast %130 : vector<1x5x1xf32> to vector<1x5x5xf32>
    %132 = arith.subf %128, %131 : vector<1x5x5xf32>
    %133 = math.exp %132 : vector<1x5x5xf32>
    %cst_42 = arith.constant dense<0.000000e+00> : vector<1x5xf32>
    %134 = vector.multi_reduction <add>, %133, %cst_42 [2] : vector<1x5x5xf32> to vector<1x5xf32>
    %135 = vector.shape_cast %134 : vector<1x5xf32> to vector<1x5x1xf32>
    %136 = tpu.reciprocal %135 {approx = true} : vector<1x5x1xf32> -> vector<1x5x1xf32>
    %137 = vector.broadcast %136 : vector<1x5x1xf32> to vector<1x5x5xf32>
    %138 = arith.mulf %133, %137 : vector<1x5x5xf32>
    %139 = arith.truncf %138 : vector<1x5x5xf32> to vector<1x5x5xbf16>
    "tpu.trace_start"() <{level = 10 : i32, message = "bqk,bkd->bqd"}> : () -> ()
    %cst_43 = arith.constant dense<0.000000e+00> : vector<1x5x32xf32>
    %140 = tpu.matmul %139, %127, %cst_43 {dimension_numbers = #tpu.dot_dimension_numbers<[2], [1], [1], [2], [0, 0, 0, 1, 1, 2], [0], [0]>} : vector<1x5x5xbf16>, vector<1x5x32xbf16>, vector<1x5x32xf32> -> vector<1x5x32xf32>
    "tpu.trace_stop"() : () -> ()
    %141 = vector.shape_cast %140 : vector<1x5x32xf32> to vector<5x32xf32>
    %142 = arith.truncf %141 : vector<5x32xf32> to vector<5x32xbf16>
    %143 = vector.extract_strided_slice %48 {offsets = [96, 0], sizes = [32, 128], strides = [1, 1]} : vector<128x128xbf16> to vector<32x128xbf16>
    %cst_44 = arith.constant dense<0.000000e+00> : vector<5x128xf32>
    %144 = tpu.matmul %142, %143, %cst_44 {dimension_numbers = #tpu.dot_dimension_numbers<[1], [0], [0], [1], [0, 0, 1, 1], [], []>} : vector<5x32xbf16>, vector<32x128xbf16>, vector<5x128xf32> -> vector<5x128xf32>
    %145 = arith.addf %121, %144 : vector<5x128xf32>
    %146 = arith.addf %4, %145 : vector<5x128xf32>
    %c0_45 = arith.constant 0 : index
    %c0_46 = arith.constant 0 : index
    %c0_47 = arith.constant 0 : index
    %147 = vector.load %arg9[%c0_45, %c0_46, %c0_47] : memref<1x1x128xf32, #tpu.memory_space<vmem>>, vector<1x1x128xf32>
    %148 = vector.shape_cast %147 : vector<1x1x128xf32> to vector<1x128xf32>
    %149 = vector.broadcast %148 : vector<1x128xf32> to vector<5x128xf32>
    %150 = arith.addf %146, %149 : vector<5x128xf32>
    %c0_48 = arith.constant 0 : index
    %c0_49 = arith.constant 0 : index
    %c0_50 = arith.constant 0 : index
    %151 = vector.load %arg10[%c0_48, %c0_49, %c0_50] : memref<1x1x128xf32, #tpu.memory_space<vmem>>, vector<1x1x128xf32>
    %152 = vector.shape_cast %151 : vector<1x1x128xf32> to vector<1x128xf32>
    %c0_51 = arith.constant 0 : index
    %c0_52 = arith.constant 0 : index
    %c0_53 = arith.constant 0 : index
    %153 = vector.load %arg11[%c0_51, %c0_52, %c0_53] : memref<1x1x128xf32, #tpu.memory_space<vmem>>, vector<1x1x128xf32>
    %154 = vector.shape_cast %153 : vector<1x1x128xf32> to vector<1x128xf32>
    %cst_54 = arith.constant dense<0.000000e+00> : vector<5xf32>
    %155 = vector.multi_reduction <add>, %150, %cst_54 [1] : vector<5x128xf32> to vector<5xf32>
    %156 = vector.shape_cast %155 : vector<5xf32> to vector<5x1xf32>
    %cst_55 = arith.constant 1.280000e+02 : f32
    %157 = vector.broadcast %cst_55 : f32 to vector<5x1xf32>
    %158 = arith.divf %156, %157 : vector<5x1xf32>
    %159 = vector.broadcast %158 : vector<5x1xf32> to vector<5x128xf32>
    %160 = arith.subf %150, %159 : vector<5x128xf32>
    %161 = arith.mulf %160, %160 : vector<5x128xf32>
    %cst_56 = arith.constant dense<0.000000e+00> : vector<5xf32>
    %162 = vector.multi_reduction <add>, %161, %cst_56 [1] : vector<5x128xf32> to vector<5xf32>
    %163 = vector.shape_cast %162 : vector<5xf32> to vector<5x1xf32>
    %cst_57 = arith.constant 1.280000e+02 : f32
    %164 = vector.broadcast %cst_57 : f32 to vector<5x1xf32>
    %165 = arith.divf %163, %164 : vector<5x1xf32>
    %166 = vector.broadcast %158 : vector<5x1xf32> to vector<5x128xf32>
    %167 = arith.subf %150, %166 : vector<5x128xf32>
    %cst_58 = arith.constant 9.99999997E-7 : f32
    %168 = vector.broadcast %cst_58 : f32 to vector<5x1xf32>
    %169 = arith.addf %165, %168 : vector<5x1xf32>
    %170 = math.rsqrt %169 : vector<5x1xf32>
    %171 = vector.broadcast %170 : vector<5x1xf32> to vector<5x128xf32>
    %172 = arith.mulf %167, %171 : vector<5x128xf32>
    %173 = vector.broadcast %152 : vector<1x128xf32> to vector<5x128xf32>
    %174 = arith.mulf %172, %173 : vector<5x128xf32>
    %175 = vector.broadcast %154 : vector<1x128xf32> to vector<5x128xf32>
    %176 = arith.addf %174, %175 : vector<5x128xf32>
    %177 = arith.truncf %176 : vector<5x128xf32> to vector<5x128xbf16>
    %c0_59 = arith.constant 0 : index
    %c0_60 = arith.constant 0 : index
    %c0_61 = arith.constant 0 : index
    %178 = vector.load %arg12[%c0_59, %c0_60, %c0_61] : memref<1x128x256xbf16, #tpu.memory_space<vmem>>, vector<1x128x256xbf16>
    %179 = vector.shape_cast %178 : vector<1x128x256xbf16> to vector<128x256xbf16>
    %cst_62 = arith.constant dense<0.000000e+00> : vector<5x256xf32>
    %180 = tpu.matmul %177, %179, %cst_62 {dimension_numbers = #tpu.dot_dimension_numbers<[1], [0], [0], [1], [0, 0, 1, 1], [], []>} : vector<5x128xbf16>, vector<128x256xbf16>, vector<5x256xf32> -> vector<5x256xf32>
    %c0_63 = arith.constant 0 : index
    %c0_64 = arith.constant 0 : index
    %c0_65 = arith.constant 0 : index
    %181 = vector.load %arg13[%c0_63, %c0_64, %c0_65] : memref<1x1x256xf32, #tpu.memory_space<vmem>>, vector<1x1x256xf32>
    %182 = vector.shape_cast %181 : vector<1x1x256xf32> to vector<1x256xf32>
    %183 = vector.broadcast %182 : vector<1x256xf32> to vector<5x256xf32>
    %184 = arith.addf %180, %183 : vector<5x256xf32>
    %185 = arith.mulf %184, %184 : vector<5x256xf32>
    %186 = arith.mulf %184, %185 : vector<5x256xf32>
    %cst_66 = arith.constant 4.471500e-02 : f32
    %187 = vector.broadcast %cst_66 : f32 to vector<5x256xf32>
    %188 = arith.mulf %187, %186 : vector<5x256xf32>
    %189 = arith.addf %184, %188 : vector<5x256xf32>
    %cst_67 = arith.constant 0.797884583 : f32
    %190 = vector.broadcast %cst_67 : f32 to vector<5x256xf32>
    %191 = arith.mulf %190, %189 : vector<5x256xf32>
    %192 = math.tanh %191 : vector<5x256xf32>
    %cst_68 = arith.constant 1.000000e+00 : f32
    %193 = vector.broadcast %cst_68 : f32 to vector<5x256xf32>
    %194 = arith.addf %193, %192 : vector<5x256xf32>
    %cst_69 = arith.constant 5.000000e-01 : f32
    %195 = vector.broadcast %cst_69 : f32 to vector<5x256xf32>
    %196 = arith.mulf %195, %194 : vector<5x256xf32>
    %197 = arith.mulf %184, %196 : vector<5x256xf32>
    %198 = arith.truncf %197 : vector<5x256xf32> to vector<5x256xbf16>
    %c0_70 = arith.constant 0 : index
    %c0_71 = arith.constant 0 : index
    %c0_72 = arith.constant 0 : index
    %199 = vector.load %arg14[%c0_70, %c0_71, %c0_72] : memref<1x256x128xbf16, #tpu.memory_space<vmem>>, vector<1x256x128xbf16>
    %200 = vector.shape_cast %199 : vector<1x256x128xbf16> to vector<256x128xbf16>
    %cst_73 = arith.constant dense<0.000000e+00> : vector<5x128xf32>
    %201 = tpu.matmul %198, %200, %cst_73 {dimension_numbers = #tpu.dot_dimension_numbers<[1], [0], [0], [1], [0, 0, 1, 1], [], []>} : vector<5x256xbf16>, vector<256x128xbf16>, vector<5x128xf32> -> vector<5x128xf32>
    %c0_74 = arith.constant 0 : index
    %c0_75 = arith.constant 0 : index
    %c0_76 = arith.constant 0 : index
    %202 = vector.load %arg15[%c0_74, %c0_75, %c0_76] : memref<1x1x128xf32, #tpu.memory_space<vmem>>, vector<1x1x128xf32>
    %203 = vector.shape_cast %202 : vector<1x1x128xf32> to vector<1x128xf32>
    %204 = vector.broadcast %203 : vector<1x128xf32> to vector<5x128xf32>
    %205 = arith.addf %201, %204 : vector<5x128xf32>
    %206 = arith.addf %150, %205 : vector<5x128xf32>
    %207 = vector.shape_cast %206 : vector<5x128xf32> to vector<1x5x128xf32>
    %c0_77 = arith.constant 0 : index
    %c0_78 = arith.constant 0 : index
    %c0_79 = arith.constant 0 : index
    %208 = vector.load %arg19[%c0_77, %c0_78, %c0_79] : memref<1x5x128xf32, #tpu.memory_space<vmem>>, vector<1x5x128xf32>
    tpu.vector_store %arg19[%c0_77, %c0_78, %c0_79], %207 {strides = array<i32>} : memref<1x5x128xf32, #tpu.memory_space<vmem>>, vector<1x5x128xf32>,
    %c1_i32 = arith.constant 1 : i32
    %209 = arith.cmpi eq, %arg1, %c1_i32 : i32
    %210 = arith.extui %209 : i1 to i32
    %c0_i32_80 = arith.constant 0 : i32
    %211 = arith.cmpi ne, %210, %c0_i32_80 : i32
    scf.if %211 {
      %c0_81 = arith.constant 0 : index
      %c0_82 = arith.constant 0 : index
      %212 = vector.load %arg16[%c0_81, %c0_82] : memref<1x128xf32, #tpu.memory_space<vmem>>, vector<1x128xf32>
      %c0_83 = arith.constant 0 : index
      %c0_84 = arith.constant 0 : index
      %213 = vector.load %arg17[%c0_83, %c0_84] : memref<1x128xf32, #tpu.memory_space<vmem>>, vector<1x128xf32>
      %cst_85 = arith.constant dense<0.000000e+00> : vector<5xf32>
      %214 = vector.multi_reduction <add>, %206, %cst_85 [1] : vector<5x128xf32> to vector<5xf32>
      %215 = vector.shape_cast %214 : vector<5xf32> to vector<5x1xf32>
      %cst_86 = arith.constant 1.280000e+02 : f32
      %216 = vector.broadcast %cst_86 : f32 to vector<5x1xf32>
      %217 = arith.divf %215, %216 : vector<5x1xf32>
      %218 = vector.broadcast %217 : vector<5x1xf32> to vector<5x128xf32>
      %219 = arith.subf %206, %218 : vector<5x128xf32>
      %220 = arith.mulf %219, %219 : vector<5x128xf32>
      %cst_87 = arith.constant dense<0.000000e+00> : vector<5xf32>
      %221 = vector.multi_reduction <add>, %220, %cst_87 [1] : vector<5x128xf32> to vector<5xf32>
      %222 = vector.shape_cast %221 : vector<5xf32> to vector<5x1xf32>
      %cst_88 = arith.constant 1.280000e+02 : f32
      %223 = vector.broadcast %cst_88 : f32 to vector<5x1xf32>
      %224 = arith.divf %222, %223 : vector<5x1xf32>
      %225 = vector.broadcast %217 : vector<5x1xf32> to vector<5x128xf32>
      %226 = arith.subf %206, %225 : vector<5x128xf32>
      %cst_89 = arith.constant 9.99999997E-7 : f32
      %227 = vector.broadcast %cst_89 : f32 to vector<5x1xf32>
      %228 = arith.addf %224, %227 : vector<5x1xf32>
      %229 = math.rsqrt %228 : vector<5x1xf32>
      %230 = vector.broadcast %229 : vector<5x1xf32> to vector<5x128xf32>
      %231 = arith.mulf %226, %230 : vector<5x128xf32>
      %232 = vector.broadcast %212 : vector<1x128xf32> to vector<5x128xf32>
      %233 = arith.mulf %231, %232 : vector<5x128xf32>
      %234 = vector.broadcast %213 : vector<1x128xf32> to vector<5x128xf32>
      %235 = arith.addf %233, %234 : vector<5x128xf32>
      %236 = vector.shape_cast %235 : vector<5x128xf32> to vector<1x5x128xf32>
      %c0_90 = arith.constant 0 : index
      %c0_91 = arith.constant 0 : index
      %c0_92 = arith.constant 0 : index
      %237 = vector.load %arg18[%c0_90, %c0_91, %c0_92] : memref<1x5x128xf32, #tpu.memory_space<vmem>>, vector<1x5x128xf32>
      tpu.vector_store %arg18[%c0_90, %c0_91, %c0_92], %236 {strides = array<i32>} : memref<1x5x128xf32, #tpu.memory_space<vmem>>, vector<1x5x128xf32>,
    } else {
    }
    return
  }
  func.func @transform_0(%arg0: i32, %arg1: i32) -> (i32, i32, i32) {
    %c0_i32 = arith.constant 0 : i32
    %c0_i32_0 = arith.constant 0 : i32
    %c0_i32_1 = arith.constant 0 : i32
    return %arg0, %c0_i32, %c0_i32_0 : i32, i32, i32
  }
  func.func @transform_1(%arg0: i32, %arg1: i32) -> (i32, i32, i32) {
    %c0_i32 = arith.constant 0 : i32
    %c0_i32_0 = arith.constant 0 : i32
    %c0_i32_1 = arith.constant 0 : i32
    %c0_i32_2 = arith.constant 0 : i32
    return %c0_i32, %c0_i32_0, %c0_i32_1 : i32, i32, i32
  }
  func.func @transform_2(%arg0: i32, %arg1: i32) -> (i32, i32, i32) {
    %c0_i32 = arith.constant 0 : i32
    %c0_i32_0 = arith.constant 0 : i32
    %c0_i32_1 = arith.constant 0 : i32
    return %arg1, %c0_i32, %c0_i32_0 : i32, i32, i32
  }
  func.func @transform_3(%arg0: i32, %arg1: i32) -> (i32, i32, i32) {
    %c0_i32 = arith.constant 0 : i32
    %c0_i32_0 = arith.constant 0 : i32
    %c0_i32_1 = arith.constant 0 : i32
    return %arg1, %c0_i32, %c0_i32_0 : i32, i32, i32
  }
  func.func @transform_4(%arg0: i32, %arg1: i32) -> (i32, i32, i32) {
    %c0_i32 = arith.constant 0 : i32
    %c0_i32_0 = arith.constant 0 : i32
    %c0_i32_1 = arith.constant 0 : i32
    return %arg1, %c0_i32, %c0_i32_0 : i32, i32, i32
  }
  func.func @transform_5(%arg0: i32, %arg1: i32) -> (i32, i32, i32) {
    %c0_i32 = arith.constant 0 : i32
    %c0_i32_0 = arith.constant 0 : i32
    %c0_i32_1 = arith.constant 0 : i32
    return %arg1, %c0_i32, %c0_i32_0 : i32, i32, i32
  }
  func.func @transform_6(%arg0: i32, %arg1: i32) -> (i32, i32, i32) {
    %c0_i32 = arith.constant 0 : i32
    %c0_i32_0 = arith.constant 0 : i32
    %c0_i32_1 = arith.constant 0 : i32
    return %arg1, %c0_i32, %c0_i32_0 : i32, i32, i32
  }
  func.func @transform_7(%arg0: i32, %arg1: i32) -> (i32, i32, i32) {
    %c0_i32 = arith.constant 0 : i32
    %c0_i32_0 = arith.constant 0 : i32
    %c0_i32_1 = arith.constant 0 : i32
    return %arg1, %c0_i32, %c0_i32_0 : i32, i32, i32
  }
  func.func @transform_8(%arg0: i32, %arg1: i32) -> (i32, i32, i32) {
    %c0_i32 = arith.constant 0 : i32
    %c0_i32_0 = arith.constant 0 : i32
    %c0_i32_1 = arith.constant 0 : i32
    return %arg1, %c0_i32, %c0_i32_0 : i32, i32, i32
  }
  func.func @transform_9(%arg0: i32, %arg1: i32) -> (i32, i32, i32) {
    %c0_i32 = arith.constant 0 : i32
    %c0_i32_0 = arith.constant 0 : i32
    %c0_i32_1 = arith.constant 0 : i32
    return %arg1, %c0_i32, %c0_i32_0 : i32, i32, i32
  }
  func.func @transform_10(%arg0: i32, %arg1: i32) -> (i32, i32, i32) {
    %c0_i32 = arith.constant 0 : i32
    %c0_i32_0 = arith.constant 0 : i32
    %c0_i32_1 = arith.constant 0 : i32
    return %arg1, %c0_i32, %c0_i32_0 : i32, i32, i32
  }
  func.func @transform_11(%arg0: i32, %arg1: i32) -> (i32, i32, i32) {
    %c0_i32 = arith.constant 0 : i32
    %c0_i32_0 = arith.constant 0 : i32
    %c0_i32_1 = arith.constant 0 : i32
    return %arg1, %c0_i32, %c0_i32_0 : i32, i32, i32
  }
  func.func @transform_12(%arg0: i32, %arg1: i32) -> (i32, i32, i32) {
    %c0_i32 = arith.constant 0 : i32
    %c0_i32_0 = arith.constant 0 : i32
    %c0_i32_1 = arith.constant 0 : i32
    return %arg1, %c0_i32, %c0_i32_0 : i32, i32, i32
  }
  func.func @transform_13(%arg0: i32, %arg1: i32) -> (i32, i32, i32) {
    %c0_i32 = arith.constant 0 : i32
    %c0_i32_0 = arith.constant 0 : i32
    %c0_i32_1 = arith.constant 0 : i32
    return %arg1, %c0_i32, %c0_i32_0 : i32, i32, i32
  }
  func.func @transform_14(%arg0: i32, %arg1: i32) -> (i32, i32) {
    %c0_i32 = arith.constant 0 : i32
    %c0_i32_0 = arith.constant 0 : i32
    %c0_i32_1 = arith.constant 0 : i32
    return %c0_i32, %c0_i32_0 : i32, i32
  }
  func.func @transform_15(%arg0: i32, %arg1: i32) -> (i32, i32) {
    %c0_i32 = arith.constant 0 : i32
    %c0_i32_0 = arith.constant 0 : i32
    %c0_i32_1 = arith.constant 0 : i32
    return %c0_i32, %c0_i32_0 : i32, i32
  }
  func.func @transform_16(%arg0: i32, %arg1: i32) -> (i32, i32, i32) {
    %c0_i32 = arith.constant 0 : i32
    %c0_i32_0 = arith.constant 0 : i32
    %c0_i32_1 = arith.constant 0 : i32
    return %arg0, %c0_i32, %c0_i32_0 : i32, i32, i32
  }
}

module attributes {stable_mosaic.version = 11 : i64} {
  func.func @_cos_head_kernel(%arg0: memref<2x128xf32, #tpu.memory_space<vmem>>, %arg1: memref<128x128xbf16, #tpu.memory_space<vmem>>, %arg2: memref<2x128xf32, #tpu.memory_space<vmem>>) attributes {dimension_semantics = [], scalar_prefetch = 0 : i64, scratch_operands = 0 : i64, tpu.core_type = #tpu.core_type<tc>} {
    %c0 = arith.constant 0 : index
    %c0_0 = arith.constant 0 : index
    %0 = vector.load %arg0[%c0, %c0_0] : memref<2x128xf32, #tpu.memory_space<vmem>>, vector<2x128xf32>
    %c0_1 = arith.constant 0 : index
    %c0_2 = arith.constant 0 : index
    %1 = vector.load %arg1[%c0_1, %c0_2] : memref<128x128xbf16, #tpu.memory_space<vmem>>, vector<128x128xbf16>
    %2 = arith.extf %1 : vector<128x128xbf16> to vector<128x128xf32>
    %3 = arith.mulf %0, %0 : vector<2x128xf32>
    %cst = arith.constant dense<0.000000e+00> : vector<2xf32>
    %4 = vector.multi_reduction <add>, %3, %cst [1] : vector<2x128xf32> to vector<2xf32>
    %5 = vector.shape_cast %4 : vector<2xf32> to vector<2x1xf32>
    %cst_3 = arith.constant 1.000000e-24 : f32
    %6 = vector.broadcast %cst_3 : f32 to vector<2x1xf32>
    %7 = arith.maximumf %5, %6 : vector<2x1xf32>
    %8 = math.rsqrt %7 : vector<2x1xf32>
    %9 = vector.broadcast %8 : vector<2x1xf32> to vector<2x128xf32>
    %10 = arith.mulf %0, %9 : vector<2x128xf32>
    %11 = arith.mulf %2, %2 : vector<128x128xf32>
    %cst_4 = arith.constant dense<0.000000e+00> : vector<128xf32>
    %12 = vector.multi_reduction <add>, %11, %cst_4 [1] : vector<128x128xf32> to vector<128xf32>
    %13 = vector.shape_cast %12 : vector<128xf32> to vector<128x1xf32>
    %cst_5 = arith.constant 1.000000e-24 : f32
    %14 = vector.broadcast %cst_5 : f32 to vector<128x1xf32>
    %15 = arith.maximumf %13, %14 : vector<128x1xf32>
    %16 = math.rsqrt %15 : vector<128x1xf32>
    %17 = vector.broadcast %16 : vector<128x1xf32> to vector<128x128xf32>
    %18 = arith.mulf %2, %17 : vector<128x128xf32>
    %19 = arith.truncf %10 : vector<2x128xf32> to vector<2x128xbf16>
    %20 = arith.truncf %18 : vector<128x128xf32> to vector<128x128xbf16>
    %cst_6 = arith.constant dense<0.000000e+00> : vector<2x128xf32>
    %21 = tpu.matmul %19, %20, %cst_6 {dimension_numbers = #tpu.dot_dimension_numbers<[1], [1], [0], [0], [0, 0, 1, 0], [], []>} : vector<2x128xbf16>, vector<128x128xbf16>, vector<2x128xf32> -> vector<2x128xf32>
    %cst_7 = arith.constant 1.600000e+01 : f32
    %22 = vector.broadcast %cst_7 : f32 to vector<2x128xf32>
    %23 = arith.mulf %22, %21 : vector<2x128xf32>
    %c0_8 = arith.constant 0 : index
    %c0_9 = arith.constant 0 : index
    %24 = vector.load %arg2[%c0_8, %c0_9] : memref<2x128xf32, #tpu.memory_space<vmem>>, vector<2x128xf32>
    tpu.vector_store %arg2[%c0_8, %c0_9], %23 {strides = array<i32>} : memref<2x128xf32, #tpu.memory_space<vmem>>, vector<2x128xf32>,
    return
  }
}

module attributes {stable_mosaic.version = 11 : i64} {
  func.func @_linear_kernel(%arg0: memref<32x128xbf16, #tpu.memory_space<vmem>>, %arg1: memref<128x192xbf16, #tpu.memory_space<vmem>>, %arg2: memref<1x192xf32, #tpu.memory_space<vmem>>, %arg3: memref<32x192xf32, #tpu.memory_space<vmem>>) attributes {dimension_semantics = [], scalar_prefetch = 0 : i64, scratch_operands = 0 : i64, tpu.core_type = #tpu.core_type<tc>} {
    %c0 = arith.constant 0 : index
    %c0_0 = arith.constant 0 : index
    %0 = vector.load %arg0[%c0, %c0_0] : memref<32x128xbf16, #tpu.memory_space<vmem>>, vector<32x128xbf16>
    %c0_1 = arith.constant 0 : index
    %c0_2 = arith.constant 0 : index
    %1 = vector.load %arg1[%c0_1, %c0_2] : memref<128x192xbf16, #tpu.memory_space<vmem>>, vector<128x192xbf16>
    %cst = arith.constant dense<0.000000e+00> : vector<32x192xf32>
    %2 = tpu.matmul %0, %1, %cst {dimension_numbers = #tpu.dot_dimension_numbers<[1], [0], [0], [1], [0, 0, 1, 1], [], []>} : vector<32x128xbf16>, vector<128x192xbf16>, vector<32x192xf32> -> vector<32x192xf32>
    %c0_3 = arith.constant 0 : index
    %c0_4 = arith.constant 0 : index
    %3 = vector.load %arg2[%c0_3, %c0_4] : memref<1x192xf32, #tpu.memory_space<vmem>>, vector<1x192xf32>
    %4 = vector.broadcast %3 : vector<1x192xf32> to vector<32x192xf32>
    %5 = arith.addf %2, %4 : vector<32x192xf32>
    %c0_5 = arith.constant 0 : index
    %c0_6 = arith.constant 0 : index
    %6 = vector.load %arg3[%c0_5, %c0_6] : memref<32x192xf32, #tpu.memory_space<vmem>>, vector<32x192xf32>
    tpu.vector_store %arg3[%c0_5, %c0_6], %5 {strides = array<i32>} : memref<32x192xf32, #tpu.memory_space<vmem>>, vector<32x192xf32>,
    return
  }
}

module attributes {stable_mosaic.version = 11 : i64} {
  func.func @_stack_block_kernel(%arg0: i32, %arg1: i32, %arg2: memref<1x17x128xbf16, #tpu.memory_space<vmem>>, %arg3: memref<1x17x128xf32, #tpu.memory_space<vmem>>, %arg4: memref<1x1x128xf32, #tpu.memory_space<vmem>>, %arg5: memref<1x1x128xf32, #tpu.memory_space<vmem>>, %arg6: memref<1x128x384xbf16, #tpu.memory_space<vmem>>, %arg7: memref<1x1x384xf32, #tpu.memory_space<vmem>>, %arg8: memref<1x128x128xbf16, #tpu.memory_space<vmem>>, %arg9: memref<1x1x128xf32, #tpu.memory_space<vmem>>, %arg10: memref<1x1x128xf32, #tpu.memory_space<vmem>>, %arg11: memref<1x1x128xf32, #tpu.memory_space<vmem>>, %arg12: memref<1x128x256xbf16, #tpu.memory_space<vmem>>, %arg13: memref<1x1x256xf32, #tpu.memory_space<vmem>>, %arg14: memref<1x256x128xbf16, #tpu.memory_space<vmem>>, %arg15: memref<1x1x128xf32, #tpu.memory_space<vmem>>, %arg16: memref<1x128xf32, #tpu.memory_space<vmem>>, %arg17: memref<1x128xf32, #tpu.memory_space<vmem>>, %arg18: memref<1x17x128xbf16, #tpu.memory_space<vmem>>, %arg19: memref<1x17x128xf32, #tpu.memory_space<vmem>>) attributes {dimension_semantics = [#tpu.dimension_semantics<parallel>, #tpu.dimension_semantics<arbitrary>], iteration_bounds = array<i64: 2, 2>, scalar_prefetch = 0 : i64, scratch_operands = 1 : i64, tpu.core_type = #tpu.core_type<tc>, window_params = [{transform_indices = @transform_0, window_bounds = array<i64: 1, 17, 128>}, {pipeline_mode = #tpu.pipeline_mode<synchronous>, transform_indices = @transform_1, window_bounds = array<i64: 1, 17, 128>}, {transform_indices = @transform_2, window_bounds = array<i64: 1, 1, 128>}, {transform_indices = @transform_3, window_bounds = array<i64: 1, 1, 128>}, {transform_indices = @transform_4, window_bounds = array<i64: 1, 128, 384>}, {transform_indices = @transform_5, window_bounds = array<i64: 1, 1, 384>}, {transform_indices = @transform_6, window_bounds = array<i64: 1, 128, 128>}, {transform_indices = @transform_7, window_bounds = array<i64: 1, 1, 128>}, {transform_indices = @transform_8, window_bounds = array<i64: 1, 1, 128>}, {transform_indices = @transform_9, window_bounds = array<i64: 1, 1, 128>}, {transform_indices = @transform_10, window_bounds = array<i64: 1, 128, 256>}, {transform_indices = @transform_11, window_bounds = array<i64: 1, 1, 256>}, {transform_indices = @transform_12, window_bounds = array<i64: 1, 256, 128>}, {transform_indices = @transform_13, window_bounds = array<i64: 1, 1, 128>}, {pipeline_mode = #tpu.pipeline_mode<synchronous>, transform_indices = @transform_14, window_bounds = array<i64: 1, 128>}, {pipeline_mode = #tpu.pipeline_mode<synchronous>, transform_indices = @transform_15, window_bounds = array<i64: 1, 128>}, {transform_indices = @transform_16, window_bounds = array<i64: 1, 17, 128>}]} {
    %c0_i32 = arith.constant 0 : i32
    %0 = arith.cmpi eq, %arg1, %c0_i32 : i32
    %1 = arith.extui %0 : i1 to i32
    %c0_i32_0 = arith.constant 0 : i32
    %2 = arith.cmpi ne, %1, %c0_i32_0 : i32
    scf.if %2 {
      %c0_81 = arith.constant 0 : index
      %c0_82 = arith.constant 0 : index
      %c0_83 = arith.constant 0 : index
      %212 = vector.load %arg2[%c0_81, %c0_82, %c0_83] : memref<1x17x128xbf16, #tpu.memory_space<vmem>>, vector<1x17x128xbf16>
      %213 = arith.extf %212 : vector<1x17x128xbf16> to vector<1x17x128xf32>
      %c0_84 = arith.constant 0 : index
      %c0_85 = arith.constant 0 : index
      %c0_86 = arith.constant 0 : index
      %214 = vector.load %arg3[%c0_84, %c0_85, %c0_86] : memref<1x17x128xf32, #tpu.memory_space<vmem>>, vector<1x17x128xf32>
      %215 = arith.addf %213, %214 : vector<1x17x128xf32>
      %c0_87 = arith.constant 0 : index
      %c0_88 = arith.constant 0 : index
      %c0_89 = arith.constant 0 : index
      %216 = vector.load %arg19[%c0_87, %c0_88, %c0_89] : memref<1x17x128xf32, #tpu.memory_space<vmem>>, vector<1x17x128xf32>
      tpu.vector_store %arg19[%c0_87, %c0_88, %c0_89], %215 {strides = array<i32>} : memref<1x17x128xf32, #tpu.memory_space<vmem>>, vector<1x17x128xf32>,
    } else {
    }
    %c0 = arith.constant 0 : index
    %c0_1 = arith.constant 0 : index
    %c0_2 = arith.constant 0 : index
    %3 = vector.load %arg19[%c0, %c0_1, %c0_2] : memref<1x17x128xf32, #tpu.memory_space<vmem>>, vector<1x17x128xf32>
    %4 = vector.shape_cast %3 : vector<1x17x128xf32> to vector<17x128xf32>
    %c0_3 = arith.constant 0 : index
    %c0_4 = arith.constant 0 : index
    %c0_5 = arith.constant 0 : index
    %5 = vector.load %arg4[%c0_3, %c0_4, %c0_5] : memref<1x1x128xf32, #tpu.memory_space<vmem>>, vector<1x1x128xf32>
    %6 = vector.shape_cast %5 : vector<1x1x128xf32> to vector<1x128xf32>
    %c0_6 = arith.constant 0 : index
    %c0_7 = arith.constant 0 : index
    %c0_8 = arith.constant 0 : index
    %7 = vector.load %arg5[%c0_6, %c0_7, %c0_8] : memref<1x1x128xf32, #tpu.memory_space<vmem>>, vector<1x1x128xf32>
    %8 = vector.shape_cast %7 : vector<1x1x128xf32> to vector<1x128xf32>
    %cst = arith.constant dense<0.000000e+00> : vector<17xf32>
    %9 = vector.multi_reduction <add>, %4, %cst [1] : vector<17x128xf32> to vector<17xf32>
    %10 = vector.shape_cast %9 : vector<17xf32> to vector<17x1xf32>
    %cst_9 = arith.constant 1.280000e+02 : f32
    %11 = vector.broadcast %cst_9 : f32 to vector<17x1xf32>
    %12 = arith.divf %10, %11 : vector<17x1xf32>
    %13 = vector.broadcast %12 : vector<17x1xf32> to vector<17x128xf32>
    %14 = arith.subf %4, %13 : vector<17x128xf32>
    %15 = arith.mulf %14, %14 : vector<17x128xf32>
    %cst_10 = arith.constant dense<0.000000e+00> : vector<17xf32>
    %16 = vector.multi_reduction <add>, %15, %cst_10 [1] : vector<17x128xf32> to vector<17xf32>
    %17 = vector.shape_cast %16 : vector<17xf32> to vector<17x1xf32>
    %cst_11 = arith.constant 1.280000e+02 : f32
    %18 = vector.broadcast %cst_11 : f32 to vector<17x1xf32>
    %19 = arith.divf %17, %18 : vector<17x1xf32>
    %20 = vector.broadcast %12 : vector<17x1xf32> to vector<17x128xf32>
    %21 = arith.subf %4, %20 : vector<17x128xf32>
    %cst_12 = arith.constant 9.99999997E-7 : f32
    %22 = vector.broadcast %cst_12 : f32 to vector<17x1xf32>
    %23 = arith.addf %19, %22 : vector<17x1xf32>
    %24 = math.rsqrt %23 : vector<17x1xf32>
    %25 = vector.broadcast %24 : vector<17x1xf32> to vector<17x128xf32>
    %26 = arith.mulf %21, %25 : vector<17x128xf32>
    %27 = vector.broadcast %6 : vector<1x128xf32> to vector<17x128xf32>
    %28 = arith.mulf %26, %27 : vector<17x128xf32>
    %29 = vector.broadcast %8 : vector<1x128xf32> to vector<17x128xf32>
    %30 = arith.addf %28, %29 : vector<17x128xf32>
    %31 = arith.truncf %30 : vector<17x128xf32> to vector<17x128xbf16>
    %c0_13 = arith.constant 0 : index
    %c0_14 = arith.constant 0 : index
    %c0_15 = arith.constant 0 : index
    %32 = vector.load %arg6[%c0_13, %c0_14, %c0_15] : memref<1x128x384xbf16, #tpu.memory_space<vmem>>, vector<1x128x384xbf16>
    %33 = vector.shape_cast %32 : vector<1x128x384xbf16> to vector<128x384xbf16>
    %cst_16 = arith.constant dense<0.000000e+00> : vector<17x384xf32>
    %34 = tpu.matmul %31, %33, %cst_16 {dimension_numbers = #tpu.dot_dimension_numbers<[1], [0], [0], [1], [0, 0, 1, 1], [], []>} : vector<17x128xbf16>, vector<128x384xbf16>, vector<17x384xf32> -> vector<17x384xf32>
    %c0_17 = arith.constant 0 : index
    %c0_18 = arith.constant 0 : index
    %c0_19 = arith.constant 0 : index
    %35 = vector.load %arg7[%c0_17, %c0_18, %c0_19] : memref<1x1x384xf32, #tpu.memory_space<vmem>>, vector<1x1x384xf32>
    %36 = vector.shape_cast %35 : vector<1x1x384xf32> to vector<1x384xf32>
    %37 = vector.broadcast %36 : vector<1x384xf32> to vector<17x384xf32>
    %38 = arith.addf %34, %37 : vector<17x384xf32>
    %39 = vector.extract_strided_slice %38 {offsets = [0, 0], sizes = [17, 128], strides = [1, 1]} : vector<17x384xf32> to vector<17x128xf32>
    %cst_20 = arith.constant 0.176776692 : f32
    %40 = vector.broadcast %cst_20 : f32 to vector<17x128xf32>
    %41 = arith.mulf %39, %40 : vector<17x128xf32>
    %42 = vector.shape_cast %41 : vector<17x128xf32> to vector<1x17x128xf32>
    %43 = vector.extract_strided_slice %38 {offsets = [0, 128], sizes = [17, 128], strides = [1, 1]} : vector<17x384xf32> to vector<17x128xf32>
    %44 = vector.shape_cast %43 : vector<17x128xf32> to vector<1x17x128xf32>
    %45 = vector.extract_strided_slice %38 {offsets = [0, 256], sizes = [17, 128], strides = [1, 1]} : vector<17x384xf32> to vector<17x128xf32>
    %46 = vector.shape_cast %45 : vector<17x128xf32> to vector<1x17x128xf32>
    %c0_21 = arith.constant 0 : index
    %c0_22 = arith.constant 0 : index
    %c0_23 = arith.constant 0 : index
    %47 = vector.load %arg8[%c0_21, %c0_22, %c0_23] : memref<1x128x128xbf16, #tpu.memory_space<vmem>>, vector<1x128x128xbf16>
    %48 = vector.shape_cast %47 : vector<1x128x128xbf16> to vector<128x128xbf16>
    %cst_24 = arith.constant 0.000000e+00 : f32
    %49 = vector.broadcast %cst_24 : f32 to vector<17x128xf32>
    %50 = vector.extract_strided_slice %42 {offsets = [0, 0, 0], sizes = [1, 17, 32], strides = [1, 1, 1]} : vector<1x17x128xf32> to vector<1x17x32xf32>
    %51 = arith.truncf %50 : vector<1x17x32xf32> to vector<1x17x32xbf16>
    %52 = vector.extract_strided_slice %44 {offsets = [0, 0, 0], sizes = [1, 17, 32], strides = [1, 1, 1]} : vector<1x17x128xf32> to vector<1x17x32xf32>
    %53 = arith.truncf %52 : vector<1x17x32xf32> to vector<1x17x32xbf16>
    %54 = vector.extract_strided_slice %46 {offsets = [0, 0, 0], sizes = [1, 17, 32], strides = [1, 1, 1]} : vector<1x17x128xf32> to vector<1x17x32xf32>
    %55 = arith.truncf %54 : vector<1x17x32xf32> to vector<1x17x32xbf16>
    "tpu.trace_start"() <{level = 10 : i32, message = "bqd,bkd->bqk"}> : () -> ()
    %cst_25 = arith.constant dense<0.000000e+00> : vector<1x17x17xf32>
    %56 = tpu.matmul %51, %53, %cst_25 {dimension_numbers = #tpu.dot_dimension_numbers<[2], [2], [1], [1], [0, 0, 0, 1, 1, 1], [0], [0]>} : vector<1x17x32xbf16>, vector<1x17x32xbf16>, vector<1x17x17xf32> -> vector<1x17x17xf32>
    "tpu.trace_stop"() : () -> ()
    %cst_26 = arith.constant dense<0xFF800000> : vector<1x17xf32>
    %57 = vector.multi_reduction <maximumf>, %56, %cst_26 [2] : vector<1x17x17xf32> to vector<1x17xf32>
    %58 = vector.shape_cast %57 : vector<1x17xf32> to vector<1x17x1xf32>
    %59 = vector.broadcast %58 : vector<1x17x1xf32> to vector<1x17x17xf32>
    %60 = arith.subf %56, %59 : vector<1x17x17xf32>
    %61 = math.exp %60 : vector<1x17x17xf32>
    %cst_27 = arith.constant dense<0.000000e+00> : vector<1x17xf32>
    %62 = vector.multi_reduction <add>, %61, %cst_27 [2] : vector<1x17x17xf32> to vector<1x17xf32>
    %63 = vector.shape_cast %62 : vector<1x17xf32> to vector<1x17x1xf32>
    %64 = tpu.reciprocal %63 {approx = true} : vector<1x17x1xf32> -> vector<1x17x1xf32>
    %65 = vector.broadcast %64 : vector<1x17x1xf32> to vector<1x17x17xf32>
    %66 = arith.mulf %61, %65 : vector<1x17x17xf32>
    %67 = arith.truncf %66 : vector<1x17x17xf32> to vector<1x17x17xbf16>
    "tpu.trace_start"() <{level = 10 : i32, message = "bqk,bkd->bqd"}> : () -> ()
    %cst_28 = arith.constant dense<0.000000e+00> : vector<1x17x32xf32>
    %68 = tpu.matmul %67, %55, %cst_28 {dimension_numbers = #tpu.dot_dimension_numbers<[2], [1], [1], [2], [0, 0, 0, 1, 1, 2], [0], [0]>} : vector<1x17x17xbf16>, vector<1x17x32xbf16>, vector<1x17x32xf32> -> vector<1x17x32xf32>
    "tpu.trace_stop"() : () -> ()
    %69 = vector.shape_cast %68 : vector<1x17x32xf32> to vector<17x32xf32>
    %70 = arith.truncf %69 : vector<17x32xf32> to vector<17x32xbf16>
    %71 = vector.extract_strided_slice %48 {offsets = [0, 0], sizes = [32, 128], strides = [1, 1]} : vector<128x128xbf16> to vector<32x128xbf16>
    %cst_29 = arith.constant dense<0.000000e+00> : vector<17x128xf32>
    %72 = tpu.matmul %70, %71, %cst_29 {dimension_numbers = #tpu.dot_dimension_numbers<[1], [0], [0], [1], [0, 0, 1, 1], [], []>} : vector<17x32xbf16>, vector<32x128xbf16>, vector<17x128xf32> -> vector<17x128xf32>
    %73 = arith.addf %49, %72 : vector<17x128xf32>
    %74 = vector.extract_strided_slice %42 {offsets = [0, 0, 32], sizes = [1, 17, 32], strides = [1, 1, 1]} : vector<1x17x128xf32> to vector<1x17x32xf32>
    %75 = arith.truncf %74 : vector<1x17x32xf32> to vector<1x17x32xbf16>
    %76 = vector.extract_strided_slice %44 {offsets = [0, 0, 32], sizes = [1, 17, 32], strides = [1, 1, 1]} : vector<1x17x128xf32> to vector<1x17x32xf32>
    %77 = arith.truncf %76 : vector<1x17x32xf32> to vector<1x17x32xbf16>
    %78 = vector.extract_strided_slice %46 {offsets = [0, 0, 32], sizes = [1, 17, 32], strides = [1, 1, 1]} : vector<1x17x128xf32> to vector<1x17x32xf32>
    %79 = arith.truncf %78 : vector<1x17x32xf32> to vector<1x17x32xbf16>
    "tpu.trace_start"() <{level = 10 : i32, message = "bqd,bkd->bqk"}> : () -> ()
    %cst_30 = arith.constant dense<0.000000e+00> : vector<1x17x17xf32>
    %80 = tpu.matmul %75, %77, %cst_30 {dimension_numbers = #tpu.dot_dimension_numbers<[2], [2], [1], [1], [0, 0, 0, 1, 1, 1], [0], [0]>} : vector<1x17x32xbf16>, vector<1x17x32xbf16>, vector<1x17x17xf32> -> vector<1x17x17xf32>
    "tpu.trace_stop"() : () -> ()
    %cst_31 = arith.constant dense<0xFF800000> : vector<1x17xf32>
    %81 = vector.multi_reduction <maximumf>, %80, %cst_31 [2] : vector<1x17x17xf32> to vector<1x17xf32>
    %82 = vector.shape_cast %81 : vector<1x17xf32> to vector<1x17x1xf32>
    %83 = vector.broadcast %82 : vector<1x17x1xf32> to vector<1x17x17xf32>
    %84 = arith.subf %80, %83 : vector<1x17x17xf32>
    %85 = math.exp %84 : vector<1x17x17xf32>
    %cst_32 = arith.constant dense<0.000000e+00> : vector<1x17xf32>
    %86 = vector.multi_reduction <add>, %85, %cst_32 [2] : vector<1x17x17xf32> to vector<1x17xf32>
    %87 = vector.shape_cast %86 : vector<1x17xf32> to vector<1x17x1xf32>
    %88 = tpu.reciprocal %87 {approx = true} : vector<1x17x1xf32> -> vector<1x17x1xf32>
    %89 = vector.broadcast %88 : vector<1x17x1xf32> to vector<1x17x17xf32>
    %90 = arith.mulf %85, %89 : vector<1x17x17xf32>
    %91 = arith.truncf %90 : vector<1x17x17xf32> to vector<1x17x17xbf16>
    "tpu.trace_start"() <{level = 10 : i32, message = "bqk,bkd->bqd"}> : () -> ()
    %cst_33 = arith.constant dense<0.000000e+00> : vector<1x17x32xf32>
    %92 = tpu.matmul %91, %79, %cst_33 {dimension_numbers = #tpu.dot_dimension_numbers<[2], [1], [1], [2], [0, 0, 0, 1, 1, 2], [0], [0]>} : vector<1x17x17xbf16>, vector<1x17x32xbf16>, vector<1x17x32xf32> -> vector<1x17x32xf32>
    "tpu.trace_stop"() : () -> ()
    %93 = vector.shape_cast %92 : vector<1x17x32xf32> to vector<17x32xf32>
    %94 = arith.truncf %93 : vector<17x32xf32> to vector<17x32xbf16>
    %95 = vector.extract_strided_slice %48 {offsets = [32, 0], sizes = [32, 128], strides = [1, 1]} : vector<128x128xbf16> to vector<32x128xbf16>
    %cst_34 = arith.constant dense<0.000000e+00> : vector<17x128xf32>
    %96 = tpu.matmul %94, %95, %cst_34 {dimension_numbers = #tpu.dot_dimension_numbers<[1], [0], [0], [1], [0, 0, 1, 1], [], []>} : vector<17x32xbf16>, vector<32x128xbf16>, vector<17x128xf32> -> vector<17x128xf32>
    %97 = arith.addf %73, %96 : vector<17x128xf32>
    %98 = vector.extract_strided_slice %42 {offsets = [0, 0, 64], sizes = [1, 17, 32], strides = [1, 1, 1]} : vector<1x17x128xf32> to vector<1x17x32xf32>
    %99 = arith.truncf %98 : vector<1x17x32xf32> to vector<1x17x32xbf16>
    %100 = vector.extract_strided_slice %44 {offsets = [0, 0, 64], sizes = [1, 17, 32], strides = [1, 1, 1]} : vector<1x17x128xf32> to vector<1x17x32xf32>
    %101 = arith.truncf %100 : vector<1x17x32xf32> to vector<1x17x32xbf16>
    %102 = vector.extract_strided_slice %46 {offsets = [0, 0, 64], sizes = [1, 17, 32], strides = [1, 1, 1]} : vector<1x17x128xf32> to vector<1x17x32xf32>
    %103 = arith.truncf %102 : vector<1x17x32xf32> to vector<1x17x32xbf16>
    "tpu.trace_start"() <{level = 10 : i32, message = "bqd,bkd->bqk"}> : () -> ()
    %cst_35 = arith.constant dense<0.000000e+00> : vector<1x17x17xf32>
    %104 = tpu.matmul %99, %101, %cst_35 {dimension_numbers = #tpu.dot_dimension_numbers<[2], [2], [1], [1], [0, 0, 0, 1, 1, 1], [0], [0]>} : vector<1x17x32xbf16>, vector<1x17x32xbf16>, vector<1x17x17xf32> -> vector<1x17x17xf32>
    "tpu.trace_stop"() : () -> ()
    %cst_36 = arith.constant dense<0xFF800000> : vector<1x17xf32>
    %105 = vector.multi_reduction <maximumf>, %104, %cst_36 [2] : vector<1x17x17xf32> to vector<1x17xf32>
    %106 = vector.shape_cast %105 : vector<1x17xf32> to vector<1x17x1xf32>
    %107 = vector.broadcast %106 : vector<1x17x1xf32> to vector<1x17x17xf32>
    %108 = arith.subf %104, %107 : vector<1x17x17xf32>
    %109 = math.exp %108 : vector<1x17x17xf32>
    %cst_37 = arith.constant dense<0.000000e+00> : vector<1x17xf32>
    %110 = vector.multi_reduction <add>, %109, %cst_37 [2] : vector<1x17x17xf32> to vector<1x17xf32>
    %111 = vector.shape_cast %110 : vector<1x17xf32> to vector<1x17x1xf32>
    %112 = tpu.reciprocal %111 {approx = true} : vector<1x17x1xf32> -> vector<1x17x1xf32>
    %113 = vector.broadcast %112 : vector<1x17x1xf32> to vector<1x17x17xf32>
    %114 = arith.mulf %109, %113 : vector<1x17x17xf32>
    %115 = arith.truncf %114 : vector<1x17x17xf32> to vector<1x17x17xbf16>
    "tpu.trace_start"() <{level = 10 : i32, message = "bqk,bkd->bqd"}> : () -> ()
    %cst_38 = arith.constant dense<0.000000e+00> : vector<1x17x32xf32>
    %116 = tpu.matmul %115, %103, %cst_38 {dimension_numbers = #tpu.dot_dimension_numbers<[2], [1], [1], [2], [0, 0, 0, 1, 1, 2], [0], [0]>} : vector<1x17x17xbf16>, vector<1x17x32xbf16>, vector<1x17x32xf32> -> vector<1x17x32xf32>
    "tpu.trace_stop"() : () -> ()
    %117 = vector.shape_cast %116 : vector<1x17x32xf32> to vector<17x32xf32>
    %118 = arith.truncf %117 : vector<17x32xf32> to vector<17x32xbf16>
    %119 = vector.extract_strided_slice %48 {offsets = [64, 0], sizes = [32, 128], strides = [1, 1]} : vector<128x128xbf16> to vector<32x128xbf16>
    %cst_39 = arith.constant dense<0.000000e+00> : vector<17x128xf32>
    %120 = tpu.matmul %118, %119, %cst_39 {dimension_numbers = #tpu.dot_dimension_numbers<[1], [0], [0], [1], [0, 0, 1, 1], [], []>} : vector<17x32xbf16>, vector<32x128xbf16>, vector<17x128xf32> -> vector<17x128xf32>
    %121 = arith.addf %97, %120 : vector<17x128xf32>
    %122 = vector.extract_strided_slice %42 {offsets = [0, 0, 96], sizes = [1, 17, 32], strides = [1, 1, 1]} : vector<1x17x128xf32> to vector<1x17x32xf32>
    %123 = arith.truncf %122 : vector<1x17x32xf32> to vector<1x17x32xbf16>
    %124 = vector.extract_strided_slice %44 {offsets = [0, 0, 96], sizes = [1, 17, 32], strides = [1, 1, 1]} : vector<1x17x128xf32> to vector<1x17x32xf32>
    %125 = arith.truncf %124 : vector<1x17x32xf32> to vector<1x17x32xbf16>
    %126 = vector.extract_strided_slice %46 {offsets = [0, 0, 96], sizes = [1, 17, 32], strides = [1, 1, 1]} : vector<1x17x128xf32> to vector<1x17x32xf32>
    %127 = arith.truncf %126 : vector<1x17x32xf32> to vector<1x17x32xbf16>
    "tpu.trace_start"() <{level = 10 : i32, message = "bqd,bkd->bqk"}> : () -> ()
    %cst_40 = arith.constant dense<0.000000e+00> : vector<1x17x17xf32>
    %128 = tpu.matmul %123, %125, %cst_40 {dimension_numbers = #tpu.dot_dimension_numbers<[2], [2], [1], [1], [0, 0, 0, 1, 1, 1], [0], [0]>} : vector<1x17x32xbf16>, vector<1x17x32xbf16>, vector<1x17x17xf32> -> vector<1x17x17xf32>
    "tpu.trace_stop"() : () -> ()
    %cst_41 = arith.constant dense<0xFF800000> : vector<1x17xf32>
    %129 = vector.multi_reduction <maximumf>, %128, %cst_41 [2] : vector<1x17x17xf32> to vector<1x17xf32>
    %130 = vector.shape_cast %129 : vector<1x17xf32> to vector<1x17x1xf32>
    %131 = vector.broadcast %130 : vector<1x17x1xf32> to vector<1x17x17xf32>
    %132 = arith.subf %128, %131 : vector<1x17x17xf32>
    %133 = math.exp %132 : vector<1x17x17xf32>
    %cst_42 = arith.constant dense<0.000000e+00> : vector<1x17xf32>
    %134 = vector.multi_reduction <add>, %133, %cst_42 [2] : vector<1x17x17xf32> to vector<1x17xf32>
    %135 = vector.shape_cast %134 : vector<1x17xf32> to vector<1x17x1xf32>
    %136 = tpu.reciprocal %135 {approx = true} : vector<1x17x1xf32> -> vector<1x17x1xf32>
    %137 = vector.broadcast %136 : vector<1x17x1xf32> to vector<1x17x17xf32>
    %138 = arith.mulf %133, %137 : vector<1x17x17xf32>
    %139 = arith.truncf %138 : vector<1x17x17xf32> to vector<1x17x17xbf16>
    "tpu.trace_start"() <{level = 10 : i32, message = "bqk,bkd->bqd"}> : () -> ()
    %cst_43 = arith.constant dense<0.000000e+00> : vector<1x17x32xf32>
    %140 = tpu.matmul %139, %127, %cst_43 {dimension_numbers = #tpu.dot_dimension_numbers<[2], [1], [1], [2], [0, 0, 0, 1, 1, 2], [0], [0]>} : vector<1x17x17xbf16>, vector<1x17x32xbf16>, vector<1x17x32xf32> -> vector<1x17x32xf32>
    "tpu.trace_stop"() : () -> ()
    %141 = vector.shape_cast %140 : vector<1x17x32xf32> to vector<17x32xf32>
    %142 = arith.truncf %141 : vector<17x32xf32> to vector<17x32xbf16>
    %143 = vector.extract_strided_slice %48 {offsets = [96, 0], sizes = [32, 128], strides = [1, 1]} : vector<128x128xbf16> to vector<32x128xbf16>
    %cst_44 = arith.constant dense<0.000000e+00> : vector<17x128xf32>
    %144 = tpu.matmul %142, %143, %cst_44 {dimension_numbers = #tpu.dot_dimension_numbers<[1], [0], [0], [1], [0, 0, 1, 1], [], []>} : vector<17x32xbf16>, vector<32x128xbf16>, vector<17x128xf32> -> vector<17x128xf32>
    %145 = arith.addf %121, %144 : vector<17x128xf32>
    %146 = arith.addf %4, %145 : vector<17x128xf32>
    %c0_45 = arith.constant 0 : index
    %c0_46 = arith.constant 0 : index
    %c0_47 = arith.constant 0 : index
    %147 = vector.load %arg9[%c0_45, %c0_46, %c0_47] : memref<1x1x128xf32, #tpu.memory_space<vmem>>, vector<1x1x128xf32>
    %148 = vector.shape_cast %147 : vector<1x1x128xf32> to vector<1x128xf32>
    %149 = vector.broadcast %148 : vector<1x128xf32> to vector<17x128xf32>
    %150 = arith.addf %146, %149 : vector<17x128xf32>
    %c0_48 = arith.constant 0 : index
    %c0_49 = arith.constant 0 : index
    %c0_50 = arith.constant 0 : index
    %151 = vector.load %arg10[%c0_48, %c0_49, %c0_50] : memref<1x1x128xf32, #tpu.memory_space<vmem>>, vector<1x1x128xf32>
    %152 = vector.shape_cast %151 : vector<1x1x128xf32> to vector<1x128xf32>
    %c0_51 = arith.constant 0 : index
    %c0_52 = arith.constant 0 : index
    %c0_53 = arith.constant 0 : index
    %153 = vector.load %arg11[%c0_51, %c0_52, %c0_53] : memref<1x1x128xf32, #tpu.memory_space<vmem>>, vector<1x1x128xf32>
    %154 = vector.shape_cast %153 : vector<1x1x128xf32> to vector<1x128xf32>
    %cst_54 = arith.constant dense<0.000000e+00> : vector<17xf32>
    %155 = vector.multi_reduction <add>, %150, %cst_54 [1] : vector<17x128xf32> to vector<17xf32>
    %156 = vector.shape_cast %155 : vector<17xf32> to vector<17x1xf32>
    %cst_55 = arith.constant 1.280000e+02 : f32
    %157 = vector.broadcast %cst_55 : f32 to vector<17x1xf32>
    %158 = arith.divf %156, %157 : vector<17x1xf32>
    %159 = vector.broadcast %158 : vector<17x1xf32> to vector<17x128xf32>
    %160 = arith.subf %150, %159 : vector<17x128xf32>
    %161 = arith.mulf %160, %160 : vector<17x128xf32>
    %cst_56 = arith.constant dense<0.000000e+00> : vector<17xf32>
    %162 = vector.multi_reduction <add>, %161, %cst_56 [1] : vector<17x128xf32> to vector<17xf32>
    %163 = vector.shape_cast %162 : vector<17xf32> to vector<17x1xf32>
    %cst_57 = arith.constant 1.280000e+02 : f32
    %164 = vector.broadcast %cst_57 : f32 to vector<17x1xf32>
    %165 = arith.divf %163, %164 : vector<17x1xf32>
    %166 = vector.broadcast %158 : vector<17x1xf32> to vector<17x128xf32>
    %167 = arith.subf %150, %166 : vector<17x128xf32>
    %cst_58 = arith.constant 9.99999997E-7 : f32
    %168 = vector.broadcast %cst_58 : f32 to vector<17x1xf32>
    %169 = arith.addf %165, %168 : vector<17x1xf32>
    %170 = math.rsqrt %169 : vector<17x1xf32>
    %171 = vector.broadcast %170 : vector<17x1xf32> to vector<17x128xf32>
    %172 = arith.mulf %167, %171 : vector<17x128xf32>
    %173 = vector.broadcast %152 : vector<1x128xf32> to vector<17x128xf32>
    %174 = arith.mulf %172, %173 : vector<17x128xf32>
    %175 = vector.broadcast %154 : vector<1x128xf32> to vector<17x128xf32>
    %176 = arith.addf %174, %175 : vector<17x128xf32>
    %177 = arith.truncf %176 : vector<17x128xf32> to vector<17x128xbf16>
    %c0_59 = arith.constant 0 : index
    %c0_60 = arith.constant 0 : index
    %c0_61 = arith.constant 0 : index
    %178 = vector.load %arg12[%c0_59, %c0_60, %c0_61] : memref<1x128x256xbf16, #tpu.memory_space<vmem>>, vector<1x128x256xbf16>
    %179 = vector.shape_cast %178 : vector<1x128x256xbf16> to vector<128x256xbf16>
    %cst_62 = arith.constant dense<0.000000e+00> : vector<17x256xf32>
    %180 = tpu.matmul %177, %179, %cst_62 {dimension_numbers = #tpu.dot_dimension_numbers<[1], [0], [0], [1], [0, 0, 1, 1], [], []>} : vector<17x128xbf16>, vector<128x256xbf16>, vector<17x256xf32> -> vector<17x256xf32>
    %c0_63 = arith.constant 0 : index
    %c0_64 = arith.constant 0 : index
    %c0_65 = arith.constant 0 : index
    %181 = vector.load %arg13[%c0_63, %c0_64, %c0_65] : memref<1x1x256xf32, #tpu.memory_space<vmem>>, vector<1x1x256xf32>
    %182 = vector.shape_cast %181 : vector<1x1x256xf32> to vector<1x256xf32>
    %183 = vector.broadcast %182 : vector<1x256xf32> to vector<17x256xf32>
    %184 = arith.addf %180, %183 : vector<17x256xf32>
    %185 = arith.mulf %184, %184 : vector<17x256xf32>
    %186 = arith.mulf %184, %185 : vector<17x256xf32>
    %cst_66 = arith.constant 4.471500e-02 : f32
    %187 = vector.broadcast %cst_66 : f32 to vector<17x256xf32>
    %188 = arith.mulf %187, %186 : vector<17x256xf32>
    %189 = arith.addf %184, %188 : vector<17x256xf32>
    %cst_67 = arith.constant 0.797884583 : f32
    %190 = vector.broadcast %cst_67 : f32 to vector<17x256xf32>
    %191 = arith.mulf %190, %189 : vector<17x256xf32>
    %192 = math.tanh %191 : vector<17x256xf32>
    %cst_68 = arith.constant 1.000000e+00 : f32
    %193 = vector.broadcast %cst_68 : f32 to vector<17x256xf32>
    %194 = arith.addf %193, %192 : vector<17x256xf32>
    %cst_69 = arith.constant 5.000000e-01 : f32
    %195 = vector.broadcast %cst_69 : f32 to vector<17x256xf32>
    %196 = arith.mulf %195, %194 : vector<17x256xf32>
    %197 = arith.mulf %184, %196 : vector<17x256xf32>
    %198 = arith.truncf %197 : vector<17x256xf32> to vector<17x256xbf16>
    %c0_70 = arith.constant 0 : index
    %c0_71 = arith.constant 0 : index
    %c0_72 = arith.constant 0 : index
    %199 = vector.load %arg14[%c0_70, %c0_71, %c0_72] : memref<1x256x128xbf16, #tpu.memory_space<vmem>>, vector<1x256x128xbf16>
    %200 = vector.shape_cast %199 : vector<1x256x128xbf16> to vector<256x128xbf16>
    %cst_73 = arith.constant dense<0.000000e+00> : vector<17x128xf32>
    %201 = tpu.matmul %198, %200, %cst_73 {dimension_numbers = #tpu.dot_dimension_numbers<[1], [0], [0], [1], [0, 0, 1, 1], [], []>} : vector<17x256xbf16>, vector<256x128xbf16>, vector<17x128xf32> -> vector<17x128xf32>
    %c0_74 = arith.constant 0 : index
    %c0_75 = arith.constant 0 : index
    %c0_76 = arith.constant 0 : index
    %202 = vector.load %arg15[%c0_74, %c0_75, %c0_76] : memref<1x1x128xf32, #tpu.memory_space<vmem>>, vector<1x1x128xf32>
    %203 = vector.shape_cast %202 : vector<1x1x128xf32> to vector<1x128xf32>
    %204 = vector.broadcast %203 : vector<1x128xf32> to vector<17x128xf32>
    %205 = arith.addf %201, %204 : vector<17x128xf32>
    %206 = arith.addf %150, %205 : vector<17x128xf32>
    %207 = vector.shape_cast %206 : vector<17x128xf32> to vector<1x17x128xf32>
    %c0_77 = arith.constant 0 : index
    %c0_78 = arith.constant 0 : index
    %c0_79 = arith.constant 0 : index
    %208 = vector.load %arg19[%c0_77, %c0_78, %c0_79] : memref<1x17x128xf32, #tpu.memory_space<vmem>>, vector<1x17x128xf32>
    tpu.vector_store %arg19[%c0_77, %c0_78, %c0_79], %207 {strides = array<i32>} : memref<1x17x128xf32, #tpu.memory_space<vmem>>, vector<1x17x128xf32>,
    %c1_i32 = arith.constant 1 : i32
    %209 = arith.cmpi eq, %arg1, %c1_i32 : i32
    %210 = arith.extui %209 : i1 to i32
    %c0_i32_80 = arith.constant 0 : i32
    %211 = arith.cmpi ne, %210, %c0_i32_80 : i32
    scf.if %211 {
      %c0_81 = arith.constant 0 : index
      %c0_82 = arith.constant 0 : index
      %212 = vector.load %arg16[%c0_81, %c0_82] : memref<1x128xf32, #tpu.memory_space<vmem>>, vector<1x128xf32>
      %c0_83 = arith.constant 0 : index
      %c0_84 = arith.constant 0 : index
      %213 = vector.load %arg17[%c0_83, %c0_84] : memref<1x128xf32, #tpu.memory_space<vmem>>, vector<1x128xf32>
      %cst_85 = arith.constant dense<0.000000e+00> : vector<17xf32>
      %214 = vector.multi_reduction <add>, %206, %cst_85 [1] : vector<17x128xf32> to vector<17xf32>
      %215 = vector.shape_cast %214 : vector<17xf32> to vector<17x1xf32>
      %cst_86 = arith.constant 1.280000e+02 : f32
      %216 = vector.broadcast %cst_86 : f32 to vector<17x1xf32>
      %217 = arith.divf %215, %216 : vector<17x1xf32>
      %218 = vector.broadcast %217 : vector<17x1xf32> to vector<17x128xf32>
      %219 = arith.subf %206, %218 : vector<17x128xf32>
      %220 = arith.mulf %219, %219 : vector<17x128xf32>
      %cst_87 = arith.constant dense<0.000000e+00> : vector<17xf32>
      %221 = vector.multi_reduction <add>, %220, %cst_87 [1] : vector<17x128xf32> to vector<17xf32>
      %222 = vector.shape_cast %221 : vector<17xf32> to vector<17x1xf32>
      %cst_88 = arith.constant 1.280000e+02 : f32
      %223 = vector.broadcast %cst_88 : f32 to vector<17x1xf32>
      %224 = arith.divf %222, %223 : vector<17x1xf32>
      %225 = vector.broadcast %217 : vector<17x1xf32> to vector<17x128xf32>
      %226 = arith.subf %206, %225 : vector<17x128xf32>
      %cst_89 = arith.constant 9.99999997E-7 : f32
      %227 = vector.broadcast %cst_89 : f32 to vector<17x1xf32>
      %228 = arith.addf %224, %227 : vector<17x1xf32>
      %229 = math.rsqrt %228 : vector<17x1xf32>
      %230 = vector.broadcast %229 : vector<17x1xf32> to vector<17x128xf32>
      %231 = arith.mulf %226, %230 : vector<17x128xf32>
      %232 = vector.broadcast %212 : vector<1x128xf32> to vector<17x128xf32>
      %233 = arith.mulf %231, %232 : vector<17x128xf32>
      %234 = vector.broadcast %213 : vector<1x128xf32> to vector<17x128xf32>
      %235 = arith.addf %233, %234 : vector<17x128xf32>
      %236 = vector.shape_cast %235 : vector<17x128xf32> to vector<1x17x128xf32>
      %237 = arith.truncf %236 : vector<1x17x128xf32> to vector<1x17x128xbf16>
      %c0_90 = arith.constant 0 : index
      %c0_91 = arith.constant 0 : index
      %c0_92 = arith.constant 0 : index
      %238 = vector.load %arg18[%c0_90, %c0_91, %c0_92] : memref<1x17x128xbf16, #tpu.memory_space<vmem>>, vector<1x17x128xbf16>
      tpu.vector_store %arg18[%c0_90, %c0_91, %c0_92], %237 {strides = array<i32>} : memref<1x17x128xbf16, #tpu.memory_space<vmem>>, vector<1x17x128xbf16>,
    } else {
    }
    return
  }
  func.func @transform_0(%arg0: i32, %arg1: i32) -> (i32, i32, i32) {
    %c0_i32 = arith.constant 0 : i32
    %c0_i32_0 = arith.constant 0 : i32
    %c0_i32_1 = arith.constant 0 : i32
    return %arg0, %c0_i32, %c0_i32_0 : i32, i32, i32
  }
  func.func @transform_1(%arg0: i32, %arg1: i32) -> (i32, i32, i32) {
    %c0_i32 = arith.constant 0 : i32
    %c0_i32_0 = arith.constant 0 : i32
    %c0_i32_1 = arith.constant 0 : i32
    %c0_i32_2 = arith.constant 0 : i32
    return %c0_i32, %c0_i32_0, %c0_i32_1 : i32, i32, i32
  }
  func.func @transform_2(%arg0: i32, %arg1: i32) -> (i32, i32, i32) {
    %c0_i32 = arith.constant 0 : i32
    %c0_i32_0 = arith.constant 0 : i32
    %c0_i32_1 = arith.constant 0 : i32
    return %arg1, %c0_i32, %c0_i32_0 : i32, i32, i32
  }
  func.func @transform_3(%arg0: i32, %arg1: i32) -> (i32, i32, i32) {
    %c0_i32 = arith.constant 0 : i32
    %c0_i32_0 = arith.constant 0 : i32
    %c0_i32_1 = arith.constant 0 : i32
    return %arg1, %c0_i32, %c0_i32_0 : i32, i32, i32
  }
  func.func @transform_4(%arg0: i32, %arg1: i32) -> (i32, i32, i32) {
    %c0_i32 = arith.constant 0 : i32
    %c0_i32_0 = arith.constant 0 : i32
    %c0_i32_1 = arith.constant 0 : i32
    return %arg1, %c0_i32, %c0_i32_0 : i32, i32, i32
  }
  func.func @transform_5(%arg0: i32, %arg1: i32) -> (i32, i32, i32) {
    %c0_i32 = arith.constant 0 : i32
    %c0_i32_0 = arith.constant 0 : i32
    %c0_i32_1 = arith.constant 0 : i32
    return %arg1, %c0_i32, %c0_i32_0 : i32, i32, i32
  }
  func.func @transform_6(%arg0: i32, %arg1: i32) -> (i32, i32, i32) {
    %c0_i32 = arith.constant 0 : i32
    %c0_i32_0 = arith.constant 0 : i32
    %c0_i32_1 = arith.constant 0 : i32
    return %arg1, %c0_i32, %c0_i32_0 : i32, i32, i32
  }
  func.func @transform_7(%arg0: i32, %arg1: i32) -> (i32, i32, i32) {
    %c0_i32 = arith.constant 0 : i32
    %c0_i32_0 = arith.constant 0 : i32
    %c0_i32_1 = arith.constant 0 : i32
    return %arg1, %c0_i32, %c0_i32_0 : i32, i32, i32
  }
  func.func @transform_8(%arg0: i32, %arg1: i32) -> (i32, i32, i32) {
    %c0_i32 = arith.constant 0 : i32
    %c0_i32_0 = arith.constant 0 : i32
    %c0_i32_1 = arith.constant 0 : i32
    return %arg1, %c0_i32, %c0_i32_0 : i32, i32, i32
  }
  func.func @transform_9(%arg0: i32, %arg1: i32) -> (i32, i32, i32) {
    %c0_i32 = arith.constant 0 : i32
    %c0_i32_0 = arith.constant 0 : i32
    %c0_i32_1 = arith.constant 0 : i32
    return %arg1, %c0_i32, %c0_i32_0 : i32, i32, i32
  }
  func.func @transform_10(%arg0: i32, %arg1: i32) -> (i32, i32, i32) {
    %c0_i32 = arith.constant 0 : i32
    %c0_i32_0 = arith.constant 0 : i32
    %c0_i32_1 = arith.constant 0 : i32
    return %arg1, %c0_i32, %c0_i32_0 : i32, i32, i32
  }
  func.func @transform_11(%arg0: i32, %arg1: i32) -> (i32, i32, i32) {
    %c0_i32 = arith.constant 0 : i32
    %c0_i32_0 = arith.constant 0 : i32
    %c0_i32_1 = arith.constant 0 : i32
    return %arg1, %c0_i32, %c0_i32_0 : i32, i32, i32
  }
  func.func @transform_12(%arg0: i32, %arg1: i32) -> (i32, i32, i32) {
    %c0_i32 = arith.constant 0 : i32
    %c0_i32_0 = arith.constant 0 : i32
    %c0_i32_1 = arith.constant 0 : i32
    return %arg1, %c0_i32, %c0_i32_0 : i32, i32, i32
  }
  func.func @transform_13(%arg0: i32, %arg1: i32) -> (i32, i32, i32) {
    %c0_i32 = arith.constant 0 : i32
    %c0_i32_0 = arith.constant 0 : i32
    %c0_i32_1 = arith.constant 0 : i32
    return %arg1, %c0_i32, %c0_i32_0 : i32, i32, i32
  }
  func.func @transform_14(%arg0: i32, %arg1: i32) -> (i32, i32) {
    %c0_i32 = arith.constant 0 : i32
    %c0_i32_0 = arith.constant 0 : i32
    %c0_i32_1 = arith.constant 0 : i32
    return %c0_i32, %c0_i32_0 : i32, i32
  }
  func.func @transform_15(%arg0: i32, %arg1: i32) -> (i32, i32) {
    %c0_i32 = arith.constant 0 : i32
    %c0_i32_0 = arith.constant 0 : i32
    %c0_i32_1 = arith.constant 0 : i32
    return %c0_i32, %c0_i32_0 : i32, i32
  }
  func.func @transform_16(%arg0: i32, %arg1: i32) -> (i32, i32, i32) {
    %c0_i32 = arith.constant 0 : i32
    %c0_i32_0 = arith.constant 0 : i32
    %c0_i32_1 = arith.constant 0 : i32
    return %arg0, %c0_i32, %c0_i32_0 : i32, i32, i32
  }
}

module attributes {stable_mosaic.version = 11 : i64} {
  func.func @_mae_loss_kernel(%arg0: memref<2x16x192xf32, #tpu.memory_space<vmem>>, %arg1: memref<2x16x192xf32, #tpu.memory_space<vmem>>, %arg2: memref<2x16xf32, #tpu.memory_space<vmem>>, %arg3: memref<1x1xf32, #tpu.memory_space<smem>>) attributes {dimension_semantics = [], scalar_prefetch = 0 : i64, scratch_operands = 0 : i64, tpu.core_type = #tpu.core_type<tc>} {
    %c0 = arith.constant 0 : index
    %c0_0 = arith.constant 0 : index
    %c0_1 = arith.constant 0 : index
    %0 = vector.load %arg0[%c0, %c0_0, %c0_1] : memref<2x16x192xf32, #tpu.memory_space<vmem>>, vector<2x16x192xf32>
    %c0_2 = arith.constant 0 : index
    %c0_3 = arith.constant 0 : index
    %c0_4 = arith.constant 0 : index
    %1 = vector.load %arg1[%c0_2, %c0_3, %c0_4] : memref<2x16x192xf32, #tpu.memory_space<vmem>>, vector<2x16x192xf32>
    %cst = arith.constant dense<0.000000e+00> : vector<2x16xf32>
    %2 = vector.multi_reduction <add>, %1, %cst [2] : vector<2x16x192xf32> to vector<2x16xf32>
    %3 = vector.shape_cast %2 : vector<2x16xf32> to vector<2x16x1xf32>
    %cst_5 = arith.constant 1.920000e+02 : f32
    %4 = vector.broadcast %cst_5 : f32 to vector<2x16x1xf32>
    %5 = arith.divf %3, %4 : vector<2x16x1xf32>
    %6 = vector.broadcast %5 : vector<2x16x1xf32> to vector<2x16x192xf32>
    %7 = arith.subf %1, %6 : vector<2x16x192xf32>
    %8 = arith.mulf %7, %7 : vector<2x16x192xf32>
    %cst_6 = arith.constant dense<0.000000e+00> : vector<2x16xf32>
    %9 = vector.multi_reduction <add>, %8, %cst_6 [2] : vector<2x16x192xf32> to vector<2x16xf32>
    %10 = vector.shape_cast %9 : vector<2x16xf32> to vector<2x16x1xf32>
    %cst_7 = arith.constant 1.910000e+02 : f32
    %11 = vector.broadcast %cst_7 : f32 to vector<2x16x1xf32>
    %12 = arith.divf %10, %11 : vector<2x16x1xf32>
    %13 = vector.broadcast %5 : vector<2x16x1xf32> to vector<2x16x192xf32>
    %14 = arith.subf %1, %13 : vector<2x16x192xf32>
    %cst_8 = arith.constant 9.99999997E-7 : f32
    %15 = vector.broadcast %cst_8 : f32 to vector<2x16x1xf32>
    %16 = arith.addf %12, %15 : vector<2x16x1xf32>
    %17 = math.rsqrt %16 : vector<2x16x1xf32>
    %18 = vector.broadcast %17 : vector<2x16x1xf32> to vector<2x16x192xf32>
    %19 = arith.mulf %14, %18 : vector<2x16x192xf32>
    %20 = arith.subf %0, %19 : vector<2x16x192xf32>
    %21 = arith.mulf %20, %20 : vector<2x16x192xf32>
    %cst_9 = arith.constant dense<0.000000e+00> : vector<2x16xf32>
    %22 = vector.multi_reduction <add>, %21, %cst_9 [2] : vector<2x16x192xf32> to vector<2x16xf32>
    %cst_10 = arith.constant 1.920000e+02 : f32
    %23 = vector.broadcast %cst_10 : f32 to vector<2x16xf32>
    %24 = arith.divf %22, %23 : vector<2x16xf32>
    %c0_11 = arith.constant 0 : index
    %c0_12 = arith.constant 0 : index
    %25 = vector.load %arg2[%c0_11, %c0_12] : memref<2x16xf32, #tpu.memory_space<vmem>>, vector<2x16xf32>
    %26 = arith.mulf %24, %25 : vector<2x16xf32>
    %27 = vector.shape_cast %26 : vector<2x16xf32> to vector<1x2x16xf32>
    %cst_13 = arith.constant dense<0.000000e+00> : vector<1xf32>
    %28 = vector.multi_reduction <add>, %27, %cst_13 [1, 2] : vector<1x2x16xf32> to vector<1xf32>
    %29 = vector.shape_cast %28 : vector<1xf32> to vector<1x1x1xf32>
    %30 = vector.extract %29[0, 0, 0] : f32 from vector<1x1x1xf32>
    %31 = vector.shape_cast %25 : vector<2x16xf32> to vector<1x2x16xf32>
    %cst_14 = arith.constant dense<0.000000e+00> : vector<1xf32>
    %32 = vector.multi_reduction <add>, %31, %cst_14 [1, 2] : vector<1x2x16xf32> to vector<1xf32>
    %33 = vector.shape_cast %32 : vector<1xf32> to vector<1x1x1xf32>
    %34 = vector.extract %33[0, 0, 0] : f32 from vector<1x1x1xf32>
    %35 = arith.divf %30, %34 : f32
    %c0_15 = arith.constant 0 : index
    %c0_16 = arith.constant 0 : index
    %36 = memref.load %arg3[%c0_15, %c0_16] : memref<1x1xf32, #tpu.memory_space<smem>>
    memref.store %35, %arg3[%c0_15, %c0_16] : memref<1x1xf32, #tpu.memory_space<smem>>
    return
  }
}

</mosaic_0001>

<bundles_post_ra>
// kernel: _lambda_.7
= control target key start
LH: loop header
LB: loop body
LE: loop exit
PB: predicated region body
PF: predicated region fallthrough
CT: control target
= control target key end

     0   :  { %s521_s15 = smov 0   ;;  %s587_s0 = inlined_call_operand.vmem [shape: f32[2,16,192], index: 0, kind: input, shape index: {}]   ;;  %s588_s1 = inlined_call_operand.vmem [shape: bf16[192,128], index: 1, kind: input, shape index: {}]   ;;  %s589_s2 = inlined_call_operand.vmem [shape: f32[1,128], index: 2, kind: input, shape index: {}]   ;;  %s590_s3 = inlined_call_operand.vmem [shape: f32[16,128], index: 3, kind: input, shape index: {}]   ;;  %s591_s4 = inlined_call_operand.vmem [shape: bf16[2,16,128], index: 4, kind: output, shape index: {}]  }
   0x1 LB: > { %s400_s16 = sadd.s32 4294967295, %s494_s15   ;;  %p404_p0 = scmp.ge.s32.totalorder %s494_s15, 1  ;;  %s494_s15 = sphi %s521_s15, %s14_s15  }
   0x2   : > { %p162_p1 = scmp.lt.s32.totalorder %s494_s15, 3 }
   0x4   : > { %p163_p2 = pnand %p404_p0, %p162_p1 }
   0x5   : > { %p188_p3 = scmp.lt.s32.totalorder (!%p163_p2), %s400_s16, 1 }
   0x6   : > { %166 = sbr.rel (%p163_p2) target bundleno = 186 (0xba), region = 36 }
   0xb   : > { %v469_v0 = vld [vmem:[%s588_s1 + $0x38] sm:$0xff]  ;;  %v468_v2 = vld [vmem:[%s588_s1 + $0x30] sm:$0xff]  ;;  %s593_s16 = smov (!%p188_p3, %s400_s16), 1  ;;  %v467_v4 = vld [vmem:[%s588_s1 + $0x28] sm:$0xff]  ;;  %vm305_vm0 = vcmask 523264  }
   0xc   : > { %v473_v1 = vld [vmem:[%s588_s1 + $0x58] sm:$0xff]  ;;  %309 = vmatpush.bf16.msra.mxu0 %v469_v0  ;;  %v472_v3 = vld [vmem:[%s588_s1 + $0x50] sm:$0xff]  ;;  %s460_s25 = sshll.u32 %s593_s16, 5  ;;  %v471_v5 = vld [vmem:[%s588_s1 + $0x48] sm:$0xff]  ;;  %s461_s27 = sshll.u32 %s593_s16, 3 }
   0xd   : > { %327 = vmatpush.bf16.msra.mxu1 %v473_v1  ;;  %s192_s6 = scalar_lea.vmem %s587_s0, %s460_s25  ;;  %v466_v6 = vld [vmem:[%s588_s1 + $0x20] sm:$0xff]  ;;  %v465_v10 = vld [vmem:[%s588_s1 + $0x18] sm:$0xff]  ;;  %v464_v12 = vld [vmem:[%s588_s1 + $0x10] sm:$0xff]  ;;  %s197_s30 = scalar_lea.vmem %s591_s4, %s461_s27 }
   0xe   : > { %v470_v7 = vld [vmem:[%s588_s1 + $0x40] sm:$0xff]  ;;  %v200_v8 = vld [vmem:[%s192_s6 + $0x8] sm:$0xff]  ;;  %v202_v9 = vld [vmem:[%s192_s6 + $0x18] sm:$0xff] }
   0xf   : > { %v204_v11 = vpack.c.bf16 %v202_v9, %v200_v8  ;;  %v463_v13 = vld [vmem:[%s588_s1 + $0x8] sm:$0xff]  ;;  %v462_v14 = vld [vmem:[%s588_s1] sm:$0xff]  ;;  %v201_v16 = vld [vmem:[%s192_s6 + $0x10] sm:$0xff] }
  0x10   : > { %310 = vmatpush.bf16.msra.mxu0 %v468_v2  ;;  %v199_v15 = vld [vmem:[%s192_s6] sm:$0xff]  ;;  %v338_v27 = vld [vmem:[%s590_s3 + $0x8] sm:$0xff] }
  0x11   : > { %328 = vmatpush.bf16.msra.mxu1 %v472_v3  ;;  %v203_v17 = vpack.c.bf16 %v201_v16, %v199_v15  ;;  %v487_v20 = vld [vmem:[%s589_s2] ss:$0 sm:$0xff] }
  0x12   : > { %v337_v25 = vld [vmem:[%s590_s3] sm:$0xff] }
  0x14   : > { %311 = vmatpush.bf16.msra.mxu0 %v467_v4 }
  0x15   : > { %329 = vmatpush.bf16.msra.mxu1 %v471_v5 }
  0x18   : > { %312 = vmatpush.bf16.msra.mxu0 %v466_v6 }
  0x19   : > { %330 = vmatpush.bf16.msra.mxu1 %v470_v7 }
  0x1c   : > { %313 = vmatpush.bf16.msra.mxu0 %v465_v10  ;;  %457 = vmatmul.msk.bf16.vlgmr.msra.gmra.mxu1 %vm305_vm0, %v204_v11 }
  0x20   : > { %314 = vmatpush.bf16.msra.mxu0 %v464_v12 }
  0x24   : > { %315 = vmatpush.bf16.msra.mxu0 %v463_v13 }
  0x28   : > { %316 = vmatpush.bf16.msra.mxu0 %v462_v14 }
  0x2b   : > { %317 = vmatmul.bf16.vlgmr.msra.gmra.mxu0 %v203_v17 }
  0x99   : > { %v332_v18 = vpop.f32.mrf.mxu1 }
  0xa1   : > { %v334_v26 = vpop.f32.mrf.mxu1 }
  0xa8   : > { %v318_v19 = vpop.f32.mrf.mxu0 }
  0xa9   : > { %v319_v21 = vadd.f32 %v487_v20, %v318_v19 }
  0xab   : > { %v333_v23 = vadd.f32 %v332_v18, %v319_v21 }
  0xad   : > { %v339_v29 = vadd.f32 %v337_v25, %v333_v23 }
  0xb0   : > { %v320_v22 = vpop.f32.mrf.mxu0 }
  0xb1   : > { %v321_v24 = vadd.f32 %v487_v20, %v320_v22 }
  0xb3   : > { %v335_v28 = vadd.f32 %v334_v26, %v321_v24 }
  0xb5   : > { %v340_v30 = vadd.f32 %v338_v27, %v335_v28 }
  0xb7   : > { %v477_v31 = vpack.c.bf16 %v340_v30, %v339_v29 }
  0xb9   : > { %478 = vst [vmem:[%s197_s30] sm:$0xff] %v477_v31  }
  0xba PF: > { %s14_s15 = sadd.s32 1, %s494_s15  }
  0xbb   : > { %p11_p4 = scmp.ge.s32.totalorder %s14_s15, 4  }
  0xbd   :  { %13 = sbr.rel (!%p11_p4) target bundleno = 1 (0x1), region = 66 }

// kernel: _lambda_.9
= control target key start
LH: loop header
LB: loop body
LE: loop exit
PB: predicated region body
PF: predicated region fallthrough
CT: control target
= control target key end

     0   :  { %s207_s1 = inlined_call_operand.vmem [shape: bf16[128,128], index: 1, kind: input, shape index: {}]   ;;  %s208_s2 = inlined_call_operand.vmem [shape: f32[1,128], index: 2, kind: input, shape index: {}]   ;;  %s209_s0 = inlined_call_operand.vmem [shape: f32[10,128], index: 0, kind: input, shape index: {}]   ;;  %s210_s3 = inlined_call_operand.vmem [shape: bf16[10,128], index: 3, kind: output, shape index: {}]  }
   0x1   :  { %v146_v0 = vld [vmem:[%s207_s1 + $0x38] sm:$0xff]  ;;  %v145_v1 = vld [vmem:[%s207_s1 + $0x30] sm:$0xff]  ;;  %v144_v2 = vld [vmem:[%s207_s1 + $0x28] sm:$0xff] }
   0x2   :  { %85 = vmatpush.bf16.msra.mxu0 %v146_v0  ;;  %v143_v3 = vld [vmem:[%s207_s1 + $0x20] sm:$0xff]  ;;  %v142_v4 = vld [vmem:[%s207_s1 + $0x18] sm:$0xff]  ;;  %v141_v5 = vld [vmem:[%s207_s1 + $0x10] sm:$0xff] }
   0x3   :  { %v140_v6 = vld [vmem:[%s207_s1 + $0x8] sm:$0xff]  ;;  %v139_v7 = vld [vmem:[%s207_s1] sm:$0xff] }
   0x4   :  { %v14_v8 = vld [vmem:[%s209_s0] sm:$0xff]  ;;  %v15_v9 = vld [vmem:[%s209_s0 + $0x8] sm:$0x3] }
   0x5   :  { %v16_v10 = vpack.c.bf16 %v15_v9, %v14_v8  ;;  %v147_v11 = vld [vmem:[%s208_s2] ss:$0 sm:$0xff] }
   0x6   :  { %86 = vmatpush.bf16.msra.mxu0 %v145_v1 }
   0xa   :  { %87 = vmatpush.bf16.msra.mxu0 %v144_v2 }
   0xe   :  { %88 = vmatpush.bf16.msra.mxu0 %v143_v3 }
  0x12   :  { %89 = vmatpush.bf16.msra.mxu0 %v142_v4 }
  0x16   :  { %90 = vmatpush.bf16.msra.mxu0 %v141_v5 }
  0x1a   :  { %91 = vmatpush.bf16.msra.mxu0 %v140_v6 }
  0x1e   :  { %92 = vmatpush.bf16.msra.mxu0 %v139_v7 }
  0x21   :  { %93 = vmatmul.bf16.vlgmr.msra.gmra.mxu0 %v16_v10 }
  0x9e   :  { %v94_v12 = vpop.f32.mrf.mxu0 }
  0x9f   :  { %v95_v13 = vadd.f32 %v147_v11, %v94_v12 }
  0xa1   :  { %v99_v14 = vpack.c.bf16 %v95_v13, %v95_v13 }
  0xa3   :  { %101 = vst [vmem:[%s210_s3] sm:$0xf] %v99_v14 }
  0xa6   :  { %v96_v15 = vpop.f32.mrf.mxu0 }
  0xa7   :  { %v97_v16 = vadd.f32 %v147_v11, %v96_v15 }
  0xa9   :  { %v100_v17 = vpack.c.bf16 %v97_v16, %v97_v16 }
  0xab   :  { %102 = vst [vmem:[%s210_s3 + $0x4] sm:$0x1] %v100_v17 }

// kernel: _lambda_.13
= control target key start
LH: loop header
LB: loop body
LE: loop exit
PB: predicated region body
PF: predicated region fallthrough
CT: control target
= control target key end

     0   :  { %s835_s0 = inlined_call_operand.vmem [shape: f32[2,128], index: 0, kind: input, shape index: {}]   ;;  %s836_s1 = inlined_call_operand.vmem [shape: bf16[128,128], index: 1, kind: input, shape index: {}]   ;;  %s837_s2 = inlined_call_operand.hbm [shape: f32[2,128], index: 2, kind: output, shape index: {}]  }
   0x1   :  { %v380_v0 = vld [vmem:[%s836_s1 + $0x38] sm:$0xff]   ;;  %v379_v1 = vld [vmem:[%s836_s1 + $0x30] sm:$0xff]   ;;  %v378_v2 = vld [vmem:[%s836_s1 + $0x28] sm:$0xff]  }
   0x2   :  { %v467_v3 = vunpack.c.l.bf16 %v380_v0  ;;  %v469_v4 = vunpack.c.l.bf16 %v379_v1  ;;  %v471_v5 = vunpack.c.l.bf16 %v378_v2 }
   0x3   :  { %7 = vsyncpa [#allocation3], 0  ;;  %v479_v9 = vunpack.c.h.bf16 %v380_v0  ;;  %v481_v10 = vunpack.c.h.bf16 %v379_v1  ;;  %v483_v11 = vunpack.c.h.bf16 %v378_v2  ;;  %v377_v15 = vld [vmem:[%s836_s1 + $0x20] sm:$0xff]   ;;  %v376_v16 = vld [vmem:[%s836_s1 + $0x18] sm:$0xff]   ;;  %vm46_vm0 = vcmask 1041408   ;;  %s333_s29 = sshll.u32 %s837_s2, 4  ;;  %s334_s29 = int_to_ptr.hbm [resolvable:$true] %s333_s29 }
   0x4   :  { %v76_v6 = vmul.f32 %v467_v3, %v467_v3  ;;  %v74_v7 = vmul.f32 %v469_v4, %v469_v4  ;;  %v72_v8 = vmul.f32 %v471_v5, %v471_v5  ;;  %v497_v17 = vunpack.c.h.bf16 %v377_v15  ;;  %v375_v23 = vld [vmem:[%s836_s1 + $0x10] sm:$0xff]   ;;  %v374_v30 = vld [vmem:[%s836_s1 + $0x8] sm:$0xff]   ;;  %v343_v31 = vld [vmem:[%s836_s1] sm:$0xff]  }
   0x5   :  { %v77_v12 = vmul.f32 %v479_v9, %v479_v9  ;;  %v75_v13 = vmul.f32 %v481_v10, %v481_v10  ;;  %v73_v14 = vmul.f32 %v483_v11, %v483_v11  ;;  %v499_v18 = vunpack.c.l.bf16 %v377_v15  ;;  %v545_v38 = vld [vmem:[%s835_s0] sm:$0x3]  ;;  %s442_s0 = smov [#allocation2]  }
   0x6   :  { %106 = vadd.xlane.f32.xlu0 %v76_v6  ;;  %102 = vadd.xlane.f32.xlu1 %v74_v7  ;;  %v501_v19 = vunpack.c.l.bf16 %v376_v16  ;;  %v71_v20 = vmul.f32 %v497_v17, %v497_v17  ;;  %v512_v24 = vunpack.c.h.bf16 %v376_v16  ;;  %v514_v25 = vunpack.c.l.bf16 %v375_v23  ;;  %s331_s26 = sshll.u32 %s442_s0, 4  ;;  %s332_s26 = int_to_ptr.vmem [resolvable:$true] %s331_s26 }
   0x7   :  { %98 = vadd.xlane.f32.xlu2 %v72_v8  ;;  %v70_v21 = vmul.f32 %v499_v18, %v499_v18  ;;  %v516_v26 = vunpack.c.h.bf16 %v375_v23  ;;  %v530_v32 = vunpack.c.h.bf16 %v374_v30  ;;  %v532_v33 = vunpack.c.l.bf16 %v374_v30 }
   0x8   :  { %v68_v22 = vmul.f32 %v501_v19, %v501_v19  ;;  %v69_v27 = vmul.f32 %v512_v24, %v512_v24  ;;  %v66_v28 = vmul.f32 %v514_v25, %v514_v25  ;;  %v534_v34 = vunpack.c.l.bf16 %v343_v31 }
   0x9   :  { %v67_v29 = vmul.f32 %v516_v26, %v516_v26  ;;  %v65_v35 = vmul.f32 %v530_v32, %v530_v32  ;;  %v64_v36 = vmul.f32 %v532_v33, %v532_v33  ;;  %v547_v39 = vunpack.c.h.bf16 %v343_v31 }
   0xa   :  { %v62_v37 = vmul.f32 %v534_v34, %v534_v34  ;;  %v45_v40 = vmul.f32 %v545_v38, %v545_v38 }
   0xb   :  { %v63_v41 = vmul.f32 %v547_v39, %v547_v39 }
   0xc   :  { %v47_v42 = vsel %vm46_vm0, %v45_v40, 0.0 }
   0xe   :  { %108 = vadd.xlane.f32.xlu0 %v77_v12  ;;  %104 = vadd.xlane.f32.xlu1 %v75_v13 }
   0xf   :  { %100 = vadd.xlane.f32.xlu2 %v73_v14 }
  0x16   :  { %96 = vadd.xlane.f32.xlu1 %v71_v20  ;;  %94 = vadd.xlane.f32.xlu0 %v70_v21 }
  0x17   :  { %90 = vadd.xlane.f32.xlu2 %v68_v22 }
  0x1e   :  { %92 = vadd.xlane.f32.xlu0 %v69_v27  ;;  %86 = vadd.xlane.f32.xlu1 %v66_v28 }
  0x1f   :  { %88 = vadd.xlane.f32.xlu2 %v67_v29 }
  0x26   :  { %84 = vadd.xlane.f32.xlu1 %v65_v35  ;;  %82 = vadd.xlane.f32.xlu0 %v64_v36 }
  0x27   :  { %78 = vadd.xlane.f32.xlu2 %v62_v37 }
  0x2e   :  { %80 = vadd.xlane.f32.xlu0 %v63_v41  ;;  %48 = vadd.xlane.f32.xlu1 %v47_v42 }
  0x79   :  { %v107_v43 = vpop.xlane.xlu0 %106  ;;  %v103_v44 = vpop.xlane.xlu1 %102 }
  0x7a   :  { %v124_v45 = vmax.f32 %v107_v43, 1e-24  ;;  %v553_v46 = vmax.f32 %v103_v44, 1e-24  ;;  %v99_v47 = vpop.xlane.xlu2 %98 }
  0x7b   :  { %v556_v48 = vmax.f32 %v99_v47, 1e-24 }
  0x7c   :  { %382 = vrsqrt.f32 %v124_v45  ;;  %vm272_vm2 = vweird.f32 %v124_v45  ;;  %vm252_vm6 = vweird.f32 %v553_v46 }
  0x7d   :  { %384 = vrsqrt.f32 %v553_v46  ;;  %vm232_vm15 = vweird.f32 %v556_v48 }
  0x7e   :  { %386 = vrsqrt.f32 %v556_v48 }
  0x81   :  { %v109_v49 = vpop.xlane.xlu0 %108  ;;  %v105_v50 = vpop.xlane.xlu1 %104 }
  0x82   :  { %v558_v51 = vpop.eup %382  ;;  %v125_v52 = vmax.f32 %v109_v49, 1e-24  ;;  %v560_v53 = vmax.f32 %v105_v50, 1e-24  ;;  %v101_v54 = vpop.xlane.xlu2 %100 }
  0x83   :  { %v562_v55 = vpop.eup %384  ;;  %v267_v56 = vmul.f32 %v558_v51, %v124_v45  ;;  %v566_v57 = vmax.f32 %v101_v54, 1e-24  ;;  %vm273_vm1 = vweird.f32 %v558_v51 }
  0x84   :  { %388 = vrsqrt.f32 %v125_v52  ;;  %v247_v59 = vmul.f32 %v562_v55, %v553_v46  ;;  %v573_v61 = vpop.eup %386  ;;  %vm282_vm3 = vweird.f32 %v125_v52  ;;  %vm603_vm5 = vmor %vm272_vm2, %vm273_vm1  ;;  %vm262_vm7 = vweird.f32 %v560_v53 }
  0x85   :  { %v268_v58 = vmul.f32 %v558_v51, %v267_v56  ;;  %390 = vrsqrt.f32 %v560_v53  ;;  %v227_v21 = vmul.f32 %v573_v61, %v556_v48  ;;  %vm253_vm10 = vweird.f32 %v562_v55 }
  0x86   :  { %392 = vrsqrt.f32 %v566_v57  ;;  %v248_v1 = vmul.f32 %v562_v55, %v247_v59  ;;  %vm649_vm12 = vmor %vm252_vm6, %vm253_vm10  ;;  %vm242_vm13 = vweird.f32 %v566_v57  ;;  %vm233_vm0 = vweird.f32 %v573_v61 }
  0x87   :  { %v269_v60 = vmul.f32 0.5, %v268_v58  ;;  %v228_v40 = vmul.f32 %v573_v61, %v227_v21  ;;  %vm680_vm2 = vmor %vm232_vm15, %vm233_vm0 }
  0x88   :  { %v249_v20 = vmul.f32 0.5, %v248_v1 }
  0x89   :  { %v97_v62 = vpop.xlane.xlu1 %96  ;;  %v95_v63 = vpop.xlane.xlu0 %94  ;;  %v270_v8 = vsub.f32 1.5, %v269_v60 }
  0x8a   :  { %v389_v0 = vpop.eup %388  ;;  %v576_v2 = vmax.f32 %v97_v62, 1e-24  ;;  %v578_v6 = vmax.f32 %v95_v63, 1e-24  ;;  %v91_v13 = vpop.xlane.xlu2 %90  ;;  %v250_v37 = vsub.f32 1.5, %v249_v20 }
  0x8b   :  { %v580_v7 = vpop.eup %390  ;;  %v277_v12 = vmul.f32 %v389_v0, %v125_v52  ;;  %v593_v28 = vmax.f32 %v91_v13, 1e-24  ;;  %v271_v29 = vmul.f32 %v558_v51, %v270_v8  ;;  %vm283_vm4 = vweird.f32 %v389_v0 }
  0x8c   :  { %v582_v14 = vpop.eup %392  ;;  %v257_v15 = vmul.f32 %v580_v7, %v560_v53  ;;  %394 = vrsqrt.f32 %v576_v2  ;;  %vm284_vm8 = vmor %vm282_vm3, %vm283_vm4  ;;  %vm263_vm9 = vweird.f32 %v580_v7  ;;  %v229_v52 = vmul.f32 0.5, %v228_v40 }
  0x8d   :  { %v278_v16 = vmul.f32 %v389_v0, %v277_v12  ;;  %396 = vrsqrt.f32 %v578_v6  ;;  %v237_v23 = vmul.f32 %v582_v14, %v566_v57  ;;  %v275_v49 = vsel %vm603_vm5, %v558_v51, %v271_v29  ;;  %vm632_vm11 = vmor %vm262_vm7, %vm263_vm9 }
  0x8e   :  { %v258_v22 = vmul.f32 %v580_v7, %v257_v15  ;;  %398 = vrsqrt.f32 %v593_v28  ;;  %v300_v60 = vmul.f32 %v467_v3, %v275_v49  ;;  %v251_v1 = vmul.f32 %v562_v55, %v250_v37 }
  0x8f   :  { %v279_v27 = vmul.f32 0.5, %v278_v16  ;;  %v238_v41 = vmul.f32 %v582_v14, %v237_v23  ;;  %vm243_vm14 = vweird.f32 %v582_v14  ;;  %vm222_vm3 = vweird.f32 %v576_v2 }
  0x90   :  { %v259_v30 = vmul.f32 0.5, %v258_v22  ;;  %v230_v22 = vsub.f32 1.5, %v229_v52  ;;  %vm667_vm1 = vmor %vm242_vm13, %vm243_vm14  ;;  %vm212_vm5 = vweird.f32 %v578_v6  ;;  %vm192_vm9 = vweird.f32 %v593_v28 }
  0x91   :  { %v280_v31 = vsub.f32 1.5, %v279_v27  ;;  %v93_v35 = vpop.xlane.xlu0 %92  ;;  %v87_v44 = vpop.xlane.xlu1 %86  ;;  %v239_v59 = vmul.f32 0.5, %v238_v41 }
  0x92   :  { %v597_v36 = vpop.eup %394  ;;  %v601_v42 = vmax.f32 %v93_v35, 1e-24  ;;  %v260_v45 = vsub.f32 1.5, %v259_v30  ;;  %v89_v51 = vpop.xlane.xlu2 %88  ;;  %v625_v63 = vmax.f32 %v87_v44, 1e-24 }
  0x93   :  { %v607_v47 = vpop.eup %396  ;;  %v281_v50 = vmul.f32 %v389_v0, %v280_v31  ;;  %v217_v54 = vmul.f32 %v597_v36, %v576_v2  ;;  %v636_v13 = vmax.f32 %v89_v51, 1e-24  ;;  %v240_v21 = vsub.f32 1.5, %v239_v59 }
  0x94   :  { %400 = vrsqrt.f32 %v601_v42  ;;  %v207_v56 = vmul.f32 %v607_v47, %v578_v6  ;;  %v261_v8 = vmul.f32 %v580_v7, %v260_v45  ;;  %v638_v3 = vpop.eup %398  ;;  %vm223_vm4 = vweird.f32 %v597_v36 }
  0x95   :  { %v285_v58 = vsel %vm284_vm8, %v389_v0, %v281_v50  ;;  %402 = vrsqrt.f32 %v625_v63  ;;  %v187_v46 = vmul.f32 %v638_v3, %v593_v28  ;;  %v241_v37 = vmul.f32 %v582_v14, %v240_v21  ;;  %vm705_vm7 = vmor %vm222_vm3, %vm223_vm4 }
  0x96   :  { %v301_v62 = vmul.f32 %v479_v9, %v285_v58  ;;  %v218_v9 = vmul.f32 %v597_v36, %v217_v54  ;;  %v208_v15 = vmul.f32 %v607_v47, %v207_v56  ;;  %v265_v16 = vsel %vm632_vm11, %v580_v7, %v261_v8 }
  0x97   :  { %v255_v7 = vsel %vm649_vm12, %v562_v55, %v251_v1  ;;  %404 = vrsqrt.f32 %v636_v13  ;;  %v299_v27 = vmul.f32 %v481_v10, %v265_v16  ;;  %v231_v10 = vmul.f32 %v573_v61, %v230_v22 }
  0x98   :  { %v310_v0 = vpack.c.bf16 %v301_v62, %v300_v60  ;;  %v219_v57 = vmul.f32 0.5, %v218_v9  ;;  %v209_v30 = vmul.f32 0.5, %v208_v15  ;;  %v298_v35 = vmul.f32 %v469_v4, %v255_v7 }
  0x99   :  { %v83_v23 = vpop.xlane.xlu0 %82  ;;  %v85_v29 = vpop.xlane.xlu1 %84  ;;  %v188_v44 = vmul.f32 %v638_v3, %v187_v46  ;;  %v245_v56 = vsel %vm667_vm1, %v582_v14, %v241_v37  ;;  %vm213_vm6 = vweird.f32 %v607_v47  ;;  %v235_v14 = vsel %vm680_vm2, %v573_v61, %v231_v10 }
  0x9a   :  { %v645_v20 = vpop.eup %400  ;;  %311 = vmatpush.bf16.xpose.msra.mxu0 %v310_v0  ;;  %v673_v40 = vmax.f32 %v85_v29, 1e-24  ;;  %v309_v45 = vpack.c.bf16 %v299_v27, %v298_v35  ;;  %v685_v49 = vmax.f32 %v83_v23, 1e-24  ;;  %v220_v4 = vsub.f32 1.5, %v219_v57  ;;  %v79_v59 = vpop.xlane.xlu2 %78  ;;  %vm715_vm8 = vmor %vm212_vm5, %vm213_vm6 }
  0x9b   :  { %v197_v31 = vmul.f32 %v645_v20, %v601_v42  ;;  %v676_v41 = vpop.eup %402  ;;  %v210_v50 = vsub.f32 1.5, %v209_v30  ;;  %v189_v51 = vmul.f32 0.5, %v188_v44  ;;  %v297_v2 = vmul.f32 %v483_v11, %v245_v56 }
  0x9c   :  { %v167_v48 = vmul.f32 %v676_v41, %v625_v63  ;;  %406 = vrsqrt.f32 %v673_v40  ;;  %v221_v12 = vmul.f32 %v597_v36, %v220_v4  ;;  %v296_v11 = vmul.f32 %v471_v5, %v235_v14 }
  0x9d   :  { %v198_v54 = vmul.f32 %v645_v20, %v197_v31  ;;  %v691_v58 = vpop.eup %404  ;;  %408 = vrsqrt.f32 %v685_v49  ;;  %v211_v8 = vmul.f32 %v607_v47, %v210_v50  ;;  %v721_v9 = vmax.f32 %v79_v59, 1e-24 }
  0x9e   :  { %v177_v52 = vmul.f32 %v691_v58, %v636_v13  ;;  %v168_v0 = vmul.f32 %v676_v41, %v167_v48  ;;  %v190_v15 = vsub.f32 1.5, %v189_v51  ;;  %v308_v16 = vpack.c.bf16 %v297_v2, %v296_v11 }
  0x9f   :  { %v199_v62 = vmul.f32 0.5, %v198_v54  ;;  %v215_v6 = vsel %vm715_vm8, %v607_v47, %v211_v8  ;;  %v225_v5 = vsel %vm705_vm7, %v597_v36, %v221_v12  ;;  %vm193_vm10 = vweird.f32 %v638_v3 }
  0xa0   :  { %v178_v7 = vmul.f32 %v691_v58, %v177_v52  ;;  %vm202_vm11 = vweird.f32 %v601_v42  ;;  %vm203_vm12 = vweird.f32 %v645_v20  ;;  %v169_v46 = vmul.f32 0.5, %v168_v0  ;;  %vm746_vm13 = vmor %vm192_vm9, %vm193_vm10 }
  0xa1   :  { %v81_v1 = vpop.xlane.xlu0 %80  ;;  %v200_v22 = vsub.f32 1.5, %v199_v62  ;;  %410 = vrsqrt.f32 %v721_v9  ;;  %v49_v36 = vpop.xlane.xlu1 %48  ;;  %v294_v27 = vmul.f32 %v499_v18, %v215_v6  ;;  %v295_v28 = vmul.f32 %v497_v17, %v225_v5  ;;  %vm754_vm14 = vmor %vm202_vm11, %vm203_vm12 }
  0xa2   :  { %312 = vmatpush.bf16.xpose.msra.mxu0 %v309_v45  ;;  %v723_v53 = vmax.f32 %v81_v1, 1e-24  ;;  %v725_v21 = vpop.eup %406  ;;  %v179_v42 = vmul.f32 0.5, %v178_v7  ;;  %v191_v30 = vmul.f32 %v638_v3, %v190_v15  ;;  %v758_v35 = vmax.f32 %v49_v36, 1e-24 }
  0xa3   :  { %v734_v23 = vpop.eup %408  ;;  %v157_v47 = vmul.f32 %v725_v21, %v673_v40  ;;  %v201_v31 = vmul.f32 %v645_v20, %v200_v22  ;;  %v170_v18 = vsub.f32 1.5, %v169_v46  ;;  %v307_v37 = vpack.c.bf16 %v295_v28, %v294_v27 }
  0xa4   :  { %412 = vrsqrt.f32 %v723_v53  ;;  %v147_v57 = vmul.f32 %v734_v23, %v685_v49  ;;  %v180_v43 = vsub.f32 1.5, %v179_v42  ;;  %v195_v45 = vsel %vm746_vm13, %v638_v3, %v191_v30 }
  0xa5   :  { %v158_v17 = vmul.f32 %v725_v21, %v157_v47  ;;  %v205_v4 = vsel %vm754_vm14, %v645_v20, %v201_v31  ;;  %vm172_vm15 = vweird.f32 %v625_v63  ;;  %vm173_vm0 = vweird.f32 %v676_v41 }
  0xa6   :  { %v148_v44 = vmul.f32 %v734_v23, %v147_v57  ;;  %vm182_vm1 = vweird.f32 %v636_v13  ;;  %vm183_vm2 = vweird.f32 %v691_v58  ;;  %414 = vrsqrt.f32 %v758_v35  ;;  %vm781_vm3 = vmor %vm172_vm15, %vm173_vm0 }
  0xa7   :  { %v761_v10 = vpop.eup %410  ;;  %v159_v54 = vmul.f32 0.5, %v158_v17  ;;  %v292_v56 = vmul.f32 %v501_v19, %v195_v45  ;;  %v293_v20 = vmul.f32 %v512_v24, %v205_v4  ;;  %v171_v14 = vmul.f32 %v676_v41, %v170_v18  ;;  %vm789_vm4 = vmor %vm182_vm1, %vm183_vm2 }
  0xa8   :  { %v127_v3 = vmul.f32 %v761_v10, %v721_v9  ;;  %v149_v63 = vmul.f32 0.5, %v148_v44  ;;  %v181_v51 = vmul.f32 %v691_v58, %v180_v43  ;;  %vm162_vm5 = vweird.f32 %v673_v40 }
  0xa9   :  { %v160_v59 = vsub.f32 1.5, %v159_v54  ;;  %v306_v24 = vpack.c.bf16 %v293_v20, %v292_v56  ;;  %v175_v1 = vsel %vm781_vm3, %v676_v41, %v171_v14  ;;  %vm163_vm6 = vweird.f32 %v725_v21 }
  0xaa   :  { %313 = vmatpush.bf16.xpose.msra.mxu0 %v308_v16  ;;  %v770_v50 = vpop.eup %412  ;;  %v128_v19 = vmul.f32 %v761_v10, %v127_v3  ;;  %v150_v62 = vsub.f32 1.5, %v149_v63  ;;  %v185_v8 = vsel %vm789_vm4, %v691_v58, %v181_v51  ;;  %vm152_vm7 = vweird.f32 %v685_v49  ;;  %vm808_vm9 = vmor %vm162_vm5, %vm163_vm6 }
  0xab   :  { %v137_v13 = vmul.f32 %v770_v50, %v723_v53  ;;  %vm153_vm8 = vweird.f32 %v734_v23  ;;  %v290_v61 = vmul.f32 %v514_v25, %v175_v1  ;;  %v291_v11 = vmul.f32 %v516_v26, %v185_v8 }
  0xac   :  { %v415_v60 = vpop.eup %414  ;;  %v129_v0 = vmul.f32 0.5, %v128_v19  ;;  %v151_v40 = vmul.f32 %v734_v23, %v150_v62  ;;  %v161_v15 = vmul.f32 %v725_v21, %v160_v59  ;;  %vm154_vm10 = vmor %vm152_vm7, %vm153_vm8  ;;  %vm132_vm11 = vweird.f32 %v721_v9 }
  0xad   :  { %v138_v52 = vmul.f32 %v770_v50, %v137_v13  ;;  %v52_v12 = vmul.f32 %v415_v60, %v758_v35  ;;  %v305_v16 = vpack.c.bf16 %v291_v11, %v290_v61  ;;  %vm133_vm12 = vweird.f32 %v761_v10 }
  0xae   :  { %v130_v7 = vsub.f32 1.5, %v129_v0  ;;  %v155_v6 = vsel %vm154_vm10, %v734_v23, %v151_v40  ;;  %v165_v25 = vsel %vm808_vm9, %v725_v21, %v161_v15  ;;  %vm142_vm13 = vweird.f32 %v723_v53  ;;  %vm134_vm15 = vmor %vm132_vm11, %vm133_vm12 }
  0xaf   :  { %v139_v58 = vmul.f32 0.5, %v138_v52  ;;  %v53_v49 = vmul.f32 %v415_v60, %v52_v12  ;;  %vm143_vm14 = vweird.f32 %v770_v50  ;;  %v288_v5 = vmul.f32 %v532_v33, %v155_v6 }
  0xb0   :  { %v289_v46 = vmul.f32 %v530_v32, %v165_v25  ;;  %v131_v23 = vmul.f32 %v761_v10, %v130_v7  ;;  %vm144_vm0 = vmor %vm142_vm13, %vm143_vm14  ;;  %vm57_vm1 = vweird.f32 %v758_v35  ;;  %vm58_vm2 = vweird.f32 %v415_v60 }
  0xb1   :  { %v140_v22 = vsub.f32 1.5, %v139_v58  ;;  %v54_v26 = vmul.f32 0.5, %v53_v49  ;;  %vm59_vm3 = vmor %vm57_vm1, %vm58_vm2 }
  0xb2   :  { %314 = vmatpush.bf16.xpose.msra.mxu0 %v307_v37  ;;  %v304_v9 = vpack.c.bf16 %v289_v46, %v288_v5  ;;  %v135_v36 = vsel %vm134_vm15, %v761_v10, %v131_v23 }
  0xb3   :  { %v141_v47 = vmul.f32 %v770_v50, %v140_v22  ;;  %v55_v21 = vsub.f32 1.5, %v54_v26  ;;  %v286_v33 = vmul.f32 %v534_v34, %v135_v36 }
  0xb5   :  { %v145_v27 = vsel %vm144_vm0, %v770_v50, %v141_v47  ;;  %v56_v53 = vmul.f32 %v415_v60, %v55_v21 }
  0xb6   :  { %v287_v32 = vmul.f32 %v547_v39, %v145_v27 }
  0xb7   :  { %v60_v29 = vsel %vm59_vm3, %v415_v60, %v56_v53 }
  0xb8   :  { %v303_v28 = vpack.c.bf16 %v287_v32, %v286_v33  ;;  %v61_v42 = vmul.f32 %v60_v29, %v545_v38 }
  0xba   :  { %315 = vmatpush.bf16.xpose.msra.mxu0 %v306_v24  ;;  %v302_v57 = vpack.c.bf16 %v61_v42, %v61_v42 }
  0xc2   :  { %316 = vmatpush.bf16.xpose.msra.mxu0 %v305_v16 }
  0xca   :  { %317 = vmatpush.bf16.xpose.msra.mxu0 %v304_v9 }
  0xd2   :  { %318 = vmatpush.bf16.xpose.msra.mxu0 %v303_v28 }
  0xd9   :  { %319 = vmatmul.bf16.vlgmr.msra.gmra.mxu0 %v302_v57 }
 0x156   :  { %v320_v30 = vpop.f32.mrf.mxu0 }
 0x157   :  { %v324_v31 = vmul.f32 16.0, %v320_v30 }
 0x159   :  { %325 = vst [vmem:[#allocation2] sm:$0x3] %v324_v31 }
 0x15a   :  { %336 = dma.vmem_to_hbm [thread:$0]  %s332_s26, 32, %s334_s29, [#allocation3]  }
 0x15e   :  { %v322_v34 = vpop.f32.mrf.mxu0 }
 0x15f   :  { %440 = dma.done.wait [#allocation3], 32  }
 0x160   :  { %441 = vsyncadd [#allocation3], 4294967264 }
 0x161   :  { %341 = vsyncpa [#allocation3], 1 }

// kernel: _lambda_.11
= control target key start
LH: loop header
LB: loop body
LE: loop exit
PB: predicated region body
PF: predicated region fallthrough
CT: control target
= control target key end

     0   :  { %vm171_vm0 = vcmask 523264   ;;  %s442_s1 = inlined_call_operand.vmem [shape: bf16[128,192], index: 1, kind: input, shape index: {}]   ;;  %s443_s0 = inlined_call_operand.vmem [shape: bf16[32,128], index: 0, kind: input, shape index: {}]   ;;  %s444_s2 = inlined_call_operand.vmem [shape: f32[1,192], index: 2, kind: input, shape index: {}]   ;;  %s445_s3 = inlined_call_operand.vmem [shape: f32[32,192], index: 3, kind: output, shape index: {}]  }
   0x1   :  { %v249_v0 = vld [vmem:[%s442_s1 + $0x70] sm:$0xf]  ;;  %v272_v1 = vld [vmem:[%s442_s1 + $0x74] sm:$0xf0]  ;;  %v271_v2 = vld [vmem:[%s442_s1 + $0x74] sm:$0xf] }
   0x2   :  { %v250_v3 = vor.u32 %v272_v1, %v249_v0  ;;  %v251_v4 = vld [vmem:[%s442_s1 + $0x78] sm:$0xf0]  ;;  %v241_v5 = vld [vmem:[%s442_s1 + $0x60] sm:$0xf]  ;;  %v270_v6 = vld [vmem:[%s442_s1 + $0x64] sm:$0xf0] }
   0x3   :  { %v254_v7 = vor.u32 %v271_v2, %v251_v4  ;;  %v269_v8 = vld [vmem:[%s442_s1 + $0x64] sm:$0xf]  ;;  %v243_v9 = vld [vmem:[%s442_s1 + $0x68] sm:$0xf0]  ;;  %v242_v10 = vor.u32 %v270_v6, %v241_v5  ;;  %v233_v12 = vld [vmem:[%s442_s1 + $0x50] sm:$0xf] }
   0x4   :  { %132 = vmatpush.bf16.msra.mxu0 %v250_v3  ;;  %273 = vmatpush.bf16.msra.mxu2 %v250_v3  ;;  %v246_v11 = vor.u32 %v269_v8, %v243_v9  ;;  %v268_v13 = vld [vmem:[%s442_s1 + $0x54] sm:$0xf0]  ;;  %v267_v14 = vld [vmem:[%s442_s1 + $0x54] sm:$0xf]  ;;  %v235_v15 = vld [vmem:[%s442_s1 + $0x58] sm:$0xf0] }
   0x5   :  { %151 = vmatpush.bf16.msra.mxu1 %v254_v7  ;;  %281 = vmatpush.bf16.msra.mxu3 %v254_v7  ;;  %v234_v16 = vor.u32 %v268_v13, %v233_v12  ;;  %v238_v17 = vor.u32 %v267_v14, %v235_v15  ;;  %v225_v18 = vld [vmem:[%s442_s1 + $0x40] sm:$0xf]  ;;  %v266_v19 = vld [vmem:[%s442_s1 + $0x44] sm:$0xf0]  ;;  %v265_v20 = vld [vmem:[%s442_s1 + $0x44] sm:$0xf] }
   0x6   :  { %v227_v21 = vld [vmem:[%s442_s1 + $0x48] sm:$0xf0]  ;;  %v226_v22 = vor.u32 %v266_v19, %v225_v18  ;;  %v217_v24 = vld [vmem:[%s442_s1 + $0x30] sm:$0xf]  ;;  %v264_v25 = vld [vmem:[%s442_s1 + $0x34] sm:$0xf0] }
   0x7   :  { %v230_v23 = vor.u32 %v265_v20, %v227_v21  ;;  %v263_v26 = vld [vmem:[%s442_s1 + $0x34] sm:$0xf]  ;;  %v219_v27 = vld [vmem:[%s442_s1 + $0x38] sm:$0xf0]  ;;  %v218_v28 = vor.u32 %v264_v25, %v217_v24  ;;  %v209_v30 = vld [vmem:[%s442_s1 + $0x20] sm:$0xf] }
   0x8   :  { %133 = vmatpush.bf16.msra.mxu0 %v242_v10  ;;  %274 = vmatpush.bf16.msra.mxu2 %v242_v10  ;;  %v222_v29 = vor.u32 %v263_v26, %v219_v27  ;;  %v262_v31 = vld [vmem:[%s442_s1 + $0x24] sm:$0xf0]  ;;  %v261_v32 = vld [vmem:[%s442_s1 + $0x24] sm:$0xf]  ;;  %v211_v33 = vld [vmem:[%s442_s1 + $0x28] sm:$0xf0] }
   0x9   :  { %152 = vmatpush.bf16.msra.mxu1 %v246_v11  ;;  %282 = vmatpush.bf16.msra.mxu3 %v246_v11  ;;  %v210_v34 = vor.u32 %v262_v31, %v209_v30  ;;  %v214_v35 = vor.u32 %v261_v32, %v211_v33  ;;  %v201_v36 = vld [vmem:[%s442_s1 + $0x10] sm:$0xf]  ;;  %v260_v37 = vld [vmem:[%s442_s1 + $0x14] sm:$0xf0]  ;;  %v259_v38 = vld [vmem:[%s442_s1 + $0x14] sm:$0xf] }
   0xa   :  { %v203_v39 = vld [vmem:[%s442_s1 + $0x18] sm:$0xf0]  ;;  %v202_v40 = vor.u32 %v260_v37, %v201_v36  ;;  %v193_v42 = vld [vmem:[%s442_s1] sm:$0xf]  ;;  %v258_v43 = vld [vmem:[%s442_s1 + $0x4] sm:$0xf0] }
   0xb   :  { %v206_v41 = vor.u32 %v259_v38, %v203_v39  ;;  %v257_v44 = vld [vmem:[%s442_s1 + $0x4] sm:$0xf]  ;;  %v195_v45 = vld [vmem:[%s442_s1 + $0x8] sm:$0xf0]  ;;  %v194_v46 = vor.u32 %v258_v43, %v193_v42  ;;  %v34_v50 = vld [vmem:[%s444_s2] sm:$0x3] }
   0xc   :  { %134 = vmatpush.bf16.msra.mxu0 %v234_v16  ;;  %275 = vmatpush.bf16.msra.mxu2 %v234_v16  ;;  %v198_v47 = vor.u32 %v257_v44, %v195_v45  ;;  %v255_v48 = vld [vmem:[%s443_s0] sm:$0xff]  ;;  %v256_v49 = vld [vmem:[%s443_s0 + $0x8] sm:$0xff]  ;;  %v36_v51 = vperm.slane %v34_v50, 0  ;;  %v37_v52 = vperm.slane %v34_v50, 1 }
   0xd   :  { %153 = vmatpush.bf16.msra.mxu1 %v238_v17  ;;  %283 = vmatpush.bf16.msra.mxu3 %v238_v17 }
  0x10   :  { %135 = vmatpush.bf16.msra.mxu0 %v226_v22  ;;  %276 = vmatpush.bf16.msra.mxu2 %v226_v22 }
  0x11   :  { %154 = vmatpush.bf16.msra.mxu1 %v230_v23  ;;  %284 = vmatpush.bf16.msra.mxu3 %v230_v23 }
  0x14   :  { %136 = vmatpush.bf16.msra.mxu0 %v218_v28  ;;  %277 = vmatpush.bf16.msra.mxu2 %v218_v28 }
  0x15   :  { %155 = vmatpush.bf16.msra.mxu1 %v222_v29  ;;  %285 = vmatpush.bf16.msra.mxu3 %v222_v29 }
  0x18   :  { %137 = vmatpush.bf16.msra.mxu0 %v210_v34  ;;  %278 = vmatpush.bf16.msra.mxu2 %v210_v34 }
  0x19   :  { %156 = vmatpush.bf16.msra.mxu1 %v214_v35  ;;  %286 = vmatpush.bf16.msra.mxu3 %v214_v35 }
  0x1c   :  { %138 = vmatpush.bf16.msra.mxu0 %v202_v40  ;;  %279 = vmatpush.bf16.msra.mxu2 %v202_v40 }
  0x1d   :  { %157 = vmatpush.bf16.msra.mxu1 %v206_v41  ;;  %287 = vmatpush.bf16.msra.mxu3 %v206_v41 }
  0x20   :  { %139 = vmatpush.bf16.msra.mxu0 %v194_v46  ;;  %280 = vmatpush.bf16.msra.mxu2 %v194_v46 }
  0x21   :  { %158 = vmatpush.bf16.msra.mxu1 %v198_v47  ;;  %288 = vmatpush.bf16.msra.mxu3 %v198_v47 }
  0x23   :  { %140 = vmatmul.bf16.vlgmr.msra.gmra.mxu0 %v255_v48  ;;  %145 = vmatmul.bf16.vlgmr.msra.gmra.mxu2 %v256_v49 }
  0x24   :  { %159 = vmatmul.bf16.vlgmr.msra.gmra.mxu1 %v255_v48  ;;  %164 = vmatmul.bf16.vlgmr.msra.gmra.mxu3 %v256_v49 }
  0xa0   :  { %v141_v53 = vpop.f32.mrf.mxu0 }
  0xa1   :  { %v142_v54 = vadd.f32 %v141_v53, %v36_v51  ;;  %v160_v55 = vpop.f32.mrf.mxu1 }
  0xa2   :  { %v161_v56 = vadd.f32 %v160_v55, %v37_v52 }
  0xa3   :  { %170 = vst [vmem:[%s445_s3] sm:$0xff] %v142_v54 }
  0xa4   :  { %172 = vst.msk [vmem:[%s445_s3 + $0x8] sm:$0xff] %vm171_vm0, %v161_v56 }
  0xa6   :  { %v146_v57 = vpop.f32.mrf.mxu2 }
  0xa7   :  { %v147_v58 = vadd.f32 %v146_v57, %v36_v51  ;;  %v165_v59 = vpop.f32.mrf.mxu3 }
  0xa8   :  { %v166_v60 = vadd.f32 %v165_v59, %v37_v52  ;;  %v143_v61 = vpop.f32.mrf.mxu0 }
  0xa9   :  { %175 = vst [vmem:[%s445_s3 + $0x20] sm:$0xff] %v147_v58  ;;  %v144_v62 = vadd.f32 %v143_v61, %v36_v51  ;;  %v162_v63 = vpop.f32.mrf.mxu1 }
  0xaa   :  { %176 = vst.msk [vmem:[%s445_s3 + $0x28] sm:$0xff] %vm171_vm0, %v166_v60  ;;  %v163_v0 = vadd.f32 %v162_v63, %v37_v52 }
  0xab   :  { %173 = vst [vmem:[%s445_s3 + $0x10] sm:$0xff] %v144_v62 }
  0xac   :  { %174 = vst.msk [vmem:[%s445_s3 + $0x18] sm:$0xff] %vm171_vm0, %v163_v0 }
  0xae   :  { %v148_v1 = vpop.f32.mrf.mxu2 }
  0xaf   :  { %v149_v2 = vadd.f32 %v148_v1, %v36_v51  ;;  %v167_v3 = vpop.f32.mrf.mxu3 }
  0xb0   :  { %v168_v4 = vadd.f32 %v167_v3, %v37_v52 }
  0xb1   :  { %177 = vst [vmem:[%s445_s3 + $0x30] sm:$0xff] %v149_v2 }
  0xb2   :  { %178 = vst.msk [vmem:[%s445_s3 + $0x38] sm:$0xff] %vm171_vm0, %v168_v4 }

// kernel: _lambda_.8
= control target key start
LH: loop header
LB: loop body
LE: loop exit
PB: predicated region body
PF: predicated region fallthrough
CT: control target
= control target key end

     0   :  { %s2499_s21 = smov 0   ;;  %s2501_s22 = smov 0   ;;  %s2845_s0 = inlined_call_operand.vmem [shape: bf16[2,5,128], index: 0, kind: input, shape index: {}]   ;;  %s2846_s1 = inlined_call_operand.vmem [shape: f32[1,5,128], index: 1, kind: input, shape index: {}]   ;;  %s2847_s2 = inlined_call_operand.vmem [shape: f32[2,1,128], index: 2, kind: input, shape index: {}]   ;;  %s2848_s3 = inlined_call_operand.vmem [shape: f32[2,1,128], index: 3, kind: input, shape index: {}]   ;;  %s2849_s4 = inlined_call_operand.vmem [shape: bf16[2,128,384], index: 4, kind: input, shape index: {}]   ;;  %s2850_s5 = inlined_call_operand.vmem [shape: f32[2,1,384], index: 5, kind: input, shape index: {}]   ;;  %s2851_s6 = inlined_call_operand.vmem [shape: bf16[2,128,128], index: 6, kind: input, shape index: {}]   ;;  %s2852_s7 = inlined_call_operand.vmem [shape: f32[2,1,128], index: 7, kind: input, shape index: {}]   ;;  %s2853_s8 = inlined_call_operand.vmem [shape: f32[2,1,128], index: 8, kind: input, shape index: {}]   ;;  %s2854_s9 = inlined_call_operand.vmem [shape: f32[2,1,128], index: 9, kind: input, shape index: {}]   ;;  %s2855_s10 = inlined_call_operand.vmem [shape: bf16[2,128,256], index: 10, kind: input, shape index: {}]   ;;  %s2856_s11 = inlined_call_operand.vmem [shape: f32[2,1,256], index: 11, kind: input, shape index: {}]   ;;  %s2857_s12 = inlined_call_operand.vmem [shape: bf16[2,256,128], index: 12, kind: input, shape index: {}]   ;;  %s2858_s13 = inlined_call_operand.vmem [shape: f32[2,1,128], index: 13, kind: input, shape index: {}]   ;;  %s2859_s14 = inlined_call_operand.vmem [shape: f32[1,128], index: 14, kind: input, shape index: {}]   ;;  %s2860_s15 = inlined_call_operand.vmem [shape: f32[1,128], index: 15, kind: input, shape index: {}]   ;;  %s2861_s16 = inlined_call_operand.vmem [shape: f32[2,5,128], index: 16, kind: output, shape index: {}]  }
   0x1   :  { %2866 = sst [smem:[#allocation9_spill]] %s2845_s0  ;;  %s2503_s23 = smov 0  }
   0x2   :  { %2867 = sst [smem:[#allocation10_spill]] %s2846_s1  ;;  %s2505_s24 = smov 0  }
   0x3   :  { %2868 = sst [smem:[#allocation11_spill]] %s2849_s4  ;;  %s2507_s25 = smov 0  }
   0x4   :  { %2869 = sst [smem:[#allocation12_spill]] %s2850_s5 }
   0x5   :  { %2870 = sst [smem:[#allocation13_spill]] %s2851_s6 }
   0x6   :  { %2871 = sst [smem:[#allocation14_spill]] %s2854_s9 }
   0x7   :  { %2872 = sst [smem:[#allocation15_spill]] %s2858_s13 }
   0x8   :  { %2873 = sst [smem:[#allocation16_spill]] %s2859_s14 }
   0x9   :  { %2874 = sst [smem:[#allocation17_spill]] %s2860_s15 }
   0xa   :  { %2875 = sst [smem:[#allocation18_spill]] %s2861_s16 }
   0xb LB: > { %2876 = sst [smem:[#allocation3_spill]] %s2391_s21  ;;  %s35_s26 = sadd.s32 1, %s2399_s23  ;;  %s2407_s25 = sphi %s2507_s25, %s26_s25   ;;  %s2403_s24 = sphi %s2505_s24, %s2905_s24   ;;  %s2399_s23 = sphi %s2503_s23, %s2904_s23   ;;  %s2395_s22 = sphi %s2501_s22, %s2903_s22   ;;  %s2391_s21 = sphi %s2499_s21, %s2902_s21  }
   0xc   : > { %2877 = sst [smem:[#allocation4_spill]] %s2399_s23  ;;  %s38_s27 = sadd.s32 1, %s2403_s24 }
   0xd   : > { %2878 = sst [smem:[#allocation5_spill]] %s2403_s24  ;;  %p36_p0 = scmp.ge.s32.totalorder %s35_s26, 2 }
   0xe   : > { %2879 = sst [smem:[#allocation6_spill]] %s2407_s25  ;;  %p1936_p1 = scmp.ge.s32.totalorder %s2407_s25, 1 }
   0xf   : > { %p579_p2 = scmp.lt.s32.totalorder %s2407_s25, 5  ;;  %s2907_s26 = smov (%p36_p0, %s35_s26), 0 }
  0x10   : > { %2880 = sst [smem:[#allocation7_spill]] %s2907_s26  ;;  %s2909_s27 = smov (!%p36_p0, %s38_s27), %s2403_s24 }
  0x11   : > { %p580_p3 = pnand %p1936_p1, %p579_p2  ;;  %p40_p4 = scmp.ge.s32.totalorder %s2909_s27, 2 }
  0x12   : > { %p673_p5 = scmp.lt.s32.totalorder (!%p580_p3), %s2395_s22, 1  ;;  %p677_p6 = scmp.lt.s32.totalorder (!%p580_p3), %s2391_s21, 1 }
  0x13   : > { %s2911_s27 = smov (%p40_p4, %s2909_s27), 0  ;;  %583 = sbr.rel (%p580_p3) target bundleno = 2495 (0x9bf), region = 84 }
  0x14   : > { %2881 = sst [smem:[#allocation8_spill]] %s2911_s27 }
  0x15   : > { %s2882_s18 = sld [smem:[#allocation9_spill]] (!%p580_p3) }
  0x16   : > { %s2883_s4 = sld [smem:[#allocation11_spill]] (!%p580_p3) }
  0x17   : > { %s2884_s6 = sld [smem:[#allocation13_spill]] (!%p580_p3) }
  0x18   : > { %s2913_s22 = smov (!%p673_p5, %s2395_s22), 1  ;;  %s2885_s5 = sld [smem:[#allocation12_spill]] }
  0x19   : > { %s2533_s28 = scalar_select %p677_p6, %s2391_s21, 1 }
  0x1a   : > { %s1937_s29 = sshll.u32 %s2913_s22, 2  ;;  %s1946_s30 = sshll.u32 %s2913_s22, 3 }
  0x1b   : > { %s676_s19 = scalar_lea.vmem %s2882_s18, %s1937_s29  ;;  %s2286_s15 = smul.u32 192, %s2533_s28 }
  0x1c   : > { %s2287_s14 = smul.u32 3, %s2533_s28  ;;  %s2219_s1 = sshll.u32 %s2533_s28, 6 }
  0x1d   : > { %s2552_s22 = scalar_lea.vmem %s2883_s4, %s2286_s15  ;;  %s2557_s29 = scalar_lea.vmem %s2884_s6, %s2219_s1 }
  0x1e   : > { %s2562_s18 = scalar_lea.vmem %s2885_s5, %s2287_s14  ;;  %s2220_s13 = sshll.u32 %s2533_s28, 7 }
  0x1f   : > { %s1943_s1 = sshll.u32 %s2533_s28, 1  ;;  %s2581_s27 = scalar_lea.vmem %s2855_s10, %s2220_s13 }
  0x20   : > { %s2586_s23 = scalar_lea.vmem %s2856_s11, %s1943_s1  ;;  %s2591_s25 = scalar_lea.vmem %s2857_s12, %s2220_s13 }
  0x21   : > { %s2887_s21 = sld [smem:[#allocation15_spill]] }
  0x22   : > { %s2888_s9 = sld [smem:[#allocation18_spill]] }
  0x23   : > { %s2889_s0 = sld [smem:[#allocation3_spill]] }
  0x27   : > { %s722_s4 = scalar_lea.vmem %s2887_s21, %s2533_s28 }
  0x28   : > { %s2600_s6 = scalar_lea.vmem %s2888_s9, %s1946_s30 }
  0x29   : > { %p1947_p7 = scmp.ne.s32.totalorder %s2889_s0, 0 }
  0x2a   : > { %s2890_s17 = sld [smem:[#allocation10_spill]] (!%p1947_p7) }
  0x2b   : > { %731 = sbr.rel (%p1947_p7) target bundleno = 54 (0x36), region = 88 }
  0x30   : > { %v732_v0 = vld [vmem:[%s676_s19] sm:$0x7] }
  0x31   : > { %v734_v1 = vld [vmem:[%s2890_s17] sm:$0x1f]  ;;  %v733_v2 = vunpack.c.l.bf16 %v732_v0 }
  0x33   : > { %v735_v3 = vadd.f32 %v734_v1, %v733_v2 }
  0x35   : > { %736 = vst [vmem:[#allocation2] sm:$0x1f] %v735_v3 }
  0x36 PF: > { %vm740_vm0 = vcmask 1044480   ;;  %v2409_v6 = vmov 128.0   ;;  %v2034_v7 = vld [vmem:[%s2552_s22 + $0xa8] sm:$0xf]  ;;  %v2244_v8 = vld [vmem:[%s2552_s22 + $0xb0] sm:$0xf0]  ;;  %s2891_s30 = scalar_lea.vmem %s2847_s2, %s2533_s28  ;;  %s2892_s20 = scalar_lea.vmem %s2848_s3, %s2533_s28 }
  0x37   : > { %2339 = vrcp.f32 %v2409_v6  ;;  %v2243_v9 = vld [vmem:[%s2552_s22 + $0xac] sm:$0xf]  ;;  %v2035_v10 = vor.u32 %v2244_v8, %v2034_v7  ;;  %v2036_v11 = vld [vmem:[%s2552_s22 + $0xb4] sm:$0xf0]  ;;  %v2042_v12 = vld [vmem:[%s2552_s22 + $0xb0] sm:$0xf]  ;;  %s2893_s26 = scalar_lea.vmem %s2852_s7, %s2533_s28  ;;  %s2894_s21 = scalar_lea.vmem %s2853_s8, %s2533_s28 }
  0x38   : > { %v2245_v13 = vld [vmem:[%s2552_s22 + $0xb8] sm:$0xf0]  ;;  %v2039_v14 = vor.u32 %v2243_v9, %v2036_v11  ;;  %v2022_v27 = vld [vmem:[%s2552_s22 + $0x90] sm:$0xf]  ;;  %v2240_v29 = vld [vmem:[%s2552_s22 + $0x94] sm:$0xf] }
  0x39   : > { %v2043_v15 = vor.u32 %v2245_v13, %v2042_v12  ;;  %947 = vmatpush.bf16.msra.mxu0 %v2035_v10  ;;  %v2241_v28 = vld [vmem:[%s2552_s22 + $0x98] sm:$0xf0]  ;;  %v2024_v31 = vld [vmem:[%s2552_s22 + $0x9c] sm:$0xf0]  ;;  %v2030_v32 = vld [vmem:[%s2552_s22 + $0x98] sm:$0xf] }
  0x3a   : > { %960 = vmatpush.bf16.msra.mxu1 %v2039_v14  ;;  %v2023_v30 = vor.u32 %v2241_v28, %v2022_v27  ;;  %v2242_v33 = vld [vmem:[%s2552_s22 + $0xa0] sm:$0xf0]  ;;  %v2027_v34 = vor.u32 %v2240_v29, %v2024_v31  ;;  %v2010_v36 = vld [vmem:[%s2552_s22 + $0x78] sm:$0xf]  ;;  %v2237_v38 = vld [vmem:[%s2552_s22 + $0x7c] sm:$0xf] }
  0x3b   : > { %973 = vmatpush.bf16.msra.mxu2 %v2043_v15  ;;  %v2031_v35 = vor.u32 %v2242_v33, %v2030_v32  ;;  %v2238_v37 = vld [vmem:[%s2552_s22 + $0x80] sm:$0xf0]  ;;  %v2012_v40 = vld [vmem:[%s2552_s22 + $0x84] sm:$0xf0]  ;;  %v2018_v41 = vld [vmem:[%s2552_s22 + $0x80] sm:$0xf] }
  0x3c   : > { %v2606_v4 = vld [vmem:[#allocation2] sm:$0x1f]  ;;  %v2011_v39 = vor.u32 %v2238_v37, %v2010_v36  ;;  %v2239_v42 = vld [vmem:[%s2552_s22 + $0x88] sm:$0xf0]  ;;  %v2015_v43 = vor.u32 %v2237_v38, %v2012_v40  ;;  %v2000_v49 = vld [vmem:[%s2552_s22 + $0x6c] sm:$0xf0] }
  0x3d   : > { %v741_v5 = vsel %vm740_vm0, %v2606_v4, 0.0  ;;  %v2340_v16 = vpop.eup %2339  ;;  %948 = vmatpush.bf16.msra.mxu0 %v2023_v30  ;;  %v2019_v44 = vor.u32 %v2239_v42, %v2018_v41  ;;  %v1998_v45 = vld [vmem:[%s2552_s22 + $0x60] sm:$0xf]  ;;  %v2235_v46 = vld [vmem:[%s2552_s22 + $0x68] sm:$0xf0]  ;;  %vm1006_vm5 = vcmask 261120  }
  0x3e   : > { %742 = vadd.xlane.f32.xlu0 %v741_v5  ;;  %v745_v17 = vmul.f32 128.0, %v2340_v16  ;;  %vm749_vm1 = vweird.f32 %v2340_v16  ;;  %961 = vmatpush.bf16.msra.mxu1 %v2027_v34  ;;  %v2234_v47 = vld [vmem:[%s2552_s22 + $0x64] sm:$0xf]  ;;  %v1999_v48 = vor.u32 %v2235_v46, %v1998_v45  ;;  %v2006_v50 = vld [vmem:[%s2552_s22 + $0x68] sm:$0xf]  ;;  %vm1043_vm6 = vcmask 1041408  }
  0x3f   : > { %974 = vmatpush.bf16.msra.mxu2 %v2031_v35  ;;  %v2236_v51 = vld [vmem:[%s2552_s22 + $0x70] sm:$0xf0]  ;;  %v2003_v52 = vor.u32 %v2234_v47, %v2000_v49  ;;  %v1986_v54 = vld [vmem:[%s2552_s22 + $0x48] sm:$0xf]  ;;  %v2231_v56 = vld [vmem:[%s2552_s22 + $0x4c] sm:$0xf] }
  0x40   : > { %v746_v18 = vsub.f32 1.0, %v745_v17  ;;  %v2007_v53 = vor.u32 %v2236_v51, %v2006_v50  ;;  %v2232_v55 = vld [vmem:[%s2552_s22 + $0x50] sm:$0xf0]  ;;  %v1988_v58 = vld [vmem:[%s2552_s22 + $0x54] sm:$0xf0]  ;;  %vm1044_vm7 = vcmask 1042432  }
  0x41   : > { %949 = vmatpush.bf16.msra.mxu0 %v2011_v39  ;;  %v1987_v57 = vor.u32 %v2232_v55, %v1986_v54  ;;  %v1994_v59 = vld [vmem:[%s2552_s22 + $0x50] sm:$0xf]  ;;  %v2233_v60 = vld [vmem:[%s2552_s22 + $0x58] sm:$0xf0]  ;;  %v1991_v61 = vor.u32 %v2231_v56, %v1988_v58  ;;  %v2228_v1 = vld [vmem:[%s2552_s22 + $0x34] sm:$0xf] }
  0x42   : > { %v747_v19 = vmul.f32 %v2340_v16, %v746_v18  ;;  %962 = vmatpush.bf16.msra.mxu1 %v2015_v43  ;;  %v1995_v62 = vor.u32 %v2233_v60, %v1994_v59  ;;  %v1974_v63 = vld [vmem:[%s2552_s22 + $0x30] sm:$0xf]  ;;  %v2229_v0 = vld [vmem:[%s2552_s22 + $0x38] sm:$0xf0]  ;;  %v1976_v3 = vld [vmem:[%s2552_s22 + $0x3c] sm:$0xf0] }
  0x43   : > { %975 = vmatpush.bf16.msra.mxu2 %v2019_v44  ;;  %v1975_v2 = vor.u32 %v2229_v0, %v1974_v63  ;;  %v1982_v5 = vld [vmem:[%s2552_s22 + $0x38] sm:$0xf]  ;;  %v2230_v6 = vld [vmem:[%s2552_s22 + $0x40] sm:$0xf0]  ;;  %v1979_v7 = vor.u32 %v2228_v1, %v1976_v3  ;;  %v2225_v11 = vld [vmem:[%s2552_s22 + $0x1c] sm:$0xf] }
  0x44   : > { %v748_v20 = vadd.f32 %v2340_v16, %v747_v19  ;;  %v1983_v8 = vor.u32 %v2230_v6, %v1982_v5  ;;  %v1962_v9 = vld [vmem:[%s2552_s22 + $0x18] sm:$0xf]  ;;  %v2226_v10 = vld [vmem:[%s2552_s22 + $0x20] sm:$0xf0]  ;;  %v1964_v13 = vld [vmem:[%s2552_s22 + $0x24] sm:$0xf0] }
  0x45   : > { %950 = vmatpush.bf16.msra.mxu0 %v1999_v48  ;;  %v1963_v12 = vor.u32 %v2226_v10, %v1962_v9  ;;  %v1970_v14 = vld [vmem:[%s2552_s22 + $0x20] sm:$0xf]  ;;  %v2227_v15 = vld [vmem:[%s2552_s22 + $0x28] sm:$0xf0]  ;;  %v2410_v56 = vmov 65535   ;;  %s2412_s16 = smov 96  }
  0x46   : > { %v2616_v21 = vsel %vm749_vm1, %v2340_v16, %v748_v20  ;;  %963 = vmatpush.bf16.msra.mxu1 %v2003_v52  ;;  %v1967_v16 = vor.u32 %v2225_v11, %v1964_v13  ;;  %v1971_v17 = vor.u32 %v2227_v15, %v1970_v14  ;;  %v1950_v18 = vld [vmem:[%s2552_s22] sm:$0xf]  ;;  %v2223_v19 = vld [vmem:[%s2552_s22 + $0x8] sm:$0xf0]  ;;  %v2222_v20 = vld [vmem:[%s2552_s22 + $0x4] sm:$0xf] }
  0x47   : > { %976 = vmatpush.bf16.msra.mxu2 %v2007_v53  ;;  %v2333_v38 = vld [vmem:[%s2891_s30] ss:$0 sm:$0xff]  ;;  %s2413_s13 = smov 64   ;;  %vm1026_vm8 = vcmask 36864   ;;  %vm1039_vm9 = vcmask 39936   ;;  %s2895_s14 = sld [smem:[#allocation14_spill]] }
  0x48   : > { %v2334_v41 = vld [vmem:[%s2892_s20] ss:$0 sm:$0xff]  ;;  %s2898_s9 = sld [smem:[#allocation3_spill]] }
  0x49   : > { %951 = vmatpush.bf16.msra.mxu0 %v1987_v57  ;;  %v811_v45 = vld [vmem:[%s2562_s18] sm:$0x7]  ;;  %v1045_v57 = vsel %vm1043_vm6, 4294967295, %v2410_v56  ;;  %s2411_s18 = smov 32  }
  0x4a   : > { %964 = vmatpush.bf16.msra.mxu1 %v1991_v61  ;;  %v813_v46 = vperm.slane %v811_v45, 0  ;;  %v814_v47 = vperm.slane %v811_v45, 1  ;;  %v815_v53 = vperm.slane %v811_v45, 2  ;;  %v2683_v0 = vsel %vm1044_vm7, %v1045_v57, 0 }
  0x4b   : > { %977 = vmatpush.bf16.msra.mxu2 %v1995_v62 }
  0x4d   : > { %952 = vmatpush.bf16.msra.mxu0 %v1975_v2  ;;  %s2896_s17 = scalar_lea.vmem %s2895_s14, %s2533_s28 }
  0x4e   : > { %965 = vmatpush.bf16.msra.mxu1 %v1979_v7  ;;  %v2247_v7 = vld [vmem:[%s2557_s29 + $0x8] sm:$0xff]  ;;  %p2216_p8 = scmp.ne.s32.totalorder %s2898_s9, 1 }
  0x4f   : > { %978 = vmatpush.bf16.msra.mxu2 %v1983_v8  ;;  %v2246_v8 = vld [vmem:[%s2557_s29] sm:$0xff]  ;;  %s2899_s30 = sld [smem:[#allocation16_spill]] (!%p2216_p8) }
  0x50   : > { %s2900_s20 = sld [smem:[#allocation17_spill]] (!%p2216_p8) }
  0x51   : > { %953 = vmatpush.bf16.msra.mxu0 %v1963_v12 }
  0x52   : > { %966 = vmatpush.bf16.msra.mxu1 %v1967_v16 }
  0x53   : > { %979 = vmatpush.bf16.msra.mxu2 %v1971_v17 }
  0xb1   : > { %v743_v22 = vpop.xlane.xlu0 %742 }
  0xb2   : > { %v751_v23 = vmul.f32 %v2616_v21, %v743_v22  ;;  %v1951_v22 = vor.u32 %v2223_v19, %v1950_v18 }
  0xb4   : > { %v2620_v24 = vsub.f32 %v2606_v4, %v751_v23  ;;  %v1952_v23 = vld [vmem:[%s2552_s22 + $0xc] sm:$0xf0]  ;;  %954 = vmatpush.bf16.msra.mxu0 %v1951_v22 }
  0xb5   : > { %v1955_v27 = vor.u32 %v2222_v20, %v1952_v23 }
  0xb6   : > { %v753_v25 = vmul.f32 %v2620_v24, %v2620_v24 }
  0xb7   : > { %967 = vmatpush.bf16.msra.mxu1 %v1955_v27 }
  0xb8   : > { %v754_v26 = vsel %vm740_vm0, %v753_v25, 0.0  ;;  %v1958_v25 = vld [vmem:[%s2552_s22 + $0x8] sm:$0xf] }
  0xb9   : > { %755 = vadd.xlane.f32.xlu0 %v754_v26  ;;  %v2224_v26 = vld [vmem:[%s2552_s22 + $0x10] sm:$0xf0] }
  0xba   : > { %v1959_v28 = vor.u32 %v2224_v26, %v1958_v25 }
  0xbc   : > { %980 = vmatpush.bf16.msra.mxu2 %v1959_v28 }
  0xc0   : > { %1179 = vmatpush.bf16.msrb.mxu2 %v2247_v7 }
  0xc4   : > { %1180 = vmatpush.bf16.msrb.mxu2 %v2246_v8 }
 0x12c   : > { %v756_v29 = vpop.xlane.xlu0 %755 }
 0x12d   : > { %v757_v30 = vmul.f32 %v756_v29, %v2616_v21 }
 0x12f   : > { %v758_v31 = vadd.f32 1e-06, %v757_v30 }
 0x131   : > { %2341 = vrsqrt.f32 %v758_v31  ;;  %vm765_vm3 = vweird.f32 %v758_v31 }
 0x137   : > { %v2342_v32 = vpop.eup %2341 }
 0x138   : > { %v760_v33 = vmul.f32 %v2342_v32, %v758_v31  ;;  %vm766_vm2 = vweird.f32 %v2342_v32 }
 0x139   : > { %vm767_vm4 = vmor %vm765_vm3, %vm766_vm2 }
 0x13a   : > { %v761_v34 = vmul.f32 %v2342_v32, %v760_v33 }
 0x13c   : > { %v762_v35 = vmul.f32 0.5, %v761_v34 }
 0x13e   : > { %v763_v36 = vsub.f32 1.5, %v762_v35 }
 0x140   : > { %v764_v37 = vmul.f32 %v2342_v32, %v763_v36 }
 0x142   : > { %v768_v39 = vsel %vm767_vm4, %v2342_v32, %v764_v37 }
 0x143   : > { %v769_v40 = vmul.f32 %v768_v39, %v2620_v24 }
 0x145   : > { %v773_v42 = vmul.f32 %v2333_v38, %v769_v40 }
 0x147   : > { %v777_v43 = vadd.f32 %v2334_v41, %v773_v42 }
 0x149   : > { %v778_v44 = vpack.c.bf16 %v777_v43, %v777_v43 }
 0x14b   : > { %955 = vmatmul.bf16.vlgmr.msra.gmra.mxu0 %v778_v44  ;;  %968 = vmatmul.bf16.vlgmr.msra.gmra.mxu1 %v778_v44 }
 0x14c   : > { %981 = vmatmul.bf16.vlgmr.msra.gmra.mxu2 %v778_v44 }
 0x1c8   : > { %v956_v48 = vpop.f32.mrf.mxu0  ;;  %v969_v49 = vpop.f32.mrf.mxu1 }
 0x1c9   : > { %v957_v50 = vadd.f32 %v956_v48, %v813_v46  ;;  %v970_v51 = vadd.f32 %v969_v49, %v814_v47 }
 0x1cb   : > { %v986_v24 = vmul.f32 0.17677669, %v957_v50  ;;  %v1004_v52 = vpack.c.bf16 %v970_v51, %v970_v51 }
 0x1cd   : > { %v1070_v54 = vunpack.c.l.b16 %v1004_v52  ;;  %v1011_v55 = vsel %vm1006_vm5, %v1004_v52, 0  ;;  %v1003_v58 = vpack.c.bf16 %v986_v24, %v986_v24 }
 0x1ce   : > { %1020 = vmatpush.bf16.xpose.msra.mxu3 %v1011_v55 }
 0x1cf   : > { %v1071_v59 = vpack.c.b16 %v1070_v54, %v1070_v54  ;;  %v982_v60 = vpop.f32.mrf.mxu2  ;;  %v1065_v2 = vunpack.c.l.b16 %v1003_v58 }
 0x1d0   : > { %v983_v61 = vadd.f32 %v982_v60, %v815_v53  ;;  %v958_v62 = vpop.f32.mrf.mxu0  ;;  %v971_v63 = vpop.f32.mrf.mxu1 }
 0x1d1   : > { %1274 = vrot.lane.b32.xlu0 %v1071_v59, %s2411_s18  ;;  %1072 = vrot.lane.b32.xlu2 %v1071_v59, %s2412_s16  ;;  %v1066_v6 = vpack.c.b16 %v1065_v2, %v1065_v2 }
 0x1d2   : > { %v2685_v1 = vpack.c.bf16 %v983_v61, %v983_v61 }
 0x1d4   : > { %v1048_v3 = vand.u32 %v2683_v0, %v2685_v1  ;;  %v1106_v55 = vunpack.c.l.b16 %v2685_v1 }
 0x1d5   : > { %2044 = vmatmul.msk.bf16.vlgmr.msra.gmra.mxu3 %vm1006_vm5, %v1003_v58 }
 0x1d6   : > { %1057 = vmatpush.bf16.msrb.mxu3 %v1048_v3  ;;  %v1107_v56 = vpack.c.b16 %v1106_v55, %v1106_v55 }
 0x1d7   : > { %v984_v5 = vpop.f32.mrf.mxu2 }
 0x1d9   : > { %1067 = vrot.lane.b32.xlu2 %v1066_v6, %s2412_s16 }
 0x1e1   : > { %1272 = vrot.lane.b32.xlu2 %v1066_v6, %s2411_s18 }
 0x1e9   : > { %1186 = vrot.lane.b32.xlu2 %v1066_v6, %s2413_s13 }
 0x22b   : > { %v1073_v9 = vpop.permute.xlu2 %1072 }
 0x22c   : > { %v1078_v10 = vsel %vm1006_vm5, %v1073_v9, 0 }
 0x22d   : > { %1087 = vmatpush.bf16.xpose.msra.mxu3 %v1078_v10 }
 0x233   : > { %v1068_v27 = vpop.permute.xlu2 %1067 }
 0x23b   : > { %v1273_v30 = vpop.permute.xlu2 %1272 }
 0x243   : > { %v1275_v11 = vpop.permute.xlu0 %1274  ;;  %v1187_v31 = vpop.permute.xlu2 %1186 }
 0x244   : > { %v1280_v12 = vsel %vm1006_vm5, %v1275_v11, 0 }
 0x245   : > { %1289 = vmatpush.bf16.xpose.msra.mxu2 %v1280_v12  ;;  %v2249_v12 = vld [vmem:[%s2557_s29 + $0x18] sm:$0xff] }
 0x246   : > { %1151 = vmatpush.bf16.msrb.mxu1 %v2249_v12  ;;  %v2114_v12 = vld [vmem:[%s2581_s27 + $0x30] sm:$0xf] }
 0x258   : > { %v1022_v13 = vpop.f32.mrf.mxu3 }
 0x259   : > { %v1027_v14 = vsel %vm1026_vm8, %v1022_v13, -inf }
 0x25a   : > { %1028 = vmax.xlane.f32.xlu1 %v1027_v14  ;;  %v2251_v14 = vld [vmem:[%s2557_s29 + $0x28] sm:$0xff] }
 0x260   : > { %v1024_v15 = vpop.f32.mrf.mxu3 }
 0x2cd   : > { %v1029_v16 = vpop.xlane.xlu1 %1028 }
 0x2ce   : > { %v1030_v17 = vsub.f32 %v1022_v13, %v1029_v16  ;;  %v2248_v13 = vld [vmem:[%s2557_s29 + $0x10] sm:$0xff]  ;;  %v2250_v16 = vld [vmem:[%s2557_s29 + $0x20] sm:$0xff] }
 0x2cf   : > { %1152 = vmatpush.bf16.msrb.mxu1 %v2248_v13  ;;  %v2261_v13 = vld [vmem:[%s2581_s27 + $0x34] sm:$0xf0] }
 0x2d0   : > { %v1031_v18 = vmul.f32 1.442695, %v1030_v17 }
 0x2d2   : > { %2343 = vpow2.f32 %v1031_v18 }
 0x2d3   : > { %1264 = vmatpush.bf16.msra.mxu1 %v2251_v14  ;;  %v2260_v14 = vld [vmem:[%s2581_s27 + $0x34] sm:$0xf] }
 0x2d7   : > { %1265 = vmatpush.bf16.msra.mxu1 %v2250_v16  ;;  %v2116_v16 = vld [vmem:[%s2581_s27 + $0x38] sm:$0xf0] }
 0x2d8   : > { %v2344_v19 = vpop.eup %2343 }
 0x2d9   : > { %v1033_v20 = vsel %vm1026_vm8, %v2344_v19, 0.0 }
 0x2da   : > { %1034 = vadd.xlane.f32.xlu1 %v1033_v20 }
 0x2f3   : > { %1188 = vrot.lane.b32.xlu1 %v1071_v59, %s2413_s13 }
 0x34d   : > { %v1035_v22 = vpop.xlane.xlu1 %1034 }
 0x34e   : > { %2345 = vrcp.f32 %v1035_v22 }
 0x354   : > { %v2346_v23 = vpop.eup %2345 }
 0x355   : > { %v1037_v25 = vmul.f32 %v2346_v23, %v2344_v19  ;;  %v2253_v23 = vld [vmem:[%s2557_s29 + $0x38] sm:$0xff] }
 0x357   : > { %v1038_v26 = vpack.c.bf16 %v1037_v25, %v1037_v25 }
 0x359   : > { %2045 = vmatmul.msk.bf16.vlgmr.msrb.gmra.mxu3 %vm1039_vm9, %v1038_v26 }
 0x365   : > { %v1189_v28 = vpop.permute.xlu1 %1188 }
 0x366   : > { %v1194_v29 = vsel %vm1006_vm5, %v1189_v28, 0 }
 0x367   : > { %1203 = vmatpush.bf16.xpose.msrb.mxu3 %v1194_v29 }
 0x369   : > { %2046 = vmatmul.msk.bf16.vlgmr.msra.gmra.mxu3 %vm1006_vm5, %v1068_v27 }
 0x379   : > { %2066 = vmatmul.msk.bf16.vlgmr.msrb.gmra.mxu3 %vm1006_vm5, %v1187_v31  ;;  %v2252_v31 = vld [vmem:[%s2557_s29 + $0x30] sm:$0xff] }
 0x3dc   : > { %v1059_v32 = vpop.f32.mrf.mxu3 }
 0x3dd   : > { %v1063_v33 = vpack.c.bf16 %v1059_v32, %v1059_v32 }
 0x3df   : > { %2065 = vmatmul.msk.bf16.vlgmr.msrb.gmra.mxu2 %vm1006_vm5, %v1063_v33 }
 0x3e4   : > { %v1061_v34 = vpop.f32.mrf.mxu3 }
 0x3ec   : > { %v1089_v35 = vpop.f32.mrf.mxu3 }
 0x3ed   : > { %v1093_v36 = vsel %vm1026_vm8, %v1089_v35, -inf }
 0x3ee   : > { %1094 = vmax.xlane.f32.xlu2 %v1093_v36 }
 0x3ef   : > { %2077 = vmatmul.msk.bf16.vlgmr.msra.gmra.mxu2 %vm1006_vm5, %v1273_v30 }
 0x3f4   : > { %v1091_v37 = vpop.f32.mrf.mxu3 }
 0x3fc   : > { %v1205_v38 = vpop.f32.mrf.mxu3 }
 0x3fd   : > { %v1209_v39 = vsel %vm1026_vm8, %v1205_v38, -inf }
 0x3fe   : > { %1210 = vmax.xlane.f32.xlu1 %v1209_v39 }
 0x404   : > { %v1207_v40 = vpop.f32.mrf.mxu3 }
 0x461   : > { %v1095_v41 = vpop.xlane.xlu2 %1094 }
 0x462   : > { %v1096_v42 = vsub.f32 %v1089_v35, %v1095_v41  ;;  %v2708_v43 = vpop.f32.mrf.mxu2 }
 0x464   : > { %v1097_v44 = vmul.f32 1.442695, %v1096_v42  ;;  %v2335_v42 = vld [vmem:[%s2893_s26] ss:$0 sm:$0xff] }
 0x466   : > { %2347 = vpow2.f32 %v1097_v44 }
 0x46a   : > { %v1184_v45 = vpop.f32.mrf.mxu2 }
 0x46c   : > { %v2348_v46 = vpop.eup %2347 }
 0x46d   : > { %v1099_v47 = vsel %vm1026_vm8, %v2348_v46, 0.0 }
 0x46e   : > { %1100 = vadd.xlane.f32.xlu2 %v1099_v47  ;;  %v2146_v47 = vld [vmem:[%s2581_s27 + $0x70] sm:$0xf] }
 0x471   : > { %v1211_v48 = vpop.xlane.xlu1 %1210 }
 0x472   : > { %v1212_v49 = vsub.f32 %v1205_v38, %v1211_v48  ;;  %v1291_v50 = vpop.f32.mrf.mxu2  ;;  %v2269_v48 = vld [vmem:[%s2581_s27 + $0x74] sm:$0xf0] }
 0x473   : > { %v1295_v51 = vsel %vm1026_vm8, %v1291_v50, -inf }
 0x474   : > { %v1213_v24 = vmul.f32 1.442695, %v1212_v49  ;;  %1296 = vmax.xlane.f32.xlu0 %v1295_v51  ;;  %v2268_v49 = vld [vmem:[%s2581_s27 + $0x74] sm:$0xf]  ;;  %v2148_v51 = vld [vmem:[%s2581_s27 + $0x78] sm:$0xf0] }
 0x476   : > { %2349 = vpow2.f32 %v1213_v24  ;;  %v2151_v24 = vor.u32 %v2268_v49, %v2148_v51  ;;  %v2337_v51 = vld [vmem:[%s2896_s17] ss:$0 sm:$0xff] }
 0x478   : > { %1512 = vmatpush.bf16.msrb.mxu2 %v2151_v24 }
 0x47a   : > { %v1293_v52 = vpop.f32.mrf.mxu2 }
 0x47c   : > { %v2350_v53 = vpop.eup %2349 }
 0x47d   : > { %v1215_v54 = vsel %vm1026_vm8, %v2350_v53, 0.0 }
 0x47e   : > { %1216 = vadd.xlane.f32.xlu1 %v1215_v54 }
 0x488   : > { %1108 = vrot.lane.b32.xlu0 %v1107_v56, %s2412_s16 }
 0x497   : > { %1221 = vrot.lane.b32.xlu1 %v1107_v56, %s2413_s13 }
 0x4e1   : > { %v1101_v60 = vpop.xlane.xlu2 %1100 }
 0x4e7   : > { %v1297_v57 = vpop.xlane.xlu0 %1296 }
 0x4e8   : > { %v1298_v58 = vsub.f32 %v1291_v50, %v1297_v57  ;;  %v2147_v50 = vor.u32 %v2269_v48, %v2146_v47  ;;  %v2267_v57 = vld [vmem:[%s2581_s27 + $0x64] sm:$0xf0]  ;;  %v2336_v48 = vld [vmem:[%s2894_s21] ss:$0 sm:$0xff] }
 0x4ea   : > { %v1299_v59 = vmul.f32 1.442695, %v1298_v58  ;;  %v2266_v58 = vld [vmem:[%s2581_s27 + $0x64] sm:$0xf] }
 0x4ec   : > { %2351 = vpow2.f32 %v1299_v59 }
 0x4ed   : > { %2353 = vrcp.f32 %v1101_v60  ;;  %v2140_v60 = vld [vmem:[%s2581_s27 + $0x68] sm:$0xf0] }
 0x4f1   : > { %v1217_v5 = vpop.xlane.xlu1 %1216 }
 0x4f2   : > { %v2352_v61 = vpop.eup %2351  ;;  %2355 = vrcp.f32 %v1217_v5 }
 0x4f3   : > { %v1301_v62 = vsel %vm1026_vm8, %v2352_v61, 0.0  ;;  %v2354_v63 = vpop.eup %2353 }
 0x4f4   : > { %1302 = vadd.xlane.f32.xlu2 %v1301_v62  ;;  %v1103_v2 = vmul.f32 %v2354_v63, %v2348_v46  ;;  %v2130_v62 = vld [vmem:[%s2581_s27 + $0x50] sm:$0xf]  ;;  %v2265_v63 = vld [vmem:[%s2581_s27 + $0x54] sm:$0xf0] }
 0x4f6   : > { %v1104_v6 = vpack.c.bf16 %v1103_v2, %v1103_v2  ;;  %v2264_v2 = vld [vmem:[%s2581_s27 + $0x54] sm:$0xf] }
 0x4f8   : > { %v2356_v7 = vpop.eup %2355 }
 0x4f9   : > { %v1219_v9 = vmul.f32 %v2356_v7, %v2350_v53  ;;  %v2263_v7 = vld [vmem:[%s2581_s27 + $0x44] sm:$0xf0] }
 0x4fa   : > { %v1109_v3 = vpop.permute.xlu0 %1108 }
 0x4fb   : > { %v1114_v1 = vand.u32 %v1109_v3, %v2683_v0  ;;  %v1220_v11 = vpack.c.bf16 %v1219_v9, %v1219_v9  ;;  %v2131_v3 = vor.u32 %v2265_v63, %v2130_v62  ;;  %v2281_v62 = vld [vmem:[%s2591_s25 + $0x58] sm:$0xff]  ;;  %v2271_v63 = vld [vmem:[%s2591_s25 + $0x8] sm:$0xff] }
 0x4fd   : > { %1123 = vmatpush.bf16.msrb.mxu0 %v1114_v1  ;;  %v2132_v1 = vld [vmem:[%s2581_s27 + $0x58] sm:$0xf0] }
 0x4fe   : > { %v2135_v5 = vor.u32 %v2264_v2, %v2132_v1  ;;  %v2280_v2 = vld [vmem:[%s2591_s25 + $0x50] sm:$0xff]  ;;  %v2279_v1 = vld [vmem:[%s2591_s25 + $0x48] sm:$0xff] }
 0x500   : > { %2047 = vmatmul.msk.bf16.vlgmr.msrb.gmra.mxu0 %vm1039_vm9, %v1104_v6  ;;  %v2122_v6 = vld [vmem:[%s2581_s27 + $0x40] sm:$0xf] }
 0x501   : > { %v2123_v9 = vor.u32 %v2263_v7, %v2122_v6  ;;  %v2278_v6 = vld [vmem:[%s2591_s25 + $0x40] sm:$0xff] }
 0x509   : > { %v1222_v8 = vpop.permute.xlu1 %1221 }
 0x50a   : > { %v1227_v10 = vand.u32 %v1222_v8, %v2683_v0  ;;  %v2262_v8 = vld [vmem:[%s2581_s27 + $0x44] sm:$0xf] }
 0x50c   : > { %1307 = vrot.lane.b32.xlu2 %v1107_v56, %s2411_s18  ;;  %1236 = vmatpush.bf16.msra.mxu0 %v1227_v10  ;;  %v2138_v56 = vld [vmem:[%s2581_s27 + $0x60] sm:$0xf]  ;;  %v2124_v10 = vld [vmem:[%s2581_s27 + $0x48] sm:$0xf0] }
 0x50d   : > { %v2139_v59 = vor.u32 %v2267_v57, %v2138_v56  ;;  %v2284_v56 = vld [vmem:[%s2591_s25 + $0x70] sm:$0xff]  ;;  %v2274_v57 = vld [vmem:[%s2591_s25 + $0x20] sm:$0xff] }
 0x510   : > { %2067 = vmatmul.msk.bf16.vlgmr.msra.gmra.mxu0 %vm1039_vm9, %v1220_v11  ;;  %v2127_v11 = vor.u32 %v2262_v8, %v2124_v10 }
 0x511   : > { %1350 = vmatpush.bf16.msrb.mxu0 %v2253_v23  ;;  %v2108_v23 = vld [vmem:[%s2581_s27 + $0x28] sm:$0xf0] }
 0x515   : > { %1351 = vmatpush.bf16.msrb.mxu0 %v2252_v31  ;;  %v2090_v31 = vld [vmem:[%s2581_s27] sm:$0xf] }
 0x567   : > { %v1303_v15 = vpop.xlane.xlu2 %1302 }
 0x568   : > { %2357 = vrcp.f32 %v1303_v15  ;;  %v2115_v15 = vor.u32 %v2261_v13, %v2114_v12 }
 0x56e   : > { %v2358_v17 = vpop.eup %2357 }
 0x56f   : > { %v1305_v18 = vmul.f32 %v2358_v17, %v2352_v61  ;;  %v1308_v19 = vpop.permute.xlu2 %1307  ;;  %v2143_v61 = vor.u32 %v2266_v58, %v2140_v60  ;;  %v2119_v17 = vor.u32 %v2260_v14, %v2116_v16  ;;  %v2283_v58 = vld [vmem:[%s2591_s25 + $0x68] sm:$0xff]  ;;  %v2282_v60 = vld [vmem:[%s2591_s25 + $0x60] sm:$0xff] }
 0x570   : > { %v1313_v20 = vand.u32 %v1308_v19, %v2683_v0  ;;  %v2259_v19 = vld [vmem:[%s2581_s27 + $0x24] sm:$0xf0] }
 0x571   : > { %v1306_v22 = vpack.c.bf16 %v1305_v18, %v1305_v18  ;;  %1513 = vmatpush.bf16.msrb.mxu2 %v2143_v61  ;;  %v2106_v18 = vld [vmem:[%s2581_s27 + $0x20] sm:$0xf]  ;;  %v2272_v61 = vld [vmem:[%s2591_s25 + $0x10] sm:$0xff] }
 0x572   : > { %1322 = vmatpush.bf16.msra.mxu3 %v1313_v20  ;;  %v2258_v20 = vld [vmem:[%s2581_s27 + $0x24] sm:$0xf] }
 0x575   : > { %2078 = vmatmul.msk.bf16.vlgmr.msra.gmra.mxu3 %vm1039_vm9, %v1306_v22  ;;  %1514 = vmatpush.bf16.msrb.mxu2 %v2135_v5  ;;  %v2107_v22 = vor.u32 %v2259_v19, %v2106_v18  ;;  %v1413_v5 = vld [vmem:[%s2586_s23] sm:$0x3] }
 0x576   : > { %v1415_v7 = vperm.slane %v1413_v5, 0 }
 0x579   : > { %1515 = vmatpush.bf16.msrb.mxu2 %v2127_v11  ;;  %v1416_v11 = vperm.slane %v1413_v5, 1 }
 0x57d   : > { %v1125_v25 = vpop.f32.mrf.mxu0  ;;  %1516 = vmatpush.bf16.msrb.mxu2 %v2119_v17 }
 0x57e   : > { %v1129_v26 = vpack.c.bf16 %v1125_v25, %v1125_v25  ;;  %v2111_v25 = vor.u32 %v2258_v20, %v2108_v23 }
 0x580   : > { %2056 = vmatmul.msk.bf16.vlgmr.msrb.gmra.mxu1 %vm1006_vm5, %v1129_v26  ;;  %v2098_v26 = vld [vmem:[%s2581_s27 + $0x10] sm:$0xf] }
 0x581   : > { %1499 = vmatpush.bf16.msrb.mxu1 %v2147_v50  ;;  %1517 = vmatpush.bf16.msrb.mxu2 %v2111_v25 }
 0x585   : > { %v1127_v27 = vpop.f32.mrf.mxu0  ;;  %1500 = vmatpush.bf16.msrb.mxu1 %v2139_v59  ;;  %v2273_v59 = vld [vmem:[%s2591_s25 + $0x18] sm:$0xff] }
 0x586   : > { %v2257_v27 = vld [vmem:[%s2581_s27 + $0x14] sm:$0xf0] }
 0x589   : > { %1501 = vmatpush.bf16.msrb.mxu1 %v2131_v3  ;;  %v2270_v3 = vld [vmem:[%s2591_s25] sm:$0xff] }
 0x58d   : > { %v1238_v28 = vpop.f32.mrf.mxu0  ;;  %1502 = vmatpush.bf16.msrb.mxu1 %v2123_v9 }
 0x58e   : > { %v1242_v29 = vpack.c.bf16 %v1238_v28, %v1238_v28  ;;  %v2256_v28 = vld [vmem:[%s2581_s27 + $0x14] sm:$0xf] }
 0x590   : > { %2076 = vmatmul.msk.bf16.vlgmr.msra.gmra.mxu1 %vm1006_vm5, %v1242_v29  ;;  %v2099_v29 = vor.u32 %v2257_v27, %v2098_v26 }
 0x591   : > { %1503 = vmatpush.bf16.msrb.mxu1 %v2115_v15 }
 0x595   : > { %v1240_v30 = vpop.f32.mrf.mxu0  ;;  %1504 = vmatpush.bf16.msrb.mxu1 %v2107_v22 }
 0x596   : > { %v2100_v30 = vld [vmem:[%s2581_s27 + $0x18] sm:$0xf0] }
 0x599   : > { %1505 = vmatpush.bf16.msrb.mxu1 %v2099_v29 }
 0x5f8   : > { %v1324_v0 = vpop.f32.mrf.mxu3 }
 0x5f9   : > { %v1328_v32 = vpack.c.bf16 %v1324_v0, %v1324_v0  ;;  %v2255_v0 = vld [vmem:[%s2581_s27 + $0x4] sm:$0xf0] }
 0x5fb   : > { %2087 = vmatmul.msk.bf16.vlgmr.msrb.gmra.mxu0 %vm1006_vm5, %v1328_v32  ;;  %v2103_v32 = vor.u32 %v2256_v28, %v2100_v30 }
 0x5fd   : > { %v1154_v33 = vpop.f32.mrf.mxu1  ;;  %1518 = vmatpush.bf16.msrb.mxu2 %v2103_v32 }
 0x5fe   : > { %v1183_v36 = vadd.f32 %v2708_v43, %v1154_v33  ;;  %v2254_v33 = vld [vmem:[%s2581_s27 + $0x4] sm:$0xf] }
 0x600   : > { %v1326_v34 = vpop.f32.mrf.mxu3 }
 0x601   : > { %v2092_v34 = vld [vmem:[%s2581_s27 + $0x8] sm:$0xf0] }
 0x605   : > { %v1156_v35 = vpop.f32.mrf.mxu1 }
 0x606   : > { %v2091_v35 = vor.u32 %v2255_v0, %v2090_v31 }
 0x608   : > { %1506 = vmatpush.bf16.msrb.mxu1 %v2091_v35 }
 0x60d   : > { %v1267_v37 = vpop.f32.mrf.mxu1 }
 0x60e   : > { %v1271_v38 = vadd.f32 %v1267_v37, %v1183_v36  ;;  %v2095_v36 = vor.u32 %v2254_v33, %v2092_v34  ;;  %v2277_v37 = vld [vmem:[%s2591_s25 + $0x38] sm:$0xff] }
 0x60f   : > { %1677 = vmatpush.bf16.msrb.mxu3 %v2277_v37 }
 0x610   : > { %1519 = vmatpush.bf16.msrb.mxu2 %v2095_v36  ;;  %v2338_v36 = vld [vmem:[%s722_s4] ss:$0 sm:$0xff] }
 0x615   : > { %v1269_v39 = vpop.f32.mrf.mxu1 }
 0x678   : > { %v1353_v40 = vpop.f32.mrf.mxu0 }
 0x679   : > { %v1357_v41 = vadd.f32 %v1353_v40, %v1271_v38 }
 0x67b   : > { %v1358_v44 = vadd.f32 %v1357_v41, %v2606_v4 }
 0x67d   : > { %v2740_v45 = vadd.f32 %v2335_v42, %v1358_v44 }
 0x67f   : > { %v1366_v46 = vsel %vm740_vm0, %v2740_v45, 0.0 }
 0x680   : > { %1367 = vadd.xlane.f32.xlu0 %v1366_v46  ;;  %v1355_v43 = vpop.f32.mrf.mxu0 }
 0x6f3   : > { %v1368_v4 = vpop.xlane.xlu0 %1367 }
 0x6f4   : > { %v1369_v52 = vmul.f32 %v1368_v4, %v2616_v21 }
 0x6f6   : > { %v2750_v53 = vsub.f32 %v2740_v45, %v1369_v52 }
 0x6f8   : > { %v1371_v54 = vmul.f32 %v2750_v53, %v2750_v53 }
 0x6fa   : > { %v1372_v55 = vsel %vm740_vm0, %v1371_v54, 0.0  ;;  %v2276_v54 = vld [vmem:[%s2591_s25 + $0x30] sm:$0xff] }
 0x6fb   : > { %1373 = vadd.xlane.f32.xlu2 %v1372_v55  ;;  %1678 = vmatpush.bf16.msrb.mxu3 %v2276_v54  ;;  %v2285_v55 = vld [vmem:[%s2591_s25 + $0x78] sm:$0xff] }
 0x6fc   : > { %1690 = vmatpush.bf16.msra.mxu0 %v2285_v55 }
 0x700   : > { %1691 = vmatpush.bf16.msra.mxu0 %v2284_v56 }
 0x704   : > { %1692 = vmatpush.bf16.msra.mxu0 %v2283_v58 }
 0x708   : > { %1693 = vmatpush.bf16.msra.mxu0 %v2282_v60 }
 0x70c   : > { %1694 = vmatpush.bf16.msra.mxu0 %v2281_v62 }
 0x710   : > { %1695 = vmatpush.bf16.msra.mxu0 %v2280_v2 }
 0x714   : > { %1696 = vmatpush.bf16.msra.mxu0 %v2279_v1 }
 0x718   : > { %1697 = vmatpush.bf16.msra.mxu0 %v2278_v6 }
 0x76e   : > { %v1374_v38 = vpop.xlane.xlu2 %1373 }
 0x76f   : > { %v1375_v39 = vmul.f32 %v1374_v38, %v2616_v21 }
 0x771   : > { %v1376_v40 = vadd.f32 1e-06, %v1375_v39 }
 0x773   : > { %2359 = vrsqrt.f32 %v1376_v40  ;;  %vm1383_vm11 = vweird.f32 %v1376_v40 }
 0x779   : > { %v2360_v41 = vpop.eup %2359 }
 0x77a   : > { %v1378_v42 = vmul.f32 %v2360_v41, %v1376_v40  ;;  %vm1384_vm10 = vweird.f32 %v2360_v41 }
 0x77b   : > { %vm1385_vm12 = vmor %vm1383_vm11, %vm1384_vm10 }
 0x77c   : > { %v1379_v44 = vmul.f32 %v2360_v41, %v1378_v42 }
 0x77e   : > { %v1380_v46 = vmul.f32 0.5, %v1379_v44 }
 0x780   : > { %v1381_v43 = vsub.f32 1.5, %v1380_v46 }
 0x782   : > { %v1382_v47 = vmul.f32 %v2360_v41, %v1381_v43 }
 0x784   : > { %v1386_v49 = vsel %vm1385_vm12, %v2360_v41, %v1382_v47 }
 0x785   : > { %v1387_v50 = vmul.f32 %v1386_v49, %v2750_v53  ;;  %v2275_v53 = vld [vmem:[%s2591_s25 + $0x28] sm:$0xff] }
 0x786   : > { %1679 = vmatpush.bf16.msrb.mxu3 %v2275_v53 }
 0x787   : > { %v1391_v24 = vmul.f32 %v2336_v48, %v1387_v50 }
 0x789   : > { %v1395_v4 = vadd.f32 %v2337_v51, %v1391_v24 }
 0x78a   : > { %1680 = vmatpush.bf16.msrb.mxu3 %v2274_v57 }
 0x78b   : > { %v1396_v52 = vpack.c.bf16 %v1395_v4, %v1395_v4 }
 0x78d   : > { %1507 = vmatmul.bf16.vlgmr.msrb.gmra.mxu1 %v1396_v52  ;;  %1520 = vmatmul.bf16.vlgmr.msrb.gmra.mxu2 %v1396_v52 }
 0x78e   : > { %1681 = vmatpush.bf16.msrb.mxu3 %v2273_v59 }
 0x792   : > { %1682 = vmatpush.bf16.msrb.mxu3 %v2272_v61 }
 0x796   : > { %1683 = vmatpush.bf16.msrb.mxu3 %v2271_v63 }
 0x79a   : > { %1684 = vmatpush.bf16.msrb.mxu3 %v2270_v3 }
 0x80a   : > { %v1508_v8 = vpop.f32.mrf.mxu1 }
 0x80b   : > { %v1509_v9 = vadd.f32 %v1508_v8, %v1415_v7 }
 0x80d   : > { %v1525_v10 = vmul.f32 %v1509_v9, %v1509_v9 }
 0x80f   : > { %v1527_v12 = vmul.f32 %v1525_v10, %v1509_v9 }
 0x810   : > { %v1521_v13 = vpop.f32.mrf.mxu2 }
 0x811   : > { %v1529_v14 = vmul.f32 0.044715, %v1527_v12  ;;  %v1522_v15 = vadd.f32 %v1521_v13, %v1416_v11 }
 0x812   : > { %v1510_v16 = vpop.f32.mrf.mxu1 }
 0x813   : > { %v1531_v17 = vadd.f32 %v1529_v14, %v1509_v9  ;;  %v1526_v18 = vmul.f32 %v1522_v15, %v1522_v15 }
 0x815   : > { %v1533_v19 = vmul.f32 0.7978846, %v1531_v17  ;;  %v1528_v20 = vmul.f32 %v1526_v18, %v1522_v15 }
 0x817   : > { %2361 = vtanh.f32 %v1533_v19  ;;  %v1530_v22 = vmul.f32 0.044715, %v1528_v20 }
 0x818   : > { %v1523_v23 = vpop.f32.mrf.mxu2 }
 0x819   : > { %v1532_v25 = vadd.f32 %v1530_v22, %v1522_v15 }
 0x81b   : > { %v1534_v26 = vmul.f32 0.7978846, %v1532_v25 }
 0x81d   : > { %v2362_v27 = vpop.eup %2361  ;;  %2363 = vtanh.f32 %v1534_v26 }
 0x81e   : > { %v1537_v28 = vadd.f32 1.0, %v2362_v27 }
 0x820   : > { %v1539_v29 = vmul.f32 0.5, %v1537_v28 }
 0x822   : > { %v1541_v30 = vmul.f32 %v1539_v29, %v1509_v9 }
 0x823   : > { %v2364_v31 = vpop.eup %2363 }
 0x824   : > { %v1543_v0 = vpack.c.bf16 %v1541_v30, %v1541_v30  ;;  %v1538_v32 = vadd.f32 1.0, %v2364_v31 }
 0x826   : > { %1685 = vmatmul.bf16.vlgmr.msrb.gmra.mxu3 %v1543_v0  ;;  %v1540_v33 = vmul.f32 0.5, %v1538_v32 }
 0x828   : > { %v1542_v34 = vmul.f32 %v1540_v33, %v1522_v15 }
 0x82a   : > { %v1544_v35 = vpack.c.bf16 %v1542_v34, %v1542_v34 }
 0x82c   : > { %1698 = vmatmul.bf16.vlgmr.msra.gmra.mxu0 %v1544_v35 }
 0x8a9   : > { %v1686_v37 = vpop.f32.mrf.mxu3  ;;  %v1699_v38 = vpop.f32.mrf.mxu0 }
 0x8aa   : > { %v1687_v39 = vadd.f32 %v2338_v36, %v1686_v37 }
 0x8ac   : > { %v1700_v40 = vadd.f32 %v1699_v38, %v1687_v39 }
 0x8ad   : > { %1708 = sbr.rel (%p2216_p8) target bundleno = 2495 (0x9bf), region = 92 }
 0x8ae   : > { %v1703_v41 = vadd.f32 %v1700_v40, %v2740_v45 }
 0x8b0   : > { %1704 = vst [vmem:[#allocation2] sm:$0x1f] %v1703_v41 }
 0x8b1   : > { %v1688_v42 = vpop.f32.mrf.mxu3  ;;  %v1701_v44 = vpop.f32.mrf.mxu0 }
 0x8b2   : > { %v1711_v46 = vsel %vm740_vm0, %v1703_v41, 0.0  ;;  %v2365_v57 = vld [vmem:[%s2899_s30] ss:$0 sm:$0xff] }
 0x8b3   : > { %1712 = vadd.xlane.f32.xlu0 %v1711_v46 }
 0x926   : > { %v1713_v43 = vpop.xlane.xlu0 %1712 }
 0x927   : > { %v1714_v47 = vmul.f32 %v1713_v43, %v2616_v21 }
 0x929   : > { %v1715_v48 = vsub.f32 %v1703_v41, %v1714_v47 }
 0x92b   : > { %v1716_v49 = vmul.f32 %v1715_v48, %v1715_v48 }
 0x92d   : > { %v1717_v50 = vsel %vm740_vm0, %v1716_v49, 0.0 }
 0x92e   : > { %1718 = vadd.xlane.f32.xlu0 %v1717_v50 }
 0x9a1   : > { %v1719_v51 = vpop.xlane.xlu0 %1718 }
 0x9a2   : > { %v1720_v45 = vmul.f32 %v1719_v51, %v2616_v21  ;;  %v2366_v21 = vld [vmem:[%s2900_s20] ss:$0 sm:$0xff] }
 0x9a4   : > { %v1721_v24 = vadd.f32 1e-06, %v1720_v45 }
 0x9a6   : > { %2367 = vrsqrt.f32 %v1721_v24  ;;  %vm1728_vm14 = vweird.f32 %v1721_v24 }
 0x9ac   : > { %v2368_v4 = vpop.eup %2367 }
 0x9ad   : > { %v1723_v52 = vmul.f32 %v2368_v4, %v1721_v24  ;;  %vm1729_vm13 = vweird.f32 %v2368_v4 }
 0x9ae   : > { %vm1730_vm15 = vmor %vm1728_vm14, %vm1729_vm13 }
 0x9af   : > { %v1724_v54 = vmul.f32 %v2368_v4, %v1723_v52 }
 0x9b1   : > { %v1725_v55 = vmul.f32 0.5, %v1724_v54 }
 0x9b3   : > { %v1726_v53 = vsub.f32 1.5, %v1725_v55 }
 0x9b5   : > { %v1727_v56 = vmul.f32 %v2368_v4, %v1726_v53 }
 0x9b7   : > { %v1731_v58 = vsel %vm1730_vm15, %v2368_v4, %v1727_v56 }
 0x9b8   : > { %v1732_v59 = vmul.f32 %v1731_v58, %v1715_v48 }
 0x9ba   : > { %v1736_v60 = vmul.f32 %v2365_v57, %v1732_v59 }
 0x9bc   : > { %v1740_v61 = vadd.f32 %v2366_v21, %v1736_v60 }
 0x9be   : > { %1741 = vst [vmem:[%s2600_s6] sm:$0x1f] %v1740_v61 }
 0x9bf PF: > { %s2901_s18 = sld [smem:[#allocation6_spill]] }
 0x9c0   : > { %s2902_s21 = sld [smem:[#allocation4_spill]] }
 0x9c1   : > { %s2903_s22 = sld [smem:[#allocation5_spill]] }
 0x9c2   : > { %s2904_s23 = sld [smem:[#allocation7_spill]] }
 0x9c3   : > { %s2905_s24 = sld [smem:[#allocation8_spill]] }
 0x9c5   : > { %s26_s25 = sadd.s32 1, %s2901_s18  }
 0x9c6   : > { %p23_p9 = scmp.ge.s32.totalorder %s26_s25, 6  }
 0x9c8   :  { %25 = sbr.rel (!%p23_p9) target bundleno = 11 (0xb), region = 158 }

// kernel: _lambda_.10
= control target key start
LH: loop header
LB: loop body
LE: loop exit
PB: predicated region body
PF: predicated region fallthrough
CT: control target
= control target key end

     0   :  { %s3109_s21 = smov 0   ;;  %s3111_s22 = smov 0   ;;  %s3600_s0 = inlined_call_operand.vmem [shape: bf16[2,17,128], index: 0, kind: input, shape index: {}]   ;;  %s3601_s1 = inlined_call_operand.vmem [shape: f32[1,17,128], index: 1, kind: input, shape index: {}]   ;;  %s3602_s2 = inlined_call_operand.vmem [shape: f32[2,1,128], index: 2, kind: input, shape index: {}]   ;;  %s3603_s3 = inlined_call_operand.vmem [shape: f32[2,1,128], index: 3, kind: input, shape index: {}]   ;;  %s3604_s4 = inlined_call_operand.vmem [shape: bf16[2,128,384], index: 4, kind: input, shape index: {}]   ;;  %s3605_s5 = inlined_call_operand.vmem [shape: f32[2,1,384], index: 5, kind: input, shape index: {}]   ;;  %s3606_s6 = inlined_call_operand.vmem [shape: bf16[2,128,128], index: 6, kind: input, shape index: {}]   ;;  %s3607_s7 = inlined_call_operand.vmem [shape: f32[2,1,128], index: 7, kind: input, shape index: {}]   ;;  %s3608_s8 = inlined_call_operand.vmem [shape: f32[2,1,128], index: 8, kind: input, shape index: {}]   ;;  %s3609_s9 = inlined_call_operand.vmem [shape: f32[2,1,128], index: 9, kind: input, shape index: {}]   ;;  %s3610_s10 = inlined_call_operand.vmem [shape: bf16[2,128,256], index: 10, kind: input, shape index: {}]   ;;  %s3611_s11 = inlined_call_operand.vmem [shape: f32[2,1,256], index: 11, kind: input, shape index: {}]   ;;  %s3612_s12 = inlined_call_operand.vmem [shape: bf16[2,256,128], index: 12, kind: input, shape index: {}]   ;;  %s3613_s13 = inlined_call_operand.vmem [shape: f32[2,1,128], index: 13, kind: input, shape index: {}]   ;;  %s3614_s14 = inlined_call_operand.vmem [shape: f32[1,128], index: 14, kind: input, shape index: {}]   ;;  %s3615_s15 = inlined_call_operand.vmem [shape: f32[1,128], index: 15, kind: input, shape index: {}]   ;;  %s3616_s16 = inlined_call_operand.vmem [shape: bf16[2,17,128], index: 16, kind: output, shape index: {}]  }
   0x1   :  { %3622 = sst [smem:[#allocation9_spill]] %s3600_s0  ;;  %s3113_s23 = smov 0  }
   0x2   :  { %3623 = sst [smem:[#allocation10_spill]] %s3601_s1  ;;  %s3115_s24 = smov 0  }
   0x3   :  { %3624 = sst [smem:[#allocation11_spill]] %s3603_s3  ;;  %s3117_s25 = smov 0  }
   0x4   :  { %3625 = sst [smem:[#allocation12_spill]] %s3604_s4 }
   0x5   :  { %3626 = sst [smem:[#allocation13_spill]] %s3605_s5 }
   0x6   :  { %3627 = sst [smem:[#allocation14_spill]] %s3606_s6 }
   0x7   :  { %3628 = sst [smem:[#allocation15_spill]] %s3614_s14 }
   0x8   :  { %3629 = sst [smem:[#allocation16_spill]] %s3615_s15 }
   0x9   :  { %3630 = sst [smem:[#allocation17_spill]] %s3616_s16 }
   0xa LB: > { %3631 = sst [smem:[#allocation3_spill]] %s3001_s21  ;;  %s35_s26 = sadd.s32 1, %s3009_s23  ;;  %s3017_s25 = sphi %s3117_s25, %s26_s25   ;;  %s3013_s24 = sphi %s3115_s24, %s3658_s24   ;;  %s3009_s23 = sphi %s3113_s23, %s3657_s23   ;;  %s3005_s22 = sphi %s3111_s22, %s3656_s22   ;;  %s3001_s21 = sphi %s3109_s21, %s3655_s21  }
   0xb   : > { %3632 = sst [smem:[#allocation4_spill]] %s3009_s23  ;;  %s38_s27 = sadd.s32 1, %s3013_s24 }
   0xc   : > { %3633 = sst [smem:[#allocation5_spill]] %s3013_s24  ;;  %p36_p0 = scmp.ge.s32.totalorder %s35_s26, 2 }
   0xd   : > { %3634 = sst [smem:[#allocation6_spill]] %s3017_s25  ;;  %p2467_p1 = scmp.ge.s32.totalorder %s3017_s25, 1 }
   0xe   : > { %p580_p2 = scmp.lt.s32.totalorder %s3017_s25, 5  ;;  %s3660_s26 = smov (%p36_p0, %s35_s26), 0 }
   0xf   : > { %3635 = sst [smem:[#allocation7_spill]] %s3660_s26  ;;  %s3662_s27 = smov (!%p36_p0, %s38_s27), %s3013_s24 }
  0x10   : > { %p581_p3 = pnand %p2467_p1, %p580_p2  ;;  %p40_p4 = scmp.ge.s32.totalorder %s3662_s27, 2 }
  0x11   : > { %p676_p5 = scmp.lt.s32.totalorder (!%p581_p3), %s3005_s22, 1  ;;  %p681_p6 = scmp.lt.s32.totalorder (!%p581_p3), %s3001_s21, 1 }
  0x12   : > { %s3664_s27 = smov (%p40_p4, %s3662_s27), 0  ;;  %584 = sbr.rel (%p581_p3) target bundleno = 2624 (0xa40), region = 84 }
  0x13   : > { %3636 = sst [smem:[#allocation8_spill]] %s3664_s27 }
  0x14   : > { %s3638_s24 = sld [smem:[#allocation9_spill]] (!%p581_p3) }
  0x15   : > { %s3639_s4 = sld [smem:[#allocation12_spill]] (!%p581_p3) }
  0x16   : > { %s3640_s6 = sld [smem:[#allocation14_spill]] (!%p581_p3) }
  0x17   : > { %s3666_s22 = smov (!%p676_p5, %s3005_s22), 1  ;;  %s3641_s5 = sld [smem:[#allocation13_spill]] }
  0x18   : > { %s3143_s28 = scalar_select %p681_p6, %s3001_s21, 1 }
  0x19   : > { %s2840_s29 = smul.u32 12, %s3666_s22  ;;  %s3643_s30 = sld [smem:[#allocation3_spill]] }
  0x1a   : > { %s2841_s25 = smul.u32 192, %s3143_s28  ;;  %s2762_s14 = sshll.u32 %s3143_s28, 6 }
  0x1b   : > { %s680_s23 = scalar_lea.vmem %s3638_s24, %s2840_s29  ;;  %s2842_s15 = smul.u32 3, %s3143_s28 }
  0x1c   : > { %s3162_s22 = scalar_lea.vmem %s3639_s4, %s2841_s25  ;;  %s3167_s0 = scalar_lea.vmem %s3640_s6, %s2762_s14 }
  0x1d   : > { %s3172_s20 = scalar_lea.vmem %s3641_s5, %s2842_s15  ;;  %s2763_s16 = sshll.u32 %s3143_s28, 7 }
  0x1e   : > { %s2474_s14 = sshll.u32 %s3143_s28, 1  ;;  %s3191_s18 = scalar_lea.vmem %s3610_s10, %s2763_s16 }
  0x1f   : > { %s3196_s26 = scalar_lea.vmem %s3611_s11, %s2474_s14  ;;  %s3201_s3 = scalar_lea.vmem %s3612_s12, %s2763_s16 }
  0x20   : > { %s726_s25 = scalar_lea.vmem %s3613_s13, %s3143_s28  ;;  %s3642_s5 = sld [smem:[#allocation17_spill]] }
  0x21   : > { %p2478_p7 = scmp.ne.s32.totalorder %s3643_s30, 0 }
  0x22   : > { %s3644_s19 = sld [smem:[#allocation10_spill]] (!%p2478_p7) }
  0x23   : > { %736 = sbr.rel (%p2478_p7) target bundleno = 48 (0x30), region = 88 }
  0x26   : > { %s3210_s6 = scalar_lea.vmem %s3642_s5, %s2840_s29 }
  0x28   : > { %v2830_v0 = vld [vmem:[%s680_s23] sm:$0xff]   ;;  %v744_v2 = vld [vmem:[%s3644_s19 + $0x8] sm:$0xff]  ;;  %v745_v6 = vld [vmem:[%s3644_s19 + $0x10] sm:$0x1] }
  0x29   : > { %v743_v1 = vld [vmem:[%s3644_s19] sm:$0xff]  ;;  %v2831_v3 = vunpack.c.l.bf16 %v2830_v0  ;;  %v2832_v4 = vunpack.c.h.bf16 %v2830_v0  ;;  %v739_v5 = vld [vmem:[%s680_s23 + $0x8] sm:$0x1] }
  0x2a   : > { %v742_v7 = vunpack.c.l.bf16 %v739_v5 }
  0x2b   : > { %v746_v8 = vadd.f32 %v2831_v3, %v743_v1  ;;  %v747_v9 = vadd.f32 %v2832_v4, %v744_v2 }
  0x2c   : > { %v748_v10 = vadd.f32 %v745_v6, %v742_v7 }
  0x2d   : > { %749 = vst [vmem:[#allocation2 + $0x10] sm:$0xff] %v746_v8 }
  0x2e   : > { %750 = vst [vmem:[#allocation2] sm:$0xff] %v747_v9 }
  0x2f   : > { %751 = vst [vmem:[#allocation2 + $0x8] sm:$0x1] %v748_v10 }
  0x30 PF: > { %vm761_vm0 = vcmask 1040384   ;;  %v3019_v15 = vmov 128.0   ;;  %v2565_v35 = vld [vmem:[%s3162_s22 + $0xa8] sm:$0xf]  ;;  %v2787_v36 = vld [vmem:[%s3162_s22 + $0xb0] sm:$0xf0]  ;;  %s3645_s23 = scalar_lea.vmem %s3602_s2, %s3143_s28  ;;  %s3648_s27 = scalar_lea.vmem %s3607_s7, %s3143_s28 }
  0x31   : > { %2894 = vrcp.f32 %v3019_v15  ;;  %v2786_v37 = vld [vmem:[%s3162_s22 + $0xac] sm:$0xf]  ;;  %v2566_v38 = vor.u32 %v2787_v36, %v2565_v35  ;;  %v2567_v39 = vld [vmem:[%s3162_s22 + $0xb4] sm:$0xf0]  ;;  %v2573_v40 = vld [vmem:[%s3162_s22 + $0xb0] sm:$0xf]  ;;  %s3649_s24 = scalar_lea.vmem %s3608_s8, %s3143_s28  ;;  %s3650_s5 = scalar_lea.vmem %s3609_s9, %s3143_s28 }
  0x32   : > { %v2788_v41 = vld [vmem:[%s3162_s22 + $0xb8] sm:$0xf0]  ;;  %v2570_v42 = vor.u32 %v2786_v37, %v2567_v39  ;;  %v2553_v44 = vld [vmem:[%s3162_s22 + $0x90] sm:$0xf]  ;;  %v2783_v46 = vld [vmem:[%s3162_s22 + $0x94] sm:$0xf] }
  0x33   : > { %v2574_v43 = vor.u32 %v2788_v41, %v2573_v40  ;;  %1009 = vmatpush.bf16.msra.mxu0 %v2566_v38  ;;  %v2784_v45 = vld [vmem:[%s3162_s22 + $0x98] sm:$0xf0]  ;;  %v2555_v48 = vld [vmem:[%s3162_s22 + $0x9c] sm:$0xf0]  ;;  %v2561_v49 = vld [vmem:[%s3162_s22 + $0x98] sm:$0xf] }
  0x34   : > { %v752_v11 = vld [vmem:[#allocation2 + $0x10] sm:$0xff]  ;;  %1027 = vmatpush.bf16.msra.mxu1 %v2570_v42  ;;  %v2554_v47 = vor.u32 %v2784_v45, %v2553_v44  ;;  %v2785_v50 = vld [vmem:[%s3162_s22 + $0xa0] sm:$0xf0]  ;;  %v2558_v51 = vor.u32 %v2783_v46, %v2555_v48  ;;  %v2541_v53 = vld [vmem:[%s3162_s22 + $0x78] sm:$0xf]  ;;  %s3646_s1 = sld [smem:[#allocation11_spill]] }
  0x35   : > { %757 = vadd.xlane.f32.xlu0 %v752_v11  ;;  %v753_v14 = vld [vmem:[#allocation2] sm:$0xff]  ;;  %1045 = vmatpush.bf16.msra.mxu2 %v2574_v43  ;;  %v2562_v52 = vor.u32 %v2785_v50, %v2561_v49  ;;  %v2780_v55 = vld [vmem:[%s3162_s22 + $0x7c] sm:$0xf]  ;;  %v2543_v57 = vld [vmem:[%s3162_s22 + $0x84] sm:$0xf0]  ;;  %vm1107_vm11 = vcmask 261120  }
  0x36   : > { %v754_v12 = vld [vmem:[#allocation2 + $0x8] sm:$0x1]  ;;  %v2781_v54 = vld [vmem:[%s3162_s22 + $0x80] sm:$0xf0]  ;;  %v2549_v58 = vld [vmem:[%s3162_s22 + $0x80] sm:$0xf]  ;;  %v2546_v60 = vor.u32 %v2780_v55, %v2543_v57 }
  0x37   : > { %v762_v13 = vsel %vm761_vm0, %v754_v12, 0.0  ;;  %v2895_v16 = vpop.eup %2894  ;;  %1010 = vmatpush.bf16.msra.mxu0 %v2554_v47  ;;  %v2542_v56 = vor.u32 %v2781_v54, %v2541_v53  ;;  %v2782_v59 = vld [vmem:[%s3162_s22 + $0x88] sm:$0xf0]  ;;  %v2529_v62 = vld [vmem:[%s3162_s22 + $0x60] sm:$0xf]  ;;  %vm1138_vm12 = vcmask 138240  }
  0x38   : > { %763 = vadd.xlane.f32.xlu1 %v762_v13  ;;  %v766_v17 = vmul.f32 128.0, %v2895_v16  ;;  %vm770_vm1 = vweird.f32 %v2895_v16  ;;  %1028 = vmatpush.bf16.msra.mxu1 %v2558_v51  ;;  %v2550_v61 = vor.u32 %v2782_v59, %v2549_v58  ;;  %v2778_v63 = vld [vmem:[%s3162_s22 + $0x68] sm:$0xf0]  ;;  %v2777_v0 = vld [vmem:[%s3162_s22 + $0x64] sm:$0xf]  ;;  %vm1145_vm13 = vcmask 131072  }
  0x39   : > { %1046 = vmatpush.bf16.msra.mxu2 %v2562_v52  ;;  %v2530_v1 = vor.u32 %v2778_v63, %v2529_v62  ;;  %v2531_v2 = vld [vmem:[%s3162_s22 + $0x6c] sm:$0xf0]  ;;  %v2537_v3 = vld [vmem:[%s3162_s22 + $0x68] sm:$0xf]  ;;  %v2779_v4 = vld [vmem:[%s3162_s22 + $0x70] sm:$0xf0] }
  0x3a   : > { %v767_v18 = vsub.f32 1.0, %v766_v17  ;;  %v2534_v5 = vor.u32 %v2777_v0, %v2531_v2  ;;  %v2538_v6 = vor.u32 %v2779_v4, %v2537_v3  ;;  %v2517_v7 = vld [vmem:[%s3162_s22 + $0x48] sm:$0xf]  ;;  %v2775_v8 = vld [vmem:[%s3162_s22 + $0x50] sm:$0xf0]  ;;  %s3647_s21 = scalar_lea.vmem %s3646_s1, %s3143_s28  ;;  %s3022_s30 = smov 64  }
  0x3b   : > { %1011 = vmatpush.bf16.msra.mxu0 %v2542_v56  ;;  %v2774_v9 = vld [vmem:[%s3162_s22 + $0x4c] sm:$0xf]  ;;  %v2518_v10 = vor.u32 %v2775_v8, %v2517_v7  ;;  %v2776_v13 = vld [vmem:[%s3162_s22 + $0x58] sm:$0xf0]  ;;  %v2481_v40 = vld [vmem:[%s3162_s22] sm:$0xf] }
  0x3c   : > { %v768_v19 = vmul.f32 %v2895_v16, %v767_v18  ;;  %1029 = vmatpush.bf16.msra.mxu1 %v2546_v60  ;;  %v2772_v17 = vld [vmem:[%s3162_s22 + $0x38] sm:$0xf0]  ;;  %v2771_v18 = vld [vmem:[%s3162_s22 + $0x34] sm:$0xf]  ;;  %v2770_v35 = vld [vmem:[%s3162_s22 + $0x28] sm:$0xf0] }
  0x3d   : > { %759 = vadd.xlane.f32.xlu0 %v753_v14  ;;  %1047 = vmatpush.bf16.msra.mxu2 %v2550_v61  ;;  %v2766_v41 = vld [vmem:[%s3162_s22 + $0x8] sm:$0xf0]  ;;  %v2765_v42 = vld [vmem:[%s3162_s22 + $0x4] sm:$0xf]  ;;  %v2483_v44 = vld [vmem:[%s3162_s22 + $0xc] sm:$0xf0] }
  0x3e   : > { %v769_v20 = vadd.f32 %v2895_v16, %v768_v19  ;;  %v2482_v43 = vor.u32 %v2766_v41, %v2481_v40  ;;  %v2489_v45 = vld [vmem:[%s3162_s22 + $0x8] sm:$0xf]  ;;  %v2767_v46 = vld [vmem:[%s3162_s22 + $0x10] sm:$0xf0]  ;;  %v2486_v48 = vor.u32 %v2765_v42, %v2483_v44  ;;  %s3023_s14 = smov 32   ;;  %s3651_s28 = sld [smem:[#allocation3_spill]] }
  0x3f   : > { %1012 = vmatpush.bf16.msra.mxu0 %v2530_v1  ;;  %v2490_v49 = vor.u32 %v2767_v46, %v2489_v45 }
  0x40   : > { %v3223_v21 = vsel %vm770_vm1, %v2895_v16, %v769_v20  ;;  %1030 = vmatpush.bf16.msra.mxu1 %v2534_v5  ;;  %v2505_v16 = vld [vmem:[%s3162_s22 + $0x30] sm:$0xf]  ;;  %v2507_v20 = vld [vmem:[%s3162_s22 + $0x3c] sm:$0xf0] }
  0x41   : > { %1048 = vmatpush.bf16.msra.mxu2 %v2538_v6  ;;  %v2506_v19 = vor.u32 %v2772_v17, %v2505_v16  ;;  %v2888_v6 = vld [vmem:[%s3645_s23] ss:$0 sm:$0xff] }
  0x43   : > { %1013 = vmatpush.bf16.msra.mxu0 %v2518_v10 }
  0x44   : > { %p2759_p8 = scmp.ne.s32.totalorder %s3651_s28, 1 }
  0x45   : > { %s3652_s29 = sld [smem:[#allocation15_spill]] (!%p2759_p8) }
  0x47   : > { %1014 = vmatpush.bf16.msra.mxu0 %v2506_v19 }
  0xa8   : > { %v758_v22 = vpop.xlane.xlu0 %757 }
  0xa9   : > { %v772_v23 = vmul.f32 %v3223_v21, %v758_v22  ;;  %v2513_v22 = vld [vmem:[%s3162_s22 + $0x38] sm:$0xf] }
  0xab   : > { %v3226_v24 = vsub.f32 %v752_v11, %v772_v23  ;;  %v764_v26 = vpop.xlane.xlu1 %763  ;;  %v2519_v11 = vld [vmem:[%s3162_s22 + $0x54] sm:$0xf0]  ;;  %v2773_v23 = vld [vmem:[%s3162_s22 + $0x40] sm:$0xf0] }
  0xac   : > { %v774_v28 = vmul.f32 %v3223_v21, %v764_v26  ;;  %v2514_v26 = vor.u32 %v2773_v23, %v2513_v22 }
  0xad   : > { %v778_v25 = vmul.f32 %v3226_v24, %v3226_v24 }
  0xae   : > { %v3234_v31 = vsub.f32 %v754_v12, %v774_v28  ;;  %v2525_v12 = vld [vmem:[%s3162_s22 + $0x50] sm:$0xf]  ;;  %v2769_v28 = vld [vmem:[%s3162_s22 + $0x20] sm:$0xf0] }
  0xaf   : > { %781 = vadd.xlane.f32.xlu1 %v778_v25  ;;  %v2526_v15 = vor.u32 %v2776_v13, %v2525_v12  ;;  %v2510_v25 = vor.u32 %v2771_v18, %v2507_v20  ;;  %v2889_v13 = vld [vmem:[%s3647_s21] ss:$0 sm:$0xff]  ;;  %s3653_s21 = sld [smem:[#allocation16_spill]] (!%p2759_p8) }
  0xb0   : > { %v760_v27 = vpop.xlane.xlu0 %759  ;;  %v780_v33 = vmul.f32 %v3234_v31, %v3234_v31 }
  0xb1   : > { %v773_v29 = vmul.f32 %v3223_v21, %v760_v27  ;;  %1049 = vmatpush.bf16.msra.mxu2 %v2526_v15  ;;  %v2493_v27 = vld [vmem:[%s3162_s22 + $0x18] sm:$0xf] }
  0xb2   : > { %v785_v34 = vsel %vm761_vm0, %v780_v33, 0.0  ;;  %v2495_v33 = vld [vmem:[%s3162_s22 + $0x24] sm:$0xf0] }
  0xb3   : > { %v3232_v30 = vsub.f32 %v753_v14, %v773_v29  ;;  %v2522_v14 = vor.u32 %v2774_v9, %v2519_v11  ;;  %v2768_v29 = vld [vmem:[%s3162_s22 + $0x1c] sm:$0xf] }
  0xb4   : > { %v2498_v36 = vor.u32 %v2768_v29, %v2495_v33  ;;  %v873_v33 = vld [vmem:[%s3172_s20] sm:$0x7]  ;;  %s3021_s20 = smov 96  }
  0xb5   : > { %v779_v32 = vmul.f32 %v3232_v30, %v3232_v30  ;;  %1031 = vmatpush.bf16.msra.mxu1 %v2522_v14  ;;  %1050 = vmatpush.bf16.msra.mxu2 %v2514_v26  ;;  %v875_v41 = vperm.slane %v873_v33, 0  ;;  %v877_v44 = vperm.slane %v873_v33, 2 }
  0xb7   : > { %783 = vadd.xlane.f32.xlu2 %v779_v32  ;;  %v2494_v32 = vor.u32 %v2769_v28, %v2493_v27 }
  0xb9   : > { %1032 = vmatpush.bf16.msra.mxu1 %v2510_v25  ;;  %1015 = vmatpush.bf16.msra.mxu0 %v2494_v32 }
  0xbd   : > { %1033 = vmatpush.bf16.msra.mxu1 %v2498_v36  ;;  %1016 = vmatpush.bf16.msra.mxu0 %v2482_v43 }
  0xbf   : > { %786 = vadd.xlane.f32.xlu2 %v785_v34  ;;  %v2501_v34 = vld [vmem:[%s3162_s22 + $0x20] sm:$0xf] }
  0xc0   : > { %v2502_v37 = vor.u32 %v2770_v35, %v2501_v34  ;;  %v876_v34 = vperm.slane %v873_v33, 1 }
  0xc1   : > { %1034 = vmatpush.bf16.msra.mxu1 %v2486_v48 }
  0xc2   : > { %1051 = vmatpush.bf16.msra.mxu2 %v2502_v37 }
  0xc6   : > { %1052 = vmatpush.bf16.msra.mxu2 %v2490_v49 }
 0x122   : > { %v782_v38 = vpop.xlane.xlu1 %781 }
 0x123   : > { %v788_v39 = vmul.f32 %v782_v38, %v3223_v21 }
 0x125   : > { %v791_v47 = vadd.f32 1e-06, %v788_v39 }
 0x127   : > { %2896 = vrsqrt.f32 %v791_v47  ;;  %vm800_vm3 = vweird.f32 %v791_v47 }
 0x12a   : > { %v784_v50 = vpop.xlane.xlu2 %783 }
 0x12b   : > { %v789_v51 = vmul.f32 %v784_v50, %v3223_v21 }
 0x12d   : > { %v2897_v52 = vpop.eup %2896  ;;  %v792_v53 = vadd.f32 1e-06, %v789_v51 }
 0x12e   : > { %v795_v54 = vmul.f32 %v2897_v52, %v791_v47  ;;  %vm801_vm2 = vweird.f32 %v2897_v52 }
 0x12f   : > { %2898 = vrsqrt.f32 %v792_v53  ;;  %vm802_vm4 = vmor %vm800_vm3, %vm801_vm2  ;;  %vm810_vm6 = vweird.f32 %v792_v53 }
 0x130   : > { %v796_v55 = vmul.f32 %v2897_v52, %v795_v54 }
 0x132   : > { %v797_v56 = vmul.f32 0.5, %v796_v55  ;;  %v787_v57 = vpop.xlane.xlu2 %786 }
 0x133   : > { %v790_v58 = vmul.f32 %v787_v57, %v3223_v21 }
 0x134   : > { %v798_v59 = vsub.f32 1.5, %v797_v56 }
 0x135   : > { %v2899_v60 = vpop.eup %2898  ;;  %v793_v61 = vadd.f32 1e-06, %v790_v58 }
 0x136   : > { %v799_v62 = vmul.f32 %v2897_v52, %v798_v59  ;;  %v805_v63 = vmul.f32 %v2899_v60, %v792_v53  ;;  %vm811_vm5 = vweird.f32 %v2899_v60 }
 0x137   : > { %2900 = vrsqrt.f32 %v793_v61  ;;  %vm812_vm7 = vmor %vm810_vm6, %vm811_vm5  ;;  %vm820_vm8 = vweird.f32 %v793_v61 }
 0x138   : > { %v806_v0 = vmul.f32 %v2899_v60, %v805_v63  ;;  %v803_v1 = vsel %vm802_vm4, %v2897_v52, %v799_v62 }
 0x139   : > { %v824_v5 = vmul.f32 %v803_v1, %v3226_v24  ;;  %v3020_v1 = vmov 0  }
 0x13a   : > { %v807_v2 = vmul.f32 0.5, %v806_v0 }
 0x13b   : > { %v830_v12 = vmul.f32 %v2888_v6, %v824_v5 }
 0x13c   : > { %v808_v3 = vsub.f32 1.5, %v807_v2  ;;  %v3315_v2 = vsel %vm761_vm0, 65535, %v3020_v1 }
 0x13d   : > { %v2901_v4 = vpop.eup %2900  ;;  %v836_v16 = vadd.f32 %v2889_v13, %v830_v12 }
 0x13e   : > { %v809_v7 = vmul.f32 %v2899_v60, %v808_v3  ;;  %v815_v8 = vmul.f32 %v2901_v4, %v793_v61  ;;  %vm821_vm9 = vweird.f32 %v2901_v4 }
 0x13f   : > { %vm822_vm10 = vmor %vm820_vm8, %vm821_vm9 }
 0x140   : > { %v813_v9 = vsel %vm812_vm7, %v2899_v60, %v809_v7  ;;  %v816_v10 = vmul.f32 %v2901_v4, %v815_v8 }
 0x141   : > { %v825_v11 = vmul.f32 %v813_v9, %v3232_v30 }
 0x142   : > { %v817_v24 = vmul.f32 0.5, %v816_v10 }
 0x143   : > { %v831_v14 = vmul.f32 %v2888_v6, %v825_v11 }
 0x144   : > { %v818_v15 = vsub.f32 1.5, %v817_v24 }
 0x145   : > { %v837_v17 = vadd.f32 %v2889_v13, %v831_v14 }
 0x146   : > { %v819_v18 = vmul.f32 %v2901_v4, %v818_v15 }
 0x147   : > { %v839_v19 = vpack.c.bf16 %v837_v17, %v836_v16 }
 0x148   : > { %v823_v20 = vsel %vm822_vm10, %v2901_v4, %v819_v18 }
 0x149   : > { %1017 = vmatmul.bf16.vlgmr.msra.gmra.mxu0 %v839_v19  ;;  %1035 = vmatmul.bf16.vlgmr.msra.gmra.mxu1 %v839_v19  ;;  %v826_v30 = vmul.f32 %v823_v20, %v3234_v31 }
 0x14a   : > { %1053 = vmatmul.bf16.vlgmr.msra.gmra.mxu2 %v839_v19 }
 0x14b   : > { %v832_v22 = vmul.f32 %v2888_v6, %v826_v30 }
 0x14d   : > { %v838_v23 = vadd.f32 %v2889_v13, %v832_v22 }
 0x14f   : > { %v840_v25 = vpack.c.bf16 %v838_v23, %v838_v23 }
 0x159   : > { %1022 = vmatmul.bf16.gmra.mxu0 %v840_v25  ;;  %1040 = vmatmul.bf16.gmra.mxu1 %v840_v25 }
 0x15a   : > { %1058 = vmatmul.bf16.gmra.mxu2 %v840_v25 }
 0x1c6   : > { %v1018_v26 = vpop.f32.mrf.mxu0  ;;  %v1036_v27 = vpop.f32.mrf.mxu1 }
 0x1c7   : > { %v1037_v40 = vadd.f32 %v1036_v27, %v876_v34  ;;  %v1019_v52 = vadd.f32 %v1018_v26, %v875_v41 }
 0x1c9   : > { %v1085_v45 = vpack.c.bf16 %v1037_v40, %v1037_v40  ;;  %v1063_v61 = vmul.f32 0.17677669, %v1019_v52 }
 0x1cb   : > { %v1102_v57 = vunpack.c.l.b16 %v1085_v45  ;;  %v1082_v6 = vpack.c.bf16 %v1063_v61, %v1063_v61 }
 0x1cd   : > { %v1054_v28 = vpop.f32.mrf.mxu2  ;;  %v1094_v12 = vunpack.c.l.b16 %v1082_v6 }
 0x1ce   : > { %v1020_v29 = vpop.f32.mrf.mxu0  ;;  %v1038_v32 = vpop.f32.mrf.mxu1  ;;  %v1055_v58 = vadd.f32 %v1054_v28, %v877_v44 }
 0x1cf   : > { %v1039_v38 = vadd.f32 %v1038_v32, %v876_v34  ;;  %v1021_v46 = vadd.f32 %v1020_v29, %v875_v41 }
 0x1d0   : > { %v1088_v3 = vpack.c.bf16 %v1055_v58, %v1055_v58 }
 0x1d1   : > { %v1086_v42 = vpack.c.bf16 %v1039_v38, %v1039_v38  ;;  %v1064_v59 = vmul.f32 0.17677669, %v1021_v46  ;;  %v2789_v46 = vld [vmem:[%s3167_s0] sm:$0xff] }
 0x1d2   : > { %v1187_v10 = vunpack.c.l.b16 %v1088_v3 }
 0x1d3   : > { %v1103_v53 = vunpack.c.l.b16 %v1086_v42  ;;  %v1083_v4 = vpack.c.bf16 %v1064_v59, %v1064_v59 }
 0x1d5   : > { %v1056_v35 = vpop.f32.mrf.mxu2  ;;  %v3310_v62 = vpack.c.b16 %v1103_v53, %v1102_v57  ;;  %v1095_v11 = vunpack.c.l.b16 %v1083_v4 }
 0x1d6   : > { %v1023_v36 = vpop.f32.mrf.mxu0  ;;  %v1041_v37 = vpop.f32.mrf.mxu1  ;;  %v1057_v54 = vadd.f32 %v1056_v35, %v877_v44 }
 0x1d7   : > { %v1042_v39 = vadd.f32 %v1041_v37, %v876_v34  ;;  %v1115_v8 = vsel %vm1107_vm11, %v3310_v62, 0  ;;  %v1097_v24 = vpack.c.b16 %v1095_v11, %v1094_v12  ;;  %v1024_v14 = vadd.f32 %v1023_v36, %v875_v41 }
 0x1d8   : > { %v1089_v63 = vpack.c.bf16 %v1057_v54, %v1057_v54 }
 0x1d9   : > { %v1087_v31 = vpack.c.bf16 %v1042_v39, %v1042_v39  ;;  %v1065_v15 = vmul.f32 0.17677669, %v1024_v14 }
 0x1da   : > { %v1188_v7 = vunpack.c.l.b16 %v1089_v63 }
 0x1db   : > { %v1104_v43 = vunpack.c.l.b16 %v1087_v31  ;;  %v1084_v16 = vpack.c.bf16 %v1065_v15, %v1065_v15 }
 0x1dc   : > { %v3321_v13 = vpack.c.b16 %v1188_v7, %v1187_v10 }
 0x1dd   : > { %v3306_v47 = vpack.c.b16 %v1104_v43, %v1104_v43  ;;  %v1059_v48 = vpop.f32.mrf.mxu2  ;;  %v1096_v17 = vunpack.c.l.b16 %v1084_v16 }
 0x1de   : > { %v1060_v49 = vadd.f32 %v1059_v48, %v877_v44  ;;  %v1025_v50 = vpop.f32.mrf.mxu0  ;;  %v1043_v51 = vpop.f32.mrf.mxu1  ;;  %v2790_v44 = vld [vmem:[%s3167_s0 + $0x8] sm:$0xff] }
 0x1df   : > { %v1118_v55 = vsel %vm1107_vm11, %v3306_v47, 0  ;;  %v1098_v18 = vpack.c.b16 %v1096_v17, %v1096_v17 }
 0x1e0   : > { %v1090_v56 = vpack.c.bf16 %v1060_v49, %v1060_v49  ;;  %1126 = vmatpush.bf16.xpose.msra.mxu3 %v1118_v55 }
 0x1e2   : > { %v1189_v60 = vunpack.c.l.b16 %v1090_v56 }
 0x1e4   : > { %v3312_v0 = vpack.c.b16 %v1189_v60, %v1189_v60 }
 0x1e5   : > { %v1061_v5 = vpop.f32.mrf.mxu2 }
 0x1e6   : > { %v1202_v9 = vand.u32 %v3315_v2, %v3312_v0 }
 0x1e8   : > { %1127 = vmatpush.bf16.xpose.msra.mxu3 %v1115_v8 }
 0x1ef   : > { %2575 = vmatmul.msk.bf16.vlgmr.msra.gmra.mxu3 %vm1107_vm11, %v1097_v24 }
 0x1f0   : > { %1210 = vmatpush.bf16.msrb.mxu3 %v1202_v9 }
 0x1f4   : > { %1211 = vmatpush.bf16.msrb.mxu3 %v3321_v13 }
 0x1f8   : > { %1400 = vmatpush.bf16.msra.mxu3 %v2790_v44 }
 0x1fc   : > { %1401 = vmatpush.bf16.msra.mxu3 %v2789_v46 }
 0x1ff   : > { %2576 = vmatmul.msk.bf16.gmra.mxu3 %vm1107_vm11, %v1098_v18 }
 0x272   : > { %v1129_v19 = vpop.f32.mrf.mxu3 }
 0x273   : > { %v1139_v20 = vsel %vm1138_vm12, %v1129_v19, -inf }
 0x274   : > { %1140 = vmax.xlane.f32.xlu0 %v1139_v20 }
 0x27a   : > { %v1131_v30 = vpop.f32.mrf.mxu3 }
 0x27b   : > { %v1142_v22 = vsel %vm1138_vm12, %v1131_v30, -inf }
 0x27c   : > { %1143 = vmax.xlane.f32.xlu1 %v1142_v22 }
 0x282   : > { %v1134_v23 = vpop.f32.mrf.mxu3 }
 0x283   : > { %v1146_v25 = vsel %vm1145_vm13, %v1134_v23, -inf }
 0x284   : > { %1147 = vmax.xlane.f32.xlu2 %v1146_v25 }
 0x28a   : > { %v1136_v26 = vpop.f32.mrf.mxu3 }
 0x2e7   : > { %v1141_v27 = vpop.xlane.xlu0 %1140 }
 0x2e8   : > { %v1149_v28 = vsub.f32 %v1129_v19, %v1141_v27 }
 0x2ea   : > { %v1152_v29 = vmul.f32 1.442695, %v1149_v28 }
 0x2ec   : > { %2902 = vpow2.f32 %v1152_v29 }
 0x2ef   : > { %v1144_v32 = vpop.xlane.xlu1 %1143 }
 0x2f0   : > { %v1150_v33 = vsub.f32 %v1131_v30, %v1144_v32 }
 0x2f2   : > { %v2903_v34 = vpop.eup %2902  ;;  %v1154_v35 = vmul.f32 1.442695, %v1150_v33 }
 0x2f3   : > { %v1158_v36 = vsel %vm1138_vm12, %v2903_v34, 0.0 }
 0x2f4   : > { %2904 = vpow2.f32 %v1154_v35  ;;  %1159 = vadd.xlane.f32.xlu0 %v1158_v36 }
 0x2f7   : > { %v1148_v37 = vpop.xlane.xlu2 %1147 }
 0x2f8   : > { %v1151_v38 = vsub.f32 %v1134_v23, %v1148_v37 }
 0x2fa   : > { %v2905_v39 = vpop.eup %2904  ;;  %v1156_v40 = vmul.f32 1.442695, %v1151_v38 }
 0x2fb   : > { %v1161_v31 = vsel %vm1138_vm12, %v2905_v39, 0.0 }
 0x2fc   : > { %2906 = vpow2.f32 %v1156_v40  ;;  %1162 = vadd.xlane.f32.xlu1 %v1161_v31 }
 0x302   : > { %v2907_v41 = vpop.eup %2906 }
 0x303   : > { %v1164_v42 = vsel %vm1145_vm13, %v2907_v41, 0.0 }
 0x304   : > { %1165 = vadd.xlane.f32.xlu2 %v1164_v42 }
 0x308   : > { %1230 = vrot.lane.b32.xlu0 %v3306_v47, %s3021_s20 }
 0x310   : > { %1418 = vrot.lane.b32.xlu0 %v3306_v47, %s3022_s30 }
 0x315   : > { %1228 = vrot.lane.b32.xlu1 %v3310_v62, %s3021_s20 }
 0x318   : > { %1416 = vrot.lane.b32.xlu0 %v3310_v62, %s3022_s30 }
 0x31c   : > { %1224 = vrot.lane.b32.xlu2 %v1097_v24, %s3021_s20 }
 0x31d   : > { %1573 = vrot.lane.b32.xlu1 %v3306_v47, %s3023_s14 }
 0x320   : > { %1567 = vrot.lane.b32.xlu0 %v1097_v24, %s3023_s14 }
 0x324   : > { %1226 = vrot.lane.b32.xlu2 %v1098_v18, %s3021_s20 }
 0x325   : > { %1412 = vrot.lane.b32.xlu1 %v1097_v24, %s3022_s30 }
 0x32c   : > { %1571 = vrot.lane.b32.xlu2 %v3310_v62, %s3023_s14 }
 0x32d   : > { %1569 = vrot.lane.b32.xlu1 %v1098_v18, %s3023_s14 }
 0x334   : > { %1414 = vrot.lane.b32.xlu2 %v1098_v18, %s3022_s30 }
 0x367   : > { %v1160_v43 = vpop.xlane.xlu0 %1159 }
 0x368   : > { %2908 = vrcp.f32 %v1160_v43 }
 0x36e   : > { %v2909_v47 = vpop.eup %2908 }
 0x36f   : > { %v1163_v45 = vpop.xlane.xlu1 %1162  ;;  %v1170_v48 = vmul.f32 %v2909_v47, %v2903_v34 }
 0x370   : > { %2910 = vrcp.f32 %v1163_v45 }
 0x371   : > { %v1173_v50 = vpack.c.bf16 %v1170_v48, %v1170_v48 }
 0x373   : > { %v1179_v55 = vunpack.c.l.b16 %v1173_v50 }
 0x376   : > { %v2911_v49 = vpop.eup %2910 }
 0x377   : > { %v1171_v51 = vmul.f32 %v2911_v49, %v2905_v39  ;;  %v1166_v52 = vpop.xlane.xlu2 %1165 }
 0x378   : > { %2912 = vrcp.f32 %v1166_v52 }
 0x379   : > { %v1174_v53 = vpack.c.bf16 %v1171_v51, %v1171_v51 }
 0x37a   : > { %v1231_v54 = vpop.permute.xlu0 %1230 }
 0x37b   : > { %v1180_v56 = vunpack.c.l.b16 %v1174_v53  ;;  %v1242_v57 = vsel %vm1107_vm11, %v1231_v54, 0 }
 0x37c   : > { %1250 = vmatpush.bf16.xpose.msrb.mxu0 %v1242_v57  ;;  %2838 = vmatpush.bf16.xpose.msrb.mxu2 %v1242_v57 }
 0x37d   : > { %v1182_v58 = vpack.c.b16 %v1180_v56, %v1179_v55 }
 0x37e   : > { %v2913_v59 = vpop.eup %2912 }
 0x37f   : > { %2577 = vmatmul.msk.bf16.vlgmr.msrb.gmra.mxu3 %vm1138_vm12, %v1182_v58  ;;  %v1225_v60 = vpop.permute.xlu2 %1224  ;;  %v1172_v61 = vmul.f32 %v2913_v59, %v2907_v41 }
 0x381   : > { %v1175_v63 = vpack.c.bf16 %v1172_v61, %v1172_v61 }
 0x382   : > { %v1419_v62 = vpop.permute.xlu0 %1418 }
 0x383   : > { %v1430_v4 = vsel %vm1107_vm11, %v1419_v62, 0  ;;  %v1181_v5 = vunpack.c.l.b16 %v1175_v63 }
 0x385   : > { %v1183_v7 = vpack.c.b16 %v1181_v5, %v1181_v5 }
 0x387   : > { %v1229_v1 = vpop.permute.xlu1 %1228  ;;  %v1227_v6 = vpop.permute.xlu2 %1226 }
 0x388   : > { %v1239_v3 = vsel %vm1107_vm11, %v1229_v1, 0 }
 0x389   : > { %1251 = vmatpush.bf16.xpose.msrb.mxu0 %v1239_v3  ;;  %2839 = vmatpush.bf16.xpose.msrb.mxu2 %v1239_v3 }
 0x38a   : > { %v1417_v8 = vpop.permute.xlu0 %1416 }
 0x38b   : > { %v1427_v11 = vsel %vm1107_vm11, %v1417_v8, 0 }
 0x38f   : > { %v1574_v9 = vpop.permute.xlu1 %1573  ;;  %2578 = vmatmul.msk.bf16.gmra.mxu3 %vm1138_vm12, %v1183_v7  ;;  %v1572_v12 = vpop.permute.xlu2 %1571 }
 0x390   : > { %v1585_v10 = vsel %vm1107_vm11, %v1574_v9, 0  ;;  %2579 = vmatmul.msk.bf16.vlgmr.msrb.gmra.mxu0 %vm1107_vm11, %v1225_v60  ;;  %2580 = vmatmul.msk.bf16.vlgmr.msrb.gmra.mxu2 %vm1107_vm11, %v1227_v6  ;;  %v1582_v24 = vsel %vm1107_vm11, %v1572_v12, 0 }
 0x391   : > { %1438 = vmatpush.bf16.xpose.msra.mxu0 %v1430_v4  ;;  %1593 = vmatpush.bf16.xpose.msrb.mxu3 %v1585_v10 }
 0x392   : > { %v1568_v36 = vpop.permute.xlu0 %1567 }
 0x397   : > { %v1413_v14 = vpop.permute.xlu1 %1412  ;;  %v1415_v15 = vpop.permute.xlu2 %1414 }
 0x399   : > { %1439 = vmatpush.bf16.xpose.msra.mxu0 %v1427_v11  ;;  %1594 = vmatpush.bf16.xpose.msrb.mxu3 %v1582_v24 }
 0x39f   : > { %v1570_v40 = vpop.permute.xlu1 %1569 }
 0x3a0   : > { %2603 = vmatmul.msk.bf16.vlgmr.msra.gmra.mxu0 %vm1107_vm11, %v1413_v14 }
 0x3b0   : > { %2604 = vmatmul.msk.bf16.gmra.mxu0 %vm1107_vm11, %v1415_v15 }
 0x402   : > { %v1213_v16 = vpop.f32.mrf.mxu3 }
 0x40a   : > { %v1215_v17 = vpop.f32.mrf.mxu3 }
 0x40b   : > { %v1222_v18 = vpack.c.bf16 %v1215_v17, %v1213_v16 }
 0x40d   : > { %v1253_v19 = vpop.f32.mrf.mxu0  ;;  %2601 = vmatmul.msk.bf16.vlgmr.msra.gmra.mxu3 %vm1107_vm11, %v1222_v18 }
 0x40e   : > { %v1262_v20 = vsel %vm1138_vm12, %v1253_v19, -inf }
 0x40f   : > { %1263 = vmax.xlane.f32.xlu0 %v1262_v20 }
 0x412   : > { %v1218_v30 = vpop.f32.mrf.mxu3 }
 0x413   : > { %v1258_v22 = vpop.f32.mrf.mxu2  ;;  %v1223_v28 = vpack.c.bf16 %v1218_v30, %v1218_v30 }
 0x414   : > { %v1268_v23 = vsel %vm1145_vm13, %v1258_v22, -inf }
 0x415   : > { %v1255_v25 = vpop.f32.mrf.mxu0  ;;  %1269 = vmax.xlane.f32.xlu1 %v1268_v23 }
 0x416   : > { %v1265_v26 = vsel %vm1138_vm12, %v1255_v25, -inf }
 0x417   : > { %1266 = vmax.xlane.f32.xlu2 %v1265_v26 }
 0x41a   : > { %v1220_v27 = vpop.f32.mrf.mxu3 }
 0x41b   : > { %v1260_v29 = vpop.f32.mrf.mxu2 }
 0x41d   : > { %2602 = vmatmul.msk.bf16.gmra.mxu3 %vm1107_vm11, %v1223_v28  ;;  %v1441_v32 = vpop.f32.mrf.mxu0 }
 0x41e   : > { %v1450_v33 = vsel %vm1138_vm12, %v1441_v32, -inf }
 0x41f   : > { %1451 = vmax.xlane.f32.xlu0 %v1450_v33 }
 0x425   : > { %v1443_v34 = vpop.f32.mrf.mxu0 }
 0x426   : > { %v1453_v35 = vsel %vm1138_vm12, %v1443_v34, -inf }
 0x427   : > { %1454 = vmax.xlane.f32.xlu2 %v1453_v35 }
 0x42d   : > { %v3371_v37 = vpop.f32.mrf.mxu0  ;;  %2617 = vmatmul.msk.bf16.vlgmr.msrb.gmra.mxu3 %vm1107_vm11, %v1568_v36 }
 0x42e   : > { %v1456_v38 = vsel %vm1145_vm13, %v3371_v37, -inf }
 0x42f   : > { %1457 = vmax.xlane.f32.xlu1 %v1456_v38 }
 0x433   : > { %1308 = vrot.lane.b32.xlu0 %v3312_v0, %s3021_s20 }
 0x435   : > { %v1448_v39 = vpop.f32.mrf.mxu0 }
 0x43d   : > { %2618 = vmatmul.msk.bf16.gmra.mxu3 %vm1107_vm11, %v1570_v40 }
 0x43f   : > { %1306 = vrot.lane.b32.xlu2 %v3321_v13, %s3021_s20 }
 0x482   : > { %v1264_v31 = vpop.xlane.xlu0 %1263 }
 0x483   : > { %v1271_v41 = vsub.f32 %v1253_v19, %v1264_v31 }
 0x485   : > { %v1274_v42 = vmul.f32 1.442695, %v1271_v41 }
 0x487   : > { %2914 = vpow2.f32 %v1274_v42 }
 0x488   : > { %v1270_v43 = vpop.xlane.xlu1 %1269 }
 0x489   : > { %v1273_v44 = vsub.f32 %v1258_v22, %v1270_v43 }
 0x48a   : > { %v1267_v45 = vpop.xlane.xlu2 %1266 }
 0x48b   : > { %v1278_v46 = vmul.f32 1.442695, %v1273_v44  ;;  %v1272_v47 = vsub.f32 %v1255_v25, %v1267_v45 }
 0x48d   : > { %v2915_v48 = vpop.eup %2914  ;;  %2916 = vpow2.f32 %v1278_v46  ;;  %v1276_v50 = vmul.f32 1.442695, %v1272_v47 }
 0x48e   : > { %v1280_v49 = vsel %vm1138_vm12, %v2915_v48, 0.0 }
 0x48f   : > { %1281 = vadd.xlane.f32.xlu2 %v1280_v49  ;;  %2918 = vpow2.f32 %v1276_v50 }
 0x490   : > { %v3382_v51 = vpop.f32.mrf.mxu3 }
 0x492   : > { %v1452_v52 = vpop.xlane.xlu0 %1451 }
 0x493   : > { %v3384_v53 = vpop.eup %2916  ;;  %v1459_v54 = vsub.f32 %v1441_v32, %v1452_v52 }
 0x494   : > { %v1286_v55 = vsel %vm1145_vm13, %v3384_v53, 0.0 }
 0x495   : > { %1287 = vadd.xlane.f32.xlu1 %v1286_v55  ;;  %v1462_v56 = vmul.f32 1.442695, %v1459_v54  ;;  %v2919_v58 = vpop.eup %2918 }
 0x496   : > { %v1283_v61 = vsel %vm1138_vm12, %v2919_v58, 0.0 }
 0x497   : > { %2920 = vpow2.f32 %v1462_v56 }
 0x498   : > { %v3388_v57 = vpop.f32.mrf.mxu3 }
 0x49a   : > { %v1455_v59 = vpop.xlane.xlu2 %1454 }
 0x49b   : > { %v1460_v60 = vsub.f32 %v1443_v34, %v1455_v59 }
 0x49d   : > { %v1464_v62 = vmul.f32 1.442695, %v1460_v60  ;;  %1284 = vadd.xlane.f32.xlu1 %v1283_v61  ;;  %v3393_v1 = vpop.eup %2920 }
 0x49e   : > { %v1468_v3 = vsel %vm1138_vm12, %v3393_v1, 0.0 }
 0x49f   : > { %2922 = vpow2.f32 %v1464_v62 }
 0x4a0   : > { %v3391_v63 = vpop.f32.mrf.mxu3 }
 0x4a2   : > { %v1307_v9 = vpop.permute.xlu2 %1306  ;;  %v1458_v17 = vpop.xlane.xlu1 %1457 }
 0x4a3   : > { %v1461_v18 = vsub.f32 %v3371_v37, %v1458_v17 }
 0x4a5   : > { %v3397_v4 = vpop.eup %2922  ;;  %v1309_v5 = vpop.permute.xlu0 %1308  ;;  %1469 = vadd.xlane.f32.xlu1 %v1468_v3  ;;  %v1466_v19 = vmul.f32 1.442695, %v1461_v18  ;;  %v2792_v18 = vld [vmem:[%s3167_s0 + $0x18] sm:$0xff] }
 0x4a6   : > { %v1318_v6 = vand.u32 %v1309_v5, %v3315_v2  ;;  %v1471_v7 = vsel %vm1138_vm12, %v3397_v4, 0.0  ;;  %1364 = vmatpush.bf16.msra.mxu2 %v2792_v18 }
 0x4a7   : > { %1472 = vadd.xlane.f32.xlu2 %v1471_v7  ;;  %2924 = vpow2.f32 %v1466_v19  ;;  %v2791_v19 = vld [vmem:[%s3167_s0 + $0x10] sm:$0xff] }
 0x4a8   : > { %1326 = vmatpush.bf16.msrb.mxu1 %v1318_v6  ;;  %v1410_v8 = vpop.f32.mrf.mxu3 }
 0x4aa   : > { %1365 = vmatpush.bf16.msra.mxu2 %v2791_v19 }
 0x4ac   : > { %1327 = vmatpush.bf16.msrb.mxu1 %v1307_v9 }
 0x4ad   : > { %v3412_v20 = vpop.eup %2924 }
 0x4ae   : > { %v1474_v30 = vsel %vm1145_vm13, %v3412_v20, 0.0 }
 0x4b0   : > { %v1596_v10 = vpop.f32.mrf.mxu3 }
 0x4b1   : > { %v1605_v11 = vsel %vm1138_vm12, %v1596_v10, -inf }
 0x4b2   : > { %1606 = vmax.xlane.f32.xlu1 %v1605_v11 }
 0x4b8   : > { %v1598_v12 = vpop.f32.mrf.mxu3 }
 0x4b9   : > { %v1608_v24 = vsel %vm1138_vm12, %v1598_v12, -inf }
 0x4ba   : > { %1609 = vmax.xlane.f32.xlu0 %v1608_v24 }
 0x4bf   : > { %1494 = vrot.lane.b32.xlu2 %v3321_v13, %s3022_s30 }
 0x4c0   : > { %v1601_v14 = vpop.f32.mrf.mxu3 }
 0x4c1   : > { %v1611_v15 = vsel %vm1145_vm13, %v1601_v14, -inf }
 0x4c2   : > { %1612 = vmax.xlane.f32.xlu0 %v1611_v15 }
 0x4c8   : > { %v1603_v16 = vpop.f32.mrf.mxu3 }
 0x4cb   : > { %1496 = vrot.lane.b32.xlu1 %v3312_v0, %s3022_s30 }
 0x4d6   : > { %1651 = vrot.lane.b32.xlu0 %v3312_v0, %s3023_s14 }
 0x4e8   : > { %1475 = vadd.xlane.f32.xlu2 %v1474_v30  ;;  %v2794_v30 = vld [vmem:[%s3167_s0 + $0x28] sm:$0xff] }
 0x4e9   : > { %1552 = vmatpush.bf16.msrb.mxu2 %v2794_v30 }
 0x502   : > { %v1282_v22 = vpop.xlane.xlu2 %1281 }
 0x503   : > { %2926 = vrcp.f32 %v1282_v22 }
 0x508   : > { %v1288_v23 = vpop.xlane.xlu1 %1287 }
 0x509   : > { %v2927_v26 = vpop.eup %2926 }
 0x50a   : > { %v1292_v27 = vmul.f32 %v2927_v26, %v2915_v48 }
 0x50c   : > { %v1295_v29 = vpack.c.bf16 %v1292_v27, %v1292_v27 }
 0x50e   : > { %v1301_v33 = vunpack.c.l.b16 %v1295_v29 }
 0x510   : > { %v1285_v25 = vpop.xlane.xlu1 %1284 }
 0x511   : > { %2928 = vrcp.f32 %v1285_v25 }
 0x512   : > { %2930 = vrcp.f32 %v1288_v23 }
 0x517   : > { %v2929_v28 = vpop.eup %2928 }
 0x518   : > { %v1293_v32 = vmul.f32 %v2929_v28, %v2919_v58  ;;  %v1470_v35 = vpop.xlane.xlu1 %1469  ;;  %v2931_v37 = vpop.eup %2930 }
 0x519   : > { %v1294_v38 = vmul.f32 %v2931_v37, %v3384_v53 }
 0x51a   : > { %v1296_v0 = vpack.c.bf16 %v1293_v32, %v1293_v32  ;;  %v1473_v43 = vpop.xlane.xlu2 %1472 }
 0x51b   : > { %v1297_v31 = vpack.c.bf16 %v1294_v38, %v1294_v38 }
 0x51c   : > { %v1302_v34 = vunpack.c.l.b16 %v1296_v0 }
 0x51d   : > { %v1303_v42 = vunpack.c.l.b16 %v1297_v31 }
 0x51e   : > { %v1304_v36 = vpack.c.b16 %v1302_v34, %v1301_v33 }
 0x51f   : > { %v1305_v46 = vpack.c.b16 %v1303_v42, %v1303_v42 }
 0x520   : > { %2581 = vmatmul.msk.bf16.vlgmr.msrb.gmra.mxu1 %vm1138_vm12, %v1304_v36 }
 0x525   : > { %v1607_v39 = vpop.xlane.xlu1 %1606 }
 0x526   : > { %v1614_v40 = vsub.f32 %v1596_v10, %v1607_v39  ;;  %v1495_v10 = vpop.permute.xlu2 %1494 }
 0x528   : > { %v1617_v41 = vmul.f32 1.442695, %v1614_v40 }
 0x52a   : > { %2932 = vpow2.f32 %v1617_v41 }
 0x52b   : > { %2934 = vrcp.f32 %v1473_v43 }
 0x52c   : > { %2936 = vrcp.f32 %v1470_v35 }
 0x52d   : > { %v1610_v44 = vpop.xlane.xlu0 %1609 }
 0x52e   : > { %v1615_v45 = vsub.f32 %v1598_v12, %v1610_v44 }
 0x530   : > { %v3418_v47 = vpop.eup %2932  ;;  %v1619_v48 = vmul.f32 1.442695, %v1615_v45  ;;  %2582 = vmatmul.msk.bf16.gmra.mxu1 %vm1138_vm12, %v1305_v46 }
 0x531   : > { %v1623_v49 = vsel %vm1138_vm12, %v3418_v47, 0.0  ;;  %v2935_v52 = vpop.eup %2934 }
 0x532   : > { %2938 = vpow2.f32 %v1619_v48  ;;  %1624 = vadd.xlane.f32.xlu1 %v1623_v49  ;;  %v2937_v54 = vpop.eup %2936  ;;  %v1481_v58 = vmul.f32 %v2935_v52, %v3397_v4  ;;  %v2796_v52 = vld [vmem:[%s3167_s0 + $0x38] sm:$0xff] }
 0x533   : > { %v1480_v60 = vmul.f32 %v2937_v54, %v3393_v1 }
 0x534   : > { %v1484_v61 = vpack.c.bf16 %v1481_v58, %v1481_v58 }
 0x535   : > { %v1613_v50 = vpop.xlane.xlu0 %1612  ;;  %v1483_v5 = vpack.c.bf16 %v1480_v60, %v1480_v60 }
 0x536   : > { %v1616_v53 = vsub.f32 %v1601_v14, %v1613_v50  ;;  %v1490_v7 = vunpack.c.l.b16 %v1484_v61 }
 0x537   : > { %v1489_v9 = vunpack.c.l.b16 %v1483_v5 }
 0x538   : > { %v2939_v55 = vpop.eup %2938  ;;  %v1621_v56 = vmul.f32 1.442695, %v1616_v53  ;;  %v2795_v53 = vld [vmem:[%s3167_s0 + $0x30] sm:$0xff] }
 0x539   : > { %v1626_v59 = vsel %vm1138_vm12, %v2939_v55, 0.0  ;;  %v1492_v4 = vpack.c.b16 %v1490_v7, %v1489_v9 }
 0x53a   : > { %2940 = vpow2.f32 %v1621_v56  ;;  %1627 = vadd.xlane.f32.xlu0 %v1626_v59 }
 0x53d   : > { %v1497_v62 = vpop.permute.xlu1 %1496 }
 0x53e   : > { %v1506_v3 = vand.u32 %v1497_v62, %v3315_v2 }
 0x540   : > { %v2941_v6 = vpop.eup %2940  ;;  %1514 = vmatpush.bf16.msra.mxu1 %v1506_v3 }
 0x541   : > { %v1629_v8 = vsel %vm1145_vm13, %v2941_v6, 0.0 }
 0x542   : > { %1630 = vadd.xlane.f32.xlu1 %v1629_v8 }
 0x544   : > { %1515 = vmatpush.bf16.msra.mxu1 %v1495_v10 }
 0x547   : > { %2605 = vmatmul.msk.bf16.vlgmr.msra.gmra.mxu1 %vm1138_vm12, %v1492_v4 }
 0x548   : > { %v1652_v1 = vpop.permute.xlu0 %1651  ;;  %1707 = vmatpush.bf16.msrb.mxu1 %v2796_v52  ;;  %v2683_v52 = vld [vmem:[%s3191_s18 + $0x68] sm:$0xf0] }
 0x549   : > { %v1661_v11 = vand.u32 %v1652_v1, %v3315_v2 }
 0x54b   : > { %1669 = vmatpush.bf16.msrb.mxu0 %v1661_v11 }
 0x54c   : > { %1708 = vmatpush.bf16.msrb.mxu1 %v2795_v53 }
 0x54e   : > { %1649 = vrot.lane.b32.xlu0 %v3321_v13, %s3023_s14  ;;  %v2793_v13 = vld [vmem:[%s3167_s0 + $0x20] sm:$0xff] }
 0x54f   : > { %1553 = vmatpush.bf16.msrb.mxu2 %v2793_v13  ;;  %v2970_v13 = vld [vmem:[#allocation2 + $0x8] sm:$0x1] }
 0x55b   : > { %v1476_v12 = vpop.xlane.xlu2 %1475 }
 0x55c   : > { %2942 = vrcp.f32 %v1476_v12 }
 0x562   : > { %v2943_v24 = vpop.eup %2942 }
 0x563   : > { %v1482_v14 = vmul.f32 %v2943_v24, %v3412_v20 }
 0x565   : > { %v1485_v15 = vpack.c.bf16 %v1482_v14, %v1482_v14 }
 0x567   : > { %v1491_v16 = vunpack.c.l.b16 %v1485_v15 }
 0x569   : > { %v1493_v17 = vpack.c.b16 %v1491_v16, %v1491_v16  ;;  %v2968_v16 = vld [vmem:[#allocation2 + $0x10] sm:$0xff] }
 0x56b   : > { %2606 = vmatmul.msk.bf16.gmra.mxu1 %vm1138_vm12, %v1493_v17 }
 0x59d   : > { %v1329_v2 = vpop.f32.mrf.mxu1 }
 0x5a5   : > { %v1331_v22 = vpop.f32.mrf.mxu1  ;;  %v1625_v25 = vpop.xlane.xlu1 %1624 }
 0x5a6   : > { %v1338_v23 = vpack.c.bf16 %v1331_v22, %v1329_v2  ;;  %v2969_v2 = vld [vmem:[#allocation2] sm:$0xff] }
 0x5a8   : > { %2591 = vmatmul.msk.bf16.vlgmr.msra.gmra.mxu2 %vm1107_vm11, %v1338_v23 }
 0x5ad   : > { %v1334_v26 = vpop.f32.mrf.mxu1  ;;  %v1628_v20 = vpop.xlane.xlu0 %1627 }
 0x5ae   : > { %2944 = vrcp.f32 %v1628_v20  ;;  %v1339_v32 = vpack.c.bf16 %v1334_v26, %v1334_v26 }
 0x5af   : > { %2946 = vrcp.f32 %v1625_v25 }
 0x5b4   : > { %v2945_v27 = vpop.eup %2944 }
 0x5b5   : > { %v2947_v28 = vpop.eup %2946  ;;  %v1336_v29 = vpop.f32.mrf.mxu1  ;;  %v1636_v0 = vmul.f32 %v2945_v27, %v2939_v55 }
 0x5b6   : > { %v1635_v33 = vmul.f32 %v2947_v28, %v3418_v47  ;;  %v1631_v35 = vpop.xlane.xlu1 %1630 }
 0x5b7   : > { %v1639_v34 = vpack.c.bf16 %v1636_v0, %v1636_v0  ;;  %2948 = vrcp.f32 %v1631_v35 }
 0x5b8   : > { %2592 = vmatmul.msk.bf16.gmra.mxu2 %vm1107_vm11, %v1339_v32  ;;  %v1638_v36 = vpack.c.bf16 %v1635_v33, %v1635_v33 }
 0x5b9   : > { %v1645_v37 = vunpack.c.l.b16 %v1639_v34 }
 0x5ba   : > { %v1644_v38 = vunpack.c.l.b16 %v1638_v36 }
 0x5bc   : > { %v1647_v40 = vpack.c.b16 %v1645_v37, %v1644_v38 }
 0x5bd   : > { %v2949_v31 = vpop.eup %2948 }
 0x5be   : > { %v1637_v42 = vmul.f32 %v2949_v31, %v2941_v6 }
 0x5c0   : > { %v1650_v39 = vpop.permute.xlu0 %1649  ;;  %v1640_v43 = vpack.c.bf16 %v1637_v42, %v1637_v42  ;;  %v2812_v42 = vld [vmem:[%s3191_s18 + $0x74] sm:$0xf0] }
 0x5c1   : > { %1670 = vmatpush.bf16.msrb.mxu0 %v1650_v39 }
 0x5c2   : > { %v1646_v46 = vunpack.c.l.b16 %v1640_v43  ;;  %v2811_v43 = vld [vmem:[%s3191_s18 + $0x74] sm:$0xf] }
 0x5c4   : > { %v1517_v41 = vpop.f32.mrf.mxu1  ;;  %2619 = vmatmul.msk.bf16.vlgmr.msrb.gmra.mxu0 %vm1138_vm12, %v1647_v40  ;;  %v1648_v47 = vpack.c.b16 %v1646_v46, %v1646_v46 }
 0x5cc   : > { %v1519_v44 = vpop.f32.mrf.mxu1 }
 0x5cd   : > { %v1526_v45 = vpack.c.bf16 %v1519_v44, %v1517_v41  ;;  %v2689_v41 = vld [vmem:[%s3191_s18 + $0x70] sm:$0xf] }
 0x5ce   : > { %v2690_v44 = vor.u32 %v2812_v42, %v2689_v41 }
 0x5cf   : > { %2615 = vmatmul.msk.bf16.vlgmr.msrb.gmra.mxu2 %vm1107_vm11, %v1526_v45  ;;  %v2691_v45 = vld [vmem:[%s3191_s18 + $0x78] sm:$0xf0] }
 0x5d0   : > { %v2694_v46 = vor.u32 %v2811_v43, %v2691_v45  ;;  %1912 = vmatpush.bf16.msra.mxu2 %v2690_v44 }
 0x5d2   : > { %1930 = vmatpush.bf16.msra.mxu3 %v2694_v46 }
 0x5d4   : > { %2620 = vmatmul.msk.bf16.gmra.mxu0 %vm1138_vm12, %v1648_v47  ;;  %v2681_v47 = vld [vmem:[%s3191_s18 + $0x60] sm:$0xf] }
 0x5e8   : > { %v1522_v48 = vpop.f32.mrf.mxu1 }
 0x5e9   : > { %v1527_v49 = vpack.c.bf16 %v1522_v48, %v1522_v48  ;;  %v2810_v48 = vld [vmem:[%s3191_s18 + $0x64] sm:$0xf0] }
 0x5eb   : > { %2616 = vmatmul.msk.bf16.gmra.mxu2 %vm1107_vm11, %v1527_v49  ;;  %v2809_v49 = vld [vmem:[%s3191_s18 + $0x64] sm:$0xf] }
 0x5ec   : > { %v2686_v53 = vor.u32 %v2809_v49, %v2683_v52 }
 0x5ee   : > { %1931 = vmatpush.bf16.msra.mxu3 %v2686_v53 }
 0x5f0   : > { %v1524_v50 = vpop.f32.mrf.mxu1 }
 0x5f1   : > { %v2682_v50 = vor.u32 %v2810_v48, %v2681_v47 }
 0x5f3   : > { %1913 = vmatpush.bf16.msra.mxu2 %v2682_v50 }
 0x62b   : > { %v1367_v54 = vpop.f32.mrf.mxu2 }
 0x62c   : > { %v1404_v62 = vadd.f32 %v3382_v51, %v1367_v54  ;;  %v2890_v51 = vld [vmem:[%s3648_s27] ss:$0 sm:$0xff]  ;;  %v2673_v54 = vld [vmem:[%s3191_s18 + $0x50] sm:$0xf] }
 0x633   : > { %v1369_v55 = vpop.f32.mrf.mxu2 }
 0x634   : > { %v1406_v7 = vadd.f32 %v3388_v57, %v1369_v55  ;;  %v2808_v55 = vld [vmem:[%s3191_s18 + $0x54] sm:$0xf0] }
 0x63b   : > { %v1372_v56 = vpop.f32.mrf.mxu2 }
 0x63c   : > { %v1409_v1 = vadd.f32 %v3391_v63, %v1372_v56  ;;  %v2807_v56 = vld [vmem:[%s3191_s18 + $0x54] sm:$0xf] }
 0x641   : > { %v1672_v58 = vpop.f32.mrf.mxu0 }
 0x643   : > { %v1374_v59 = vpop.f32.mrf.mxu2 }
 0x644   : > { %v2675_v59 = vld [vmem:[%s3191_s18 + $0x58] sm:$0xf0] }
 0x649   : > { %v1674_v60 = vpop.f32.mrf.mxu0 }
 0x64a   : > { %v1681_v61 = vpack.c.bf16 %v1674_v60, %v1672_v58  ;;  %v2674_v58 = vor.u32 %v2808_v55, %v2673_v54  ;;  %v2678_v60 = vor.u32 %v2807_v56, %v2675_v59  ;;  %v2891_v55 = vld [vmem:[%s3649_s24] ss:$0 sm:$0xff] }
 0x64c   : > { %2629 = vmatmul.msk.bf16.vlgmr.msrb.gmra.mxu1 %vm1107_vm11, %v1681_v61  ;;  %1914 = vmatpush.bf16.msra.mxu2 %v2674_v58  ;;  %v2665_v61 = vld [vmem:[%s3191_s18 + $0x40] sm:$0xf] }
 0x64d   : > { %1932 = vmatpush.bf16.msra.mxu3 %v2678_v60 }
 0x651   : > { %v1677_v3 = vpop.f32.mrf.mxu0 }
 0x652   : > { %v1555_v5 = vpop.f32.mrf.mxu2  ;;  %v1682_v9 = vpack.c.bf16 %v1677_v3, %v1677_v3  ;;  %v2805_v3 = vld [vmem:[%s3191_s18 + $0x44] sm:$0xf] }
 0x653   : > { %v1564_v6 = vadd.f32 %v1555_v5, %v1404_v62  ;;  %v2806_v62 = vld [vmem:[%s3191_s18 + $0x44] sm:$0xf0] }
 0x654   : > { %v2666_v5 = vor.u32 %v2806_v62, %v2665_v61 }
 0x656   : > { %1915 = vmatpush.bf16.msra.mxu2 %v2666_v5 }
 0x659   : > { %v1679_v8 = vpop.f32.mrf.mxu0 }
 0x65a   : > { %v1557_v10 = vpop.f32.mrf.mxu2  ;;  %v2657_v8 = vld [vmem:[%s3191_s18 + $0x30] sm:$0xf] }
 0x65b   : > { %v1565_v4 = vadd.f32 %v1557_v10, %v1406_v7  ;;  %v2803_v10 = vld [vmem:[%s3191_s18 + $0x34] sm:$0xf] }
 0x65c   : > { %2630 = vmatmul.msk.bf16.gmra.mxu1 %vm1107_vm11, %v1682_v9  ;;  %v2804_v9 = vld [vmem:[%s3191_s18 + $0x34] sm:$0xf0] }
 0x66e   : > { %v1560_v11 = vpop.f32.mrf.mxu2 }
 0x66f   : > { %v1566_v12 = vadd.f32 %v1560_v11, %v1409_v1  ;;  %v2659_v1 = vld [vmem:[%s3191_s18 + $0x38] sm:$0xf0] }
 0x670   : > { %v2662_v11 = vor.u32 %v2803_v10, %v2659_v1 }
 0x676   : > { %v1562_v24 = vpop.f32.mrf.mxu2 }
 0x677   : > { %v2802_v24 = vld [vmem:[%s3191_s18 + $0x24] sm:$0xf0] }
 0x6c9   : > { %v1710_v14 = vpop.f32.mrf.mxu1 }
 0x6ca   : > { %v1719_v15 = vadd.f32 %v1710_v14, %v1564_v6  ;;  %v2667_v6 = vld [vmem:[%s3191_s18 + $0x48] sm:$0xf0]  ;;  %v2801_v14 = vld [vmem:[%s3191_s18 + $0x24] sm:$0xf] }
 0x6cb   : > { %v2670_v7 = vor.u32 %v2805_v3, %v2667_v6  ;;  %v2892_v3 = vld [vmem:[%s3650_s5] ss:$0 sm:$0xff] }
 0x6cc   : > { %v1722_v57 = vadd.f32 %v2968_v16, %v1719_v15 }
 0x6cd   : > { %1933 = vmatpush.bf16.msra.mxu3 %v2670_v7 }
 0x6ce   : > { %v3457_v17 = vadd.f32 %v2890_v51, %v1722_v57  ;;  %v2641_v57 = vld [vmem:[%s3191_s18 + $0x10] sm:$0xf] }
 0x6d0   : > { %1734 = vadd.xlane.f32.xlu0 %v3457_v17 }
 0x6d1   : > { %v1712_v18 = vpop.f32.mrf.mxu1  ;;  %1934 = vmatpush.bf16.msra.mxu3 %v2662_v11 }
 0x6d2   : > { %v1720_v19 = vadd.f32 %v1712_v18, %v1565_v4  ;;  %v2658_v4 = vor.u32 %v2804_v9, %v2657_v8  ;;  %v2800_v18 = vld [vmem:[%s3191_s18 + $0x14] sm:$0xf0] }
 0x6d4   : > { %v1723_v63 = vadd.f32 %v2969_v2, %v1720_v19  ;;  %1916 = vmatpush.bf16.msra.mxu2 %v2658_v4  ;;  %v2799_v19 = vld [vmem:[%s3191_s18 + $0x14] sm:$0xf]  ;;  %v2642_v2 = vor.u32 %v2800_v18, %v2641_v57  ;;  %v2826_v57 = vld [vmem:[%s3201_s3 + $0x68] sm:$0xff]  ;;  %v2817_v18 = vld [vmem:[%s3201_s3 + $0x20] sm:$0xff] }
 0x6d6   : > { %v3460_v30 = vadd.f32 %v2890_v51, %v1723_v63  ;;  %v2643_v63 = vld [vmem:[%s3191_s18 + $0x18] sm:$0xf0] }
 0x6d8   : > { %1736 = vadd.xlane.f32.xlu1 %v3460_v30 }
 0x6d9   : > { %v1715_v22 = vpop.f32.mrf.mxu1 }
 0x6da   : > { %v1721_v23 = vadd.f32 %v1715_v22, %v1566_v12  ;;  %v2649_v12 = vld [vmem:[%s3191_s18 + $0x20] sm:$0xf] }
 0x6db   : > { %v2650_v15 = vor.u32 %v2802_v24, %v2649_v12 }
 0x6dc   : > { %v1724_v25 = vadd.f32 %v2970_v13, %v1721_v23  ;;  %v2646_v23 = vor.u32 %v2799_v19, %v2643_v63  ;;  %v2825_v19 = vld [vmem:[%s3201_s3 + $0x60] sm:$0xff]  ;;  %v2824_v63 = vld [vmem:[%s3201_s3 + $0x58] sm:$0xff] }
 0x6dd   : > { %1917 = vmatpush.bf16.msra.mxu2 %v2650_v15  ;;  %v2828_v15 = vld [vmem:[%s3201_s3 + $0x78] sm:$0xff] }
 0x6de   : > { %v3463_v26 = vadd.f32 %v2890_v51, %v1724_v25  ;;  %v2651_v51 = vld [vmem:[%s3191_s18 + $0x28] sm:$0xf0]  ;;  %v2633_v25 = vld [vmem:[%s3191_s18] sm:$0xf]  ;;  %2156 = vmatpush.bf16.msra.mxu1 %v2828_v15 }
 0x6df   : > { %v2654_v16 = vor.u32 %v2801_v14, %v2651_v51  ;;  %v2820_v14 = vld [vmem:[%s3201_s3 + $0x38] sm:$0xff]  ;;  %v2819_v51 = vld [vmem:[%s3201_s3 + $0x30] sm:$0xff] }
 0x6e0   : > { %v1738_v20 = vsel %vm761_vm0, %v3463_v26, 0.0  ;;  %2138 = vmatpush.bf16.msra.mxu0 %v2820_v14 }
 0x6e1   : > { %v1717_v27 = vpop.f32.mrf.mxu1  ;;  %1739 = vadd.xlane.f32.xlu1 %v1738_v20  ;;  %1935 = vmatpush.bf16.msra.mxu3 %v2654_v16  ;;  %v2798_v20 = vld [vmem:[%s3191_s18 + $0x4] sm:$0xf0]  ;;  %v2827_v16 = vld [vmem:[%s3201_s3 + $0x70] sm:$0xff] }
 0x6e2   : > { %1918 = vmatpush.bf16.msra.mxu2 %v2642_v2  ;;  %v2797_v27 = vld [vmem:[%s3191_s18 + $0x4] sm:$0xf]  ;;  %2157 = vmatpush.bf16.msra.mxu1 %v2827_v16  ;;  %v2816_v2 = vld [vmem:[%s3201_s3 + $0x18] sm:$0xff] }
 0x6e4   : > { %2139 = vmatpush.bf16.msra.mxu0 %v2819_v51 }
 0x6e5   : > { %1936 = vmatpush.bf16.msra.mxu3 %v2646_v23  ;;  %v2823_v23 = vld [vmem:[%s3201_s3 + $0x50] sm:$0xff] }
 0x6e6   : > { %2158 = vmatpush.bf16.msra.mxu1 %v2826_v57 }
 0x6ea   : > { %2159 = vmatpush.bf16.msra.mxu1 %v2825_v19 }
 0x6ee   : > { %2160 = vmatpush.bf16.msra.mxu1 %v2824_v63 }
 0x6f2   : > { %2161 = vmatpush.bf16.msra.mxu1 %v2823_v23 }
 0x743   : > { %v1735_v28 = vpop.xlane.xlu0 %1734 }
 0x744   : > { %v1741_v29 = vmul.f32 %v1735_v28, %v3223_v21 }
 0x746   : > { %v3469_v32 = vsub.f32 %v3457_v17, %v1741_v29  ;;  %v2634_v29 = vor.u32 %v2798_v20, %v2633_v25  ;;  %v2814_v25 = vld [vmem:[%s3201_s3 + $0x8] sm:$0xff] }
 0x747   : > { %v2822_v20 = vld [vmem:[%s3201_s3 + $0x48] sm:$0xff] }
 0x748   : > { %v1747_v0 = vmul.f32 %v3469_v32, %v3469_v32  ;;  %1919 = vmatpush.bf16.msra.mxu2 %v2634_v29  ;;  %2162 = vmatpush.bf16.msra.mxu1 %v2822_v20 }
 0x74a   : > { %1750 = vadd.xlane.f32.xlu1 %v1747_v0  ;;  %v2635_v0 = vld [vmem:[%s3191_s18 + $0x8] sm:$0xf0] }
 0x74b   : > { %v1737_v33 = vpop.xlane.xlu1 %1736 }
 0x74c   : > { %v1742_v34 = vmul.f32 %v1737_v33, %v3223_v21  ;;  %v2638_v33 = vor.u32 %v2797_v27, %v2635_v0 }
 0x74e   : > { %v3475_v35 = vsub.f32 %v3460_v30, %v1742_v34  ;;  %1937 = vmatpush.bf16.msra.mxu3 %v2638_v33  ;;  %v2813_v33 = vld [vmem:[%s3201_s3] sm:$0xff] }
 0x750   : > { %v1748_v36 = vmul.f32 %v3475_v35, %v3475_v35 }
 0x752   : > { %1752 = vadd.xlane.f32.xlu1 %v1748_v36 }
 0x754   : > { %v1740_v37 = vpop.xlane.xlu1 %1739 }
 0x755   : > { %v1743_v38 = vmul.f32 %v1740_v37, %v3223_v21 }
 0x757   : > { %v3481_v39 = vsub.f32 %v3463_v26, %v1743_v38 }
 0x759   : > { %v1749_v40 = vmul.f32 %v3481_v39, %v3481_v39 }
 0x75b   : > { %v1754_v31 = vsel %vm761_vm0, %v1749_v40, 0.0 }
 0x75c   : > { %1755 = vadd.xlane.f32.xlu2 %v1754_v31 }
 0x7bd   : > { %v1751_v22 = vpop.xlane.xlu1 %1750 }
 0x7be   : > { %v1757_v13 = vmul.f32 %v1751_v22, %v3223_v21  ;;  %v2815_v22 = vld [vmem:[%s3201_s3 + $0x10] sm:$0xff] }
 0x7c0   : > { %v1760_v28 = vadd.f32 1e-06, %v1757_v13  ;;  %v1826_v13 = vld [vmem:[%s3196_s26] sm:$0x3] }
 0x7c1   : > { %v1828_v27 = vperm.slane %v1826_v13, 0 }
 0x7c2   : > { %2950 = vrsqrt.f32 %v1760_v28  ;;  %vm1769_vm15 = vweird.f32 %v1760_v28 }
 0x7c5   : > { %v1753_v34 = vpop.xlane.xlu1 %1752 }
 0x7c6   : > { %v1758_v36 = vmul.f32 %v1753_v34, %v3223_v21  ;;  %v2821_v34 = vld [vmem:[%s3201_s3 + $0x40] sm:$0xff] }
 0x7c7   : > { %2163 = vmatpush.bf16.msra.mxu1 %v2821_v34 }
 0x7c8   : > { %v2951_v37 = vpop.eup %2950  ;;  %v1761_v38 = vadd.f32 1e-06, %v1758_v36 }
 0x7c9   : > { %v1764_v40 = vmul.f32 %v2951_v37, %v1760_v28  ;;  %vm1770_vm14 = vweird.f32 %v2951_v37  ;;  %v1829_v28 = vperm.slane %v1826_v13, 1 }
 0x7ca   : > { %2952 = vrsqrt.f32 %v1761_v38  ;;  %vm1771_vm1 = vmor %vm1769_vm15, %vm1770_vm14  ;;  %vm1779_vm3 = vweird.f32 %v1761_v38 }
 0x7cb   : > { %v1765_v31 = vmul.f32 %v2951_v37, %v1764_v40 }
 0x7cd   : > { %v1766_v41 = vmul.f32 0.5, %v1765_v31 }
 0x7cf   : > { %v1767_v42 = vsub.f32 1.5, %v1766_v41  ;;  %v1756_v43 = vpop.xlane.xlu2 %1755 }
 0x7d0   : > { %v2953_v44 = vpop.eup %2952  ;;  %v1759_v45 = vmul.f32 %v1756_v43, %v3223_v21 }
 0x7d1   : > { %v1768_v46 = vmul.f32 %v2951_v37, %v1767_v42  ;;  %v1774_v47 = vmul.f32 %v2953_v44, %v1761_v38  ;;  %vm1780_vm2 = vweird.f32 %v2953_v44 }
 0x7d2   : > { %v1762_v48 = vadd.f32 1e-06, %v1759_v45  ;;  %vm1781_vm4 = vmor %vm1779_vm3, %vm1780_vm2 }
 0x7d3   : > { %v1775_v49 = vmul.f32 %v2953_v44, %v1774_v47  ;;  %v1772_v50 = vsel %vm1771_vm1, %v2951_v37, %v1768_v46 }
 0x7d4   : > { %2954 = vrsqrt.f32 %v1762_v48  ;;  %v1793_v54 = vmul.f32 %v1772_v50, %v3469_v32  ;;  %vm1789_vm6 = vweird.f32 %v1762_v48 }
 0x7d5   : > { %v1776_v52 = vmul.f32 0.5, %v1775_v49 }
 0x7d6   : > { %v1799_v62 = vmul.f32 %v2891_v55, %v1793_v54 }
 0x7d7   : > { %v1777_v53 = vsub.f32 1.5, %v1776_v52 }
 0x7d8   : > { %v1805_v7 = vadd.f32 %v2892_v3, %v1799_v62 }
 0x7d9   : > { %v1778_v56 = vmul.f32 %v2953_v44, %v1777_v53 }
 0x7da   : > { %v2955_v58 = vpop.eup %2954 }
 0x7db   : > { %v1782_v59 = vsel %vm1781_vm4, %v2953_v44, %v1778_v56  ;;  %v1784_v60 = vmul.f32 %v2955_v58, %v1762_v48  ;;  %vm1790_vm5 = vweird.f32 %v2955_v58 }
 0x7dc   : > { %v1794_v61 = vmul.f32 %v1782_v59, %v3475_v35  ;;  %vm1791_vm7 = vmor %vm1789_vm6, %vm1790_vm5 }
 0x7dd   : > { %v1785_v32 = vmul.f32 %v2955_v58, %v1784_v60 }
 0x7de   : > { %v1800_v5 = vmul.f32 %v2891_v55, %v1794_v61 }
 0x7df   : > { %v1786_v6 = vmul.f32 0.5, %v1785_v32 }
 0x7e0   : > { %v1806_v8 = vadd.f32 %v2892_v3, %v1800_v5 }
 0x7e1   : > { %v1787_v9 = vsub.f32 1.5, %v1786_v6 }
 0x7e2   : > { %v1808_v10 = vpack.c.bf16 %v1806_v8, %v1805_v7 }
 0x7e3   : > { %v1788_v4 = vmul.f32 %v2955_v58, %v1787_v9 }
 0x7e4   : > { %1920 = vmatmul.bf16.vlgmr.msra.gmra.mxu2 %v1808_v10  ;;  %1938 = vmatmul.bf16.vlgmr.msra.gmra.mxu3 %v1808_v10 }
 0x7e5   : > { %v1792_v35 = vsel %vm1791_vm7, %v2955_v58, %v1788_v4 }
 0x7e6   : > { %v1795_v1 = vmul.f32 %v1792_v35, %v3481_v39  ;;  %v2818_v39 = vld [vmem:[%s3201_s3 + $0x28] sm:$0xff] }
 0x7e7   : > { %2140 = vmatpush.bf16.msra.mxu0 %v2818_v39 }
 0x7e8   : > { %v1801_v11 = vmul.f32 %v2891_v55, %v1795_v1 }
 0x7ea   : > { %v1807_v12 = vadd.f32 %v2892_v3, %v1801_v11 }
 0x7eb   : > { %2141 = vmatpush.bf16.msra.mxu0 %v2817_v18 }
 0x7ec   : > { %v1809_v24 = vpack.c.bf16 %v1807_v12, %v1807_v12 }
 0x7ef   : > { %2142 = vmatpush.bf16.msra.mxu0 %v2816_v2 }
 0x7f3   : > { %2143 = vmatpush.bf16.msra.mxu0 %v2815_v22 }
 0x7f4   : > { %1925 = vmatmul.bf16.gmra.mxu2 %v1809_v24  ;;  %1943 = vmatmul.bf16.gmra.mxu3 %v1809_v24 }
 0x7f7   : > { %2144 = vmatpush.bf16.msra.mxu0 %v2814_v25 }
 0x7fb   : > { %2145 = vmatpush.bf16.msra.mxu0 %v2813_v33 }
 0x867   : > { %v1921_v29 = vpop.f32.mrf.mxu2  ;;  %v1939_v0 = vpop.f32.mrf.mxu3 }
 0x868   : > { %v1922_v36 = vadd.f32 %v1921_v29, %v1828_v27  ;;  %v3551_v37 = vadd.f32 %v1939_v0, %v1829_v28 }
 0x86a   : > { %v1948_v38 = vmul.f32 %v1922_v36, %v1922_v36  ;;  %v1949_v40 = vmul.f32 %v3551_v37, %v3551_v37 }
 0x86c   : > { %v1954_v31 = vmul.f32 %v1948_v38, %v1922_v36  ;;  %v1955_v41 = vmul.f32 %v1949_v40, %v3551_v37 }
 0x86e   : > { %v1960_v42 = vmul.f32 0.044715, %v1954_v31  ;;  %v1961_v43 = vmul.f32 0.044715, %v1955_v41 }
 0x86f   : > { %v1923_v44 = vpop.f32.mrf.mxu2  ;;  %v1941_v45 = vpop.f32.mrf.mxu3 }
 0x870   : > { %v1966_v46 = vadd.f32 %v1960_v42, %v1922_v36  ;;  %v1967_v47 = vadd.f32 %v1961_v43, %v3551_v37  ;;  %v1924_v48 = vadd.f32 %v1923_v44, %v1828_v27  ;;  %v1942_v49 = vadd.f32 %v1941_v45, %v1829_v28 }
 0x872   : > { %v1972_v50 = vmul.f32 0.7978846, %v1966_v46  ;;  %v1950_v52 = vmul.f32 %v1924_v48, %v1924_v48  ;;  %v1951_v53 = vmul.f32 %v1942_v49, %v1942_v49  ;;  %v1973_v54 = vmul.f32 0.7978846, %v1967_v47 }
 0x874   : > { %v1956_v55 = vmul.f32 %v1950_v52, %v1924_v48  ;;  %v1957_v56 = vmul.f32 %v1951_v53, %v1942_v49  ;;  %2956 = vtanh.f32 %v1972_v50 }
 0x875   : > { %2958 = vtanh.f32 %v1973_v54 }
 0x876   : > { %v1962_v58 = vmul.f32 0.044715, %v1956_v55  ;;  %v1963_v59 = vmul.f32 0.044715, %v1957_v56 }
 0x877   : > { %v1926_v60 = vpop.f32.mrf.mxu2  ;;  %v1944_v61 = vpop.f32.mrf.mxu3 }
 0x878   : > { %v1968_v62 = vadd.f32 %v1962_v58, %v1924_v48  ;;  %v1969_v3 = vadd.f32 %v1963_v59, %v1942_v49  ;;  %v1927_v32 = vadd.f32 %v1926_v60, %v1828_v27  ;;  %v1945_v5 = vadd.f32 %v1944_v61, %v1829_v28 }
 0x87a   : > { %v1974_v6 = vmul.f32 0.7978846, %v1968_v62  ;;  %v1975_v7 = vmul.f32 0.7978846, %v1969_v3  ;;  %v1952_v8 = vmul.f32 %v1927_v32, %v1927_v32  ;;  %v1953_v9 = vmul.f32 %v1945_v5, %v1945_v5  ;;  %v2957_v10 = vpop.eup %2956 }
 0x87b   : > { %v2959_v1 = vpop.eup %2958  ;;  %v1984_v24 = vadd.f32 1.0, %v2957_v10 }
 0x87c   : > { %2960 = vtanh.f32 %v1974_v6  ;;  %v1958_v4 = vmul.f32 %v1952_v8, %v1927_v32  ;;  %v1959_v35 = vmul.f32 %v1953_v9, %v1945_v5  ;;  %v1985_v51 = vadd.f32 1.0, %v2959_v1 }
 0x87d   : > { %2962 = vtanh.f32 %v1975_v7  ;;  %v1990_v63 = vmul.f32 0.5, %v1984_v24 }
 0x87e   : > { %v1964_v11 = vmul.f32 0.044715, %v1958_v4  ;;  %v1965_v12 = vmul.f32 0.044715, %v1959_v35  ;;  %v1991_v23 = vmul.f32 0.5, %v1985_v51 }
 0x87f   : > { %v1928_v14 = vpop.f32.mrf.mxu2  ;;  %v1946_v15 = vpop.f32.mrf.mxu3  ;;  %v1996_v27 = vmul.f32 %v1990_v63, %v1922_v36  ;;  %v2893_v36 = vld [vmem:[%s726_s25] ss:$0 sm:$0xff] }
 0x880   : > { %v1970_v16 = vadd.f32 %v1964_v11, %v1927_v32  ;;  %v1971_v39 = vadd.f32 %v1965_v12, %v1945_v5  ;;  %v1997_v29 = vmul.f32 %v1991_v23, %v3551_v37 }
 0x882   : > { %v2961_v57 = vpop.eup %2960  ;;  %v1976_v18 = vmul.f32 0.7978846, %v1970_v16  ;;  %v1977_v19 = vmul.f32 0.7978846, %v1971_v39 }
 0x883   : > { %v2963_v2 = vpop.eup %2962  ;;  %v1986_v22 = vadd.f32 1.0, %v2961_v57 }
 0x884   : > { %v1987_v13 = vadd.f32 1.0, %v2963_v2  ;;  %2964 = vtanh.f32 %v1976_v18 }
 0x885   : > { %v1992_v25 = vmul.f32 0.5, %v1986_v22  ;;  %2966 = vtanh.f32 %v1977_v19 }
 0x886   : > { %v1993_v20 = vmul.f32 0.5, %v1987_v13 }
 0x887   : > { %v1998_v28 = vmul.f32 %v1992_v25, %v1924_v48 }
 0x888   : > { %v1999_v0 = vmul.f32 %v1993_v20, %v1942_v49 }
 0x889   : > { %v2002_v33 = vpack.c.bf16 %v1998_v28, %v1996_v27 }
 0x88a   : > { %v2965_v34 = vpop.eup %2964  ;;  %v2003_v38 = vpack.c.bf16 %v1999_v0, %v1997_v29 }
 0x88b   : > { %v2967_v40 = vpop.eup %2966  ;;  %2146 = vmatmul.bf16.vlgmr.msra.gmra.mxu0 %v2002_v33  ;;  %v1988_v31 = vadd.f32 1.0, %v2965_v34 }
 0x88c   : > { %2164 = vmatmul.bf16.vlgmr.msra.gmra.mxu1 %v2003_v38  ;;  %v1989_v41 = vadd.f32 1.0, %v2967_v40 }
 0x88d   : > { %v1994_v42 = vmul.f32 0.5, %v1988_v31 }
 0x88e   : > { %v1995_v43 = vmul.f32 0.5, %v1989_v41 }
 0x88f   : > { %v2000_v44 = vmul.f32 %v1994_v42, %v1927_v32 }
 0x890   : > { %v2001_v45 = vmul.f32 %v1995_v43, %v1945_v5 }
 0x891   : > { %v2004_v46 = vpack.c.bf16 %v2000_v44, %v2000_v44 }
 0x892   : > { %v2005_v47 = vpack.c.bf16 %v2001_v45, %v2001_v45 }
 0x89b   : > { %2151 = vmatmul.bf16.gmra.mxu0 %v2004_v46 }
 0x89c   : > { %2169 = vmatmul.bf16.gmra.mxu1 %v2005_v47 }
 0x908   : > { %v2147_v37 = vpop.f32.mrf.mxu0 }
 0x909   : > { %v2148_v48 = vadd.f32 %v2893_v36, %v2147_v37  ;;  %v2165_v49 = vpop.f32.mrf.mxu1 }
 0x90b   : > { %v2166_v50 = vadd.f32 %v2165_v49, %v2148_v48 }
 0x90d   : > { %v2174_v52 = vadd.f32 %v2166_v50, %v3457_v17 }
 0x90f   : > { %2177 = vst [vmem:[#allocation2 + $0x10] sm:$0xff] %v2174_v52 }
 0x910   : > { %v2149_v53 = vpop.f32.mrf.mxu0 }
 0x911   : > { %v2150_v54 = vadd.f32 %v2893_v36, %v2149_v53  ;;  %v2167_v55 = vpop.f32.mrf.mxu1 }
 0x913   : > { %v2168_v56 = vadd.f32 %v2167_v55, %v2150_v54 }
 0x915   : > { %v2175_v58 = vadd.f32 %v2168_v56, %v3460_v30 }
 0x917   : > { %2178 = vst [vmem:[#allocation2] sm:$0xff] %v2175_v58 }
 0x918   : > { %v2152_v59 = vpop.f32.mrf.mxu0 }
 0x919   : > { %v2153_v60 = vadd.f32 %v2893_v36, %v2152_v59  ;;  %v2170_v61 = vpop.f32.mrf.mxu1 }
 0x91b   : > { %v2171_v62 = vadd.f32 %v2170_v61, %v2153_v60 }
 0x91d   : > { %v2176_v3 = vadd.f32 %v2171_v62, %v3463_v26  ;;  %2183 = sbr.rel (%p2759_p8) target bundleno = 2624 (0xa40), region = 92 }
 0x91f   : > { %2179 = vst [vmem:[#allocation2 + $0x8] sm:$0x1] %v2176_v3 }
 0x920   : > { %v2154_v32 = vpop.f32.mrf.mxu0 }
 0x921   : > { %v2172_v5 = vpop.f32.mrf.mxu1 }
 0x922   : > { %v2190_v17 = vsel %vm761_vm0, %v2176_v3, 0.0  ;;  %2188 = vadd.xlane.f32.xlu1 %v2175_v58  ;;  %v2971_v29 = vld [vmem:[%s3652_s29] ss:$0 sm:$0xff]  ;;  %vm2266_vm11 = vsmask.f32 256 }
 0x923   : > { %2191 = vadd.xlane.f32.xlu0 %v2190_v17  ;;  %vm2267_vm13 = vmand %vm761_vm0, %vm2266_vm11  ;;  %v2268_v45 = vld [vmem:[%s3210_s6 + $0x8] sm:$0x1] }
 0x92b   : > { %2186 = vadd.xlane.f32.xlu0 %v2174_v52 }
 0x995   : > { %v2189_v10 = vpop.xlane.xlu1 %2188 }
 0x996   : > { %v2192_v6 = vpop.xlane.xlu0 %2191  ;;  %v2194_v1 = vmul.f32 %v2189_v10, %v3223_v21 }
 0x997   : > { %v2195_v30 = vmul.f32 %v2192_v6, %v3223_v21 }
 0x998   : > { %v2197_v12 = vsub.f32 %v2175_v58, %v2194_v1 }
 0x999   : > { %v2198_v7 = vsub.f32 %v2176_v3, %v2195_v30 }
 0x99a   : > { %v2200_v24 = vmul.f32 %v2197_v12, %v2197_v12 }
 0x99b   : > { %v2201_v8 = vmul.f32 %v2198_v7, %v2198_v7 }
 0x99d   : > { %v2206_v9 = vsel %vm761_vm0, %v2201_v8, 0.0 }
 0x99e   : > { %2207 = vadd.xlane.f32.xlu1 %v2206_v9  ;;  %v2187_v26 = vpop.xlane.xlu0 %2186 }
 0x99f   : > { %v2193_v4 = vmul.f32 %v2187_v26, %v3223_v21 }
 0x9a1   : > { %v2196_v35 = vsub.f32 %v2174_v52, %v2193_v4 }
 0x9a3   : > { %v2199_v11 = vmul.f32 %v2196_v35, %v2196_v35 }
 0x9a5   : > { %2202 = vadd.xlane.f32.xlu2 %v2199_v11 }
 0x9ad   : > { %2204 = vadd.xlane.f32.xlu2 %v2200_v24 }
 0xa11   : > { %v2208_v14 = vpop.xlane.xlu1 %2207 }
 0xa12   : > { %v2211_v15 = vmul.f32 %v2208_v14, %v3223_v21 }
 0xa14   : > { %v2214_v51 = vadd.f32 1e-06, %v2211_v15 }
 0xa16   : > { %2973 = vrsqrt.f32 %v2214_v51  ;;  %vm2241_vm9 = vweird.f32 %v2214_v51 }
 0xa18   : > { %v2203_v16 = vpop.xlane.xlu2 %2202 }
 0xa19   : > { %v2209_v39 = vmul.f32 %v2203_v16, %v3223_v21 }
 0xa1b   : > { %v2212_v57 = vadd.f32 1e-06, %v2209_v39 }
 0xa1c   : > { %v2974_v18 = vpop.eup %2973 }
 0xa1d   : > { %v2236_v19 = vmul.f32 %v2974_v18, %v2214_v51  ;;  %2975 = vrsqrt.f32 %v2212_v57  ;;  %vm2242_vm8 = vweird.f32 %v2974_v18  ;;  %vm2221_vm14 = vweird.f32 %v2212_v57 }
 0xa1e   : > { %vm2243_vm10 = vmor %vm2241_vm9, %vm2242_vm8 }
 0xa1f   : > { %v2237_v2 = vmul.f32 %v2974_v18, %v2236_v19 }
 0xa20   : > { %v2205_v63 = vpop.xlane.xlu2 %2204 }
 0xa21   : > { %v2238_v22 = vmul.f32 0.5, %v2237_v2  ;;  %v2210_v23 = vmul.f32 %v2205_v63, %v3223_v21  ;;  %v2972_v21 = vld [vmem:[%s3653_s21] ss:$0 sm:$0xff] }
 0xa23   : > { %v2976_v13 = vpop.eup %2975  ;;  %v2239_v25 = vsub.f32 1.5, %v2238_v22  ;;  %v2213_v20 = vadd.f32 1e-06, %v2210_v23 }
 0xa24   : > { %v2216_v27 = vmul.f32 %v2976_v13, %v2212_v57  ;;  %vm2222_vm12 = vweird.f32 %v2976_v13 }
 0xa25   : > { %v2240_v28 = vmul.f32 %v2974_v18, %v2239_v25  ;;  %2977 = vrsqrt.f32 %v2213_v20  ;;  %vm2223_vm15 = vmor %vm2221_vm14, %vm2222_vm12  ;;  %vm2231_vm2 = vweird.f32 %v2213_v20 }
 0xa26   : > { %v2217_v0 = vmul.f32 %v2976_v13, %v2216_v27 }
 0xa27   : > { %v2244_v33 = vsel %vm2243_vm10, %v2974_v18, %v2240_v28 }
 0xa28   : > { %v2247_v34 = vmul.f32 %v2244_v33, %v2198_v7  ;;  %v2218_v38 = vmul.f32 0.5, %v2217_v0 }
 0xa2a   : > { %v2253_v40 = vmul.f32 %v2971_v29, %v2247_v34  ;;  %v2219_v31 = vsub.f32 1.5, %v2218_v38 }
 0xa2b   : > { %v2978_v41 = vpop.eup %2977 }
 0xa2c   : > { %v2259_v42 = vadd.f32 %v2972_v21, %v2253_v40  ;;  %v2220_v43 = vmul.f32 %v2976_v13, %v2219_v31  ;;  %v2226_v44 = vmul.f32 %v2978_v41, %v2213_v20  ;;  %vm2232_vm1 = vweird.f32 %v2978_v41 }
 0xa2d   : > { %vm2233_vm3 = vmor %vm2231_vm2, %vm2232_vm1 }
 0xa2e   : > { %v2262_v46 = vpack.c.bf16 %v2259_v42, %v2259_v42  ;;  %v2227_v47 = vmul.f32 %v2978_v41, %v2226_v44  ;;  %v2224_v37 = vsel %vm2223_vm15, %v2976_v13, %v2220_v43 }
 0xa2f   : > { %v2245_v50 = vmul.f32 %v2224_v37, %v2196_v35 }
 0xa30   : > { %v2269_v36 = vsel %vm2267_vm13, %v2262_v46, %v2268_v45  ;;  %v2228_v48 = vmul.f32 0.5, %v2227_v47 }
 0xa31   : > { %2270 = vst [vmem:[%s3210_s6 + $0x8] sm:$0x1] %v2269_v36  ;;  %v2251_v54 = vmul.f32 %v2971_v29, %v2245_v50 }
 0xa32   : > { %v2229_v49 = vsub.f32 1.5, %v2228_v48 }
 0xa33   : > { %v2257_v58 = vadd.f32 %v2972_v21, %v2251_v54 }
 0xa34   : > { %v2230_v52 = vmul.f32 %v2978_v41, %v2229_v49 }
 0xa36   : > { %v2234_v53 = vsel %vm2233_vm3, %v2978_v41, %v2230_v52 }
 0xa37   : > { %v2246_v55 = vmul.f32 %v2234_v53, %v2197_v12 }
 0xa39   : > { %v2252_v56 = vmul.f32 %v2971_v29, %v2246_v55 }
 0xa3b   : > { %v2258_v59 = vadd.f32 %v2972_v21, %v2252_v56 }
 0xa3d   : > { %v2836_v60 = vpack.c.bf16 %v2258_v59, %v2257_v58 }
 0xa3f   : > { %2837 = vst [vmem:[%s3210_s6] sm:$0xff] %v2836_v60  }
 0xa40 PF: > { %s3654_s20 = sld [smem:[#allocation6_spill]] }
 0xa41   : > { %s3655_s21 = sld [smem:[#allocation4_spill]] }
 0xa42   : > { %s3656_s22 = sld [smem:[#allocation5_spill]] }
 0xa43   : > { %s3657_s23 = sld [smem:[#allocation7_spill]] }
 0xa44   : > { %s3658_s24 = sld [smem:[#allocation8_spill]] }
 0xa46   : > { %s26_s25 = sadd.s32 1, %s3654_s20  }
 0xa47   : > { %p23_p9 = scmp.ge.s32.totalorder %s26_s25, 6  }
 0xa49   :  { %25 = sbr.rel (!%p23_p9) target bundleno = 10 (0xa), region = 158 }

// kernel: _lambda_.12
= control target key start
LH: loop header
LB: loop body
LE: loop exit
PB: predicated region body
PF: predicated region fallthrough
CT: control target
= control target key end

     0   :  { %vm31_vm0 = vcmask 523264   ;;  %s518_s0 = inlined_call_operand.vmem [shape: f32[2,16,192], index: 0, kind: input, shape index: {}]   ;;  %s519_s1 = inlined_call_operand.vmem [shape: f32[2,16,192], index: 1, kind: input, shape index: {}]   ;;  %s520_s2 = inlined_call_operand.vmem [shape: f32[2,16], index: 2, kind: input, shape index: {}]   ;;  %s521_s3 = inlined_call_operand.hbm [shape: f32[1,1], index: 3, kind: output, shape index: {}]  }
   0x1   :  { %v27_v0 = vld [vmem:[%s519_s1 + $0x20] sm:$0xff]  ;;  %v28_v1 = vld [vmem:[%s519_s1 + $0x28] sm:$0xff]  ;;  %v30_v7 = vld [vmem:[%s519_s1 + $0x38] sm:$0xff] }
   0x2   :  { %v23_v2 = vld [vmem:[%s519_s1] sm:$0xff]  ;;  %v40_v3 = vsel %vm31_vm0, %v28_v1, 0.0  ;;  %v24_v4 = vld [vmem:[%s519_s1 + $0x8] sm:$0xff] }
   0x3   :  { %v41_v5 = vadd.f32 %v40_v3, %v27_v0  ;;  %v32_v6 = vsel %vm31_vm0, %v24_v4, 0.0 }
   0x4   :  { %8 = vsyncpa [#allocation3], 0  ;;  %v33_v8 = vadd.f32 %v32_v6, %v23_v2  ;;  %v26_v9 = vld [vmem:[%s519_s1 + $0x18] sm:$0xff]  ;;  %v29_v10 = vld [vmem:[%s519_s1 + $0x30] sm:$0xff]  ;;  %v44_v11 = vsel %vm31_vm0, %v30_v7, 0.0  ;;  %v355_v16 = vmov 192.0   ;;  %v193_v20 = vlaneseq }
   0x5   :  { %42 = vadd.xlane.f32.xlu1 %v41_v5  ;;  %v25_v12 = vld [vmem:[%s519_s1 + $0x10] sm:$0xff]  ;;  %v36_v13 = vsel %vm31_vm0, %v26_v9, 0.0  ;;  %v45_v14 = vadd.f32 %v44_v11, %v29_v10  ;;  %327 = vrcp.f32 %v355_v16  ;;  %v456_v58 = vld [vmem:[%s520_s2] sm:$0x3]  ;;  %v356_v60 = vmov 191.0   ;;  %s300_s20 = sshll.u32 %s521_s3, 4  ;;  %s301_s20 = int_to_ptr.hbm [resolvable:$true] %s300_s20 }
   0x6   :  { %34 = vadd.xlane.f32.xlu0 %v33_v8  ;;  %v37_v15 = vadd.f32 %v36_v13, %v25_v12  ;;  %v194_v21 = vshrl.u32 %v193_v20, 7  ;;  %v192_v59 = vperm.slane %v456_v58, 0  ;;  %329 = vrcp.f32 %v356_v60  ;;  %s358_s23 = smov [#allocation2]  }
   0x7   :  { %vm255_vm15 = vcmask 123904  }
   0x8   :  { %v408_v23 = vadd.s32 8, %v194_v21  ;;  %322 = vset.pattern.permute.xlu2 %v194_v21  ;;  %320 = vset.pattern.permute.xlu0 %v194_v21 }
   0xa   :  { %321 = vset.pattern.permute.xlu1 %v408_v23 }
   0xb   :  { %v328_v17 = vpop.eup %327 }
   0xc   :  { %v49_v18 = vmul.f32 192.0, %v328_v17  ;;  %vm53_vm1 = vweird.f32 %v328_v17  ;;  %v330_v61 = vpop.eup %329 }
   0xd   :  { %46 = vadd.xlane.f32.xlu1 %v45_v14  ;;  %v92_v62 = vmul.f32 191.0, %v330_v61  ;;  %vm96_vm2 = vweird.f32 %v330_v61 }
   0xe   :  { %38 = vadd.xlane.f32.xlu0 %v37_v15  ;;  %v50_v19 = vsub.f32 1.0, %v49_v18 }
   0xf   :  { %v93_v63 = vsub.f32 1.0, %v92_v62  ;;  %v18_v62 = vld [vmem:[%s518_s0 + $0x18] sm:$0xff] }
  0x10   :  { %v51_v22 = vmul.f32 %v328_v17, %v50_v19 }
  0x12   :  { %v52_v24 = vadd.f32 %v328_v17, %v51_v22 }
  0x14   :  { %v411_v25 = vsel %vm53_vm1, %v328_v17, %v52_v24  ;;  %vm252_vm1 = vcmask 1041409  }
  0x78   :  { %v43_v26 = vpop.xlane.xlu1 %42 }
  0x79   :  { %v57_v27 = vmul.f32 %v411_v25, %v43_v26  ;;  %v35_v28 = vpop.xlane.xlu0 %34 }
  0x7a   :  { %v55_v29 = vmul.f32 %v411_v25, %v35_v28 }
  0x7b   :  { %v415_v30 = vsub.f32 %v27_v0, %v57_v27  ;;  %v417_v31 = vsub.f32 %v28_v1, %v57_v27  ;;  %v94_v0 = vmul.f32 %v330_v61, %v93_v63 }
  0x7c   :  { %v419_v32 = vsub.f32 %v23_v2, %v55_v29  ;;  %v421_v33 = vsub.f32 %v24_v4, %v55_v29  ;;  %v19_v29 = vld [vmem:[%s518_s0 + $0x20] sm:$0xff] }
  0x7d   :  { %v71_v34 = vmul.f32 %v415_v30, %v415_v30  ;;  %v72_v35 = vmul.f32 %v417_v31, %v417_v31  ;;  %v95_v1 = vadd.f32 %v330_v61, %v94_v0 }
  0x7e   :  { %v67_v36 = vmul.f32 %v419_v32, %v419_v32  ;;  %v68_v37 = vmul.f32 %v421_v33, %v421_v33 }
  0x7f   :  { %v83_v38 = vsel %vm31_vm0, %v72_v35, 0.0  ;;  %v461_v2 = vsel %vm96_vm2, %v330_v61, %v95_v1 }
  0x80   :  { %v47_v39 = vpop.xlane.xlu1 %46  ;;  %v84_v40 = vadd.f32 %v83_v38, %v71_v34  ;;  %v75_v41 = vsel %vm31_vm0, %v68_v37, 0.0  ;;  %v20_v34 = vld [vmem:[%s518_s0 + $0x28] sm:$0xff] }
  0x81   :  { %v58_v42 = vmul.f32 %v411_v25, %v47_v39  ;;  %v39_v43 = vpop.xlane.xlu0 %38  ;;  %v76_v44 = vadd.f32 %v75_v41, %v67_v36  ;;  %v15_v39 = vld [vmem:[%s518_s0] sm:$0xff] }
  0x82   :  { %v56_v45 = vmul.f32 %v411_v25, %v39_v43  ;;  %85 = vadd.xlane.f32.xlu0 %v84_v40  ;;  %v16_v40 = vld [vmem:[%s518_s0 + $0x8] sm:$0xff] }
  0x83   :  { %v435_v46 = vsub.f32 %v29_v10, %v58_v42  ;;  %v437_v47 = vsub.f32 %v30_v7, %v58_v42  ;;  %77 = vadd.xlane.f32.xlu2 %v76_v44 }
  0x84   :  { %v439_v48 = vsub.f32 %v25_v12, %v56_v45  ;;  %v441_v49 = vsub.f32 %v26_v9, %v56_v45 }
  0x85   :  { %v73_v50 = vmul.f32 %v435_v46, %v435_v46  ;;  %v74_v51 = vmul.f32 %v437_v47, %v437_v47 }
  0x86   :  { %v69_v52 = vmul.f32 %v439_v48, %v439_v48  ;;  %v70_v53 = vmul.f32 %v441_v49, %v441_v49 }
  0x87   :  { %v87_v54 = vsel %vm31_vm0, %v74_v51, 0.0 }
  0x88   :  { %v88_v55 = vadd.f32 %v87_v54, %v73_v50  ;;  %v79_v56 = vsel %vm31_vm0, %v70_v53, 0.0 }
  0x89   :  { %v80_v57 = vadd.f32 %v79_v56, %v69_v52 }
  0x8a   :  { %89 = vadd.xlane.f32.xlu1 %v88_v55 }
  0x8b   :  { %81 = vadd.xlane.f32.xlu2 %v80_v57 }
  0xa3   :  { %203 = vperm.xlu1 %321, %v192_v59  }
  0xf5   :  { %v86_v3 = vpop.xlane.xlu0 %85 }
  0xf6   :  { %v78_v4 = vpop.xlane.xlu2 %77  ;;  %v100_v5 = vmul.f32 %v461_v2, %v86_v3 }
  0xf7   :  { %v98_v6 = vmul.f32 %v461_v2, %v78_v4 }
  0xf8   :  { %v104_v7 = vadd.f32 1e-06, %v100_v5 }
  0xf9   :  { %v102_v8 = vadd.f32 1e-06, %v98_v6 }
  0xfa   :  { %331 = vrsqrt.f32 %v104_v7  ;;  %vm132_vm3 = vweird.f32 %v104_v7 }
  0xfb   :  { %333 = vrsqrt.f32 %v102_v8  ;;  %vm112_vm7 = vweird.f32 %v102_v8 }
  0xfe   :  { %v82_v9 = vpop.xlane.xlu2 %81 }
  0xff   :  { %v99_v10 = vmul.f32 %v461_v2, %v82_v9 }
 0x100   :  { %v332_v11 = vpop.eup %331 }
 0x101   :  { %v334_v12 = vpop.eup %333  ;;  %v127_v13 = vmul.f32 %v332_v11, %v104_v7  ;;  %v103_v14 = vadd.f32 1e-06, %v99_v10  ;;  %vm133_vm4 = vweird.f32 %v332_v11  ;;  %v90_v7 = vpop.xlane.xlu1 %89 }
 0x102   :  { %v107_v15 = vmul.f32 %v334_v12, %v102_v8  ;;  %vm113_vm5 = vweird.f32 %v334_v12  ;;  %vm134_vm6 = vmor %vm132_vm3, %vm133_vm4  ;;  %v101_v10 = vmul.f32 %v461_v2, %v90_v7 }
 0x103   :  { %v128_v16 = vmul.f32 %v332_v11, %v127_v13  ;;  %335 = vrsqrt.f32 %v103_v14  ;;  %vm114_vm8 = vmor %vm112_vm7, %vm113_vm5  ;;  %vm122_vm9 = vweird.f32 %v103_v14 }
 0x104   :  { %v108_v17 = vmul.f32 %v334_v12, %v107_v15 }
 0x105   :  { %v129_v18 = vmul.f32 0.5, %v128_v16 }
 0x106   :  { %v109_v19 = vmul.f32 0.5, %v108_v17 }
 0x107   :  { %v130_v21 = vsub.f32 1.5, %v129_v18  ;;  %v22_v18 = vld [vmem:[%s518_s0 + $0x38] sm:$0xff] }
 0x108   :  { %v110_v22 = vsub.f32 1.5, %v109_v19 }
 0x109   :  { %v336_v24 = vpop.eup %335  ;;  %v131_v26 = vmul.f32 %v332_v11, %v130_v21 }
 0x10a   :  { %v111_v27 = vmul.f32 %v334_v12, %v110_v22  ;;  %v117_v28 = vmul.f32 %v336_v24, %v103_v14  ;;  %vm123_vm10 = vweird.f32 %v336_v24 }
 0x10b   :  { %v135_v35 = vsel %vm134_vm6, %v332_v11, %v131_v26  ;;  %vm124_vm11 = vmor %vm122_vm9, %vm123_vm10  ;;  %v105_v11 = vadd.f32 1e-06, %v101_v10 }
 0x10c   :  { %v118_v36 = vmul.f32 %v336_v24, %v117_v28  ;;  %v150_v37 = vmul.f32 %v135_v35, %v415_v30  ;;  %v151_v38 = vmul.f32 %v135_v35, %v417_v31  ;;  %v115_v41 = vsel %vm114_vm8, %v334_v12, %v111_v27 }
 0x10d   :  { %v146_v42 = vmul.f32 %v115_v41, %v419_v32  ;;  %v147_v43 = vmul.f32 %v115_v41, %v421_v33  ;;  %v17_v33 = vld [vmem:[%s518_s0 + $0x10] sm:$0xff]  ;;  %337 = vrsqrt.f32 %v105_v11  ;;  %v205_v12 = vperm.slane %v456_v58, 1 }
 0x10e   :  { %v119_v44 = vmul.f32 0.5, %v118_v36  ;;  %v158_v45 = vsub.f32 %v19_v29, %v150_v37  ;;  %v159_v30 = vsub.f32 %v20_v34, %v151_v38  ;;  %vm142_vm12 = vweird.f32 %v105_v11 }
 0x10f   :  { %v154_v50 = vsub.f32 %v15_v39, %v146_v42  ;;  %v155_v31 = vsub.f32 %v16_v40, %v147_v43 }
 0x110   :  { %v120_v51 = vsub.f32 1.5, %v119_v44  ;;  %v166_v52 = vmul.f32 %v158_v45, %v158_v45  ;;  %v167_v53 = vmul.f32 %v159_v30, %v159_v30 }
 0x111   :  { %v162_v54 = vmul.f32 %v154_v50, %v154_v50  ;;  %v163_v55 = vmul.f32 %v155_v31, %v155_v31  ;;  %v266_v50 = vsel %vm255_vm15, %v456_v58, 0.0 }
 0x112   :  { %v121_v56 = vmul.f32 %v336_v24, %v120_v51  ;;  %v178_v57 = vsel %vm31_vm0, %v167_v53, 0.0  ;;  %v243_v51 = vand.u32 127, %v193_v20 }
 0x113   :  { %v179_v60 = vadd.f32 %v178_v57, %v166_v52  ;;  %v170_v32 = vsel %vm31_vm0, %v163_v55, 0.0  ;;  %v338_v13 = vpop.eup %337 }
 0x114   :  { %v171_v61 = vadd.f32 %v170_v32, %v162_v54  ;;  %v125_v63 = vsel %vm124_vm11, %v336_v24, %v121_v56  ;;  %vm143_vm13 = vweird.f32 %v338_v13  ;;  %v245_v52 = vadd.s32 4294967288, %v243_v51 }
 0x115   :  { %180 = vadd.xlane.f32.xlu1 %v179_v60  ;;  %v148_v0 = vmul.f32 %v125_v63, %v439_v48  ;;  %v149_v1 = vmul.f32 %v125_v63, %v441_v49  ;;  %v137_v48 = vmul.f32 %v338_v13, %v105_v11  ;;  %vm144_vm14 = vmor %vm142_vm12, %vm143_vm13  ;;  %v204_v29 = vpop.permute.xlu1 %203 }
 0x116   :  { %172 = vadd.xlane.f32.xlu2 %v171_v61 }
 0x117   :  { %v156_v3 = vsub.f32 %v17_v33, %v148_v0  ;;  %v157_v4 = vsub.f32 %v18_v62, %v149_v1  ;;  %v138_v49 = vmul.f32 %v338_v13, %v137_v48 }
 0x119   :  { %v164_v5 = vmul.f32 %v156_v3, %v156_v3  ;;  %v165_v6 = vmul.f32 %v157_v4, %v157_v4  ;;  %v139_v14 = vmul.f32 0.5, %v138_v49 }
 0x11b   :  { %v174_v8 = vsel %vm31_vm0, %v165_v6, 0.0  ;;  %v140_v15 = vsub.f32 1.5, %v139_v14 }
 0x11c   :  { %v175_v9 = vadd.f32 %v174_v8, %v164_v5 }
 0x11d   :  { %v141_v16 = vmul.f32 %v338_v13, %v140_v15 }
 0x11e   :  { %176 = vadd.xlane.f32.xlu0 %v175_v9 }
 0x11f   :  { %v145_v2 = vsel %vm144_vm14, %v338_v13, %v141_v16 }
 0x120   :  { %v153_v17 = vmul.f32 %v145_v2, %v437_v47  ;;  %v152_v19 = vmul.f32 %v145_v2, %v435_v46  ;;  %v357_v47 = vmov 0  }
 0x121   :  { %324 = vset.pattern.permute.xlu1 %v357_v47 }
 0x12e   :  { %210 = vperm.xlu2 %322, %v205_v12  }
 0x132   :  { %197 = vperm.xlu0 %320, %v192_v59   ;;  %v21_v59 = vld [vmem:[%s518_s0 + $0x30] sm:$0xff] }
 0x133   :  { %v160_v21 = vsub.f32 %v21_v59, %v152_v19 }
 0x135   :  { %v168_v24 = vmul.f32 %v160_v21, %v160_v21 }
 0x136   :  { %323 = vset.pattern.permute.xlu2 %v408_v23  ;;  %v161_v23 = vsub.f32 %v22_v18, %v153_v17 }
 0x138   :  { %v169_v22 = vmul.f32 %v161_v23, %v161_v23 }
 0x13a   :  { %v182_v26 = vsel %vm31_vm0, %v169_v22, 0.0  ;;  %326 = vset.pattern.permute.xlu0 %v357_v47  ;;  %vm247_vm0 = vcmask 130112  }
 0x13b   :  { %v183_v27 = vadd.f32 %v182_v26, %v168_v24 }
 0x157   :  { %184 = vadd.xlane.f32.xlu2 %v183_v27 }
 0x16f   :  { %216 = vperm.xlu2 %323, %v205_v12  }
 0x177   :  { %325 = vset.pattern.permute.xlu2 %v357_v47 }
 0x188   :  { %v181_v39 = vpop.xlane.xlu1 %180 }
 0x189   :  { %v173_v35 = vpop.xlane.xlu2 %172  ;;  %v188_v41 = vmul.f32 %v181_v39, %v411_v25 }
 0x18a   :  { %v186_v36 = vmul.f32 %v173_v35, %v411_v25 }
 0x191   :  { %v177_v28 = vpop.xlane.xlu0 %176  ;;  %v211_v40 = vpop.permute.xlu2 %210 }
 0x192   :  { %v187_v46 = vmul.f32 %v177_v28, %v411_v25  ;;  %v224_v42 = vmul.f32 %v211_v40, %v188_v41 }
 0x194   :  { %v223_v34 = vmul.f32 %v204_v29, %v187_v46 }
 0x196   :  { %234 = vperm.xlu2 %325, %v223_v34  }
 0x1a4   :  { %v198_v37 = vpop.permute.xlu0 %197 }
 0x1a5   :  { %v222_v38 = vmul.f32 %v198_v37, %v186_v36 }
 0x1a7   :  { %231 = vperm.xlu1 %324, %v222_v38  }
 0x1af   :  { %237 = vperm.xlu1 %324, %v224_v42  }
 0x1ca   :  { %v185_v43 = vpop.xlane.xlu2 %184 }
 0x1cb   :  { %v189_v44 = vmul.f32 %v185_v43, %v411_v25 }
 0x1d2   :  { %v217_v45 = vpop.permute.xlu2 %216 }
 0x1d3   :  { %v225_v30 = vmul.f32 %v217_v45, %v189_v44 }
 0x1d5   :  { %240 = vperm.xlu0 %326, %v225_v30  }
 0x1d9   :  { %267 = vadd.xlane.f32.xlu1 %v266_v50 }
 0x1f0   :  { %v235_v53 = vpop.permute.xlu2 %234 }
 0x1f1   :  { %v246_v57 = vperm.slane %v235_v53, %v245_v52 }
 0x219   :  { %v232_v31 = vpop.permute.xlu1 %231 }
 0x21a   :  { %v244_v55 = vperm.slane %v232_v31, %v243_v51 }
 0x21c   :  { %v248_v32 = vsel %vm247_vm0, %v246_v57, %v244_v55 }
 0x221   :  { %v238_v54 = vpop.permute.xlu1 %237 }
 0x222   :  { %v249_v60 = vperm.slane %v238_v54, %v243_v51 }
 0x247   :  { %v241_v56 = vpop.permute.xlu0 %240 }
 0x248   :  { %v250_v25 = vperm.slane %v241_v56, %v245_v52 }
 0x24a   :  { %v251_v61 = vsel %vm247_vm0, %v250_v25, %v249_v60 }
 0x24b   :  { %v253_v33 = vsel %vm252_vm1, %v251_v61, %v248_v32 }
 0x24c   :  { %v256_v62 = vsel %vm255_vm15, %v253_v33, 0.0  ;;  %v268_v58 = vpop.xlane.xlu1 %267 }
 0x24d   :  { %257 = vadd.xlane.f32.xlu2 %v256_v62  ;;  %v269_v63 = vrot.slane %v268_v58, 4 }
 0x24f   :  { %v270_v0 = vadd.f32 %v269_v63, %v268_v58 }
 0x251   :  { %v271_v20 = vrot.slane %v270_v0, 2 }
 0x253   :  { %v272_v5 = vadd.f32 %v271_v20, %v270_v0 }
 0x255   :  { %v273_v8 = vrot.slane %v272_v5, 1 }
 0x257   :  { %v274_v11 = vadd.f32 %v273_v8, %v272_v5 }
 0x2c0   :  { %v258_v1 = vpop.xlane.xlu2 %257 }
 0x2c1   :  { %v259_v3 = vrot.slane %v258_v1, 4 }
 0x2c3   :  { %v260_v4 = vadd.f32 %v259_v3, %v258_v1 }
 0x2c5   :  { %v261_v6 = vrot.slane %v260_v4, 2 }
 0x2c7   :  { %v262_v7 = vadd.f32 %v261_v6, %v260_v4 }
 0x2c9   :  { %v263_v9 = vrot.slane %v262_v7, 1 }
 0x2cb   :  { %v264_v10 = vadd.f32 %v263_v9, %v262_v7 }
 0x2cd   :  { %310 = vpush %v264_v10 }
 0x2ce   :  { %312 = vpush %v274_v11 }
 0x2fe   :  { %s311_s0 = spop %310 }
 0x2ff   :  { %s313_s17 = spop %312 }
 0x300   :  { %v276_v12 = vstv %s313_s17 }
 0x301   :  { %339 = vrcp.f32 %v276_v12  ;;  %v288_v14 = vand.u32 2147483648, %v276_v12  ;;  %v286_v16 = vand.u32 2147483647, %v276_v12  ;;  %vm282_vm3 = vweird.f32 %v276_v12 }
 0x303   :  { %v289_v17 = vor.u32 1.1754944e-38, %v288_v14  ;;  %vm287_vm5 = vcmp.eq.f32.partialorder %v286_v16, 8.507059e+37 }
 0x307   :  { %v340_v13 = vpop.eup %339 }
 0x308   :  { %v278_v48 = vmul.f32 %v340_v13, %v276_v12  ;;  %vm283_vm2 = vweird.f32 %v340_v13 }
 0x309   :  { %vm284_vm4 = vmor %vm282_vm3, %vm283_vm2 }
 0x30a   :  { %v279_v49 = vsub.f32 1.0, %v278_v48 }
 0x30c   :  { %v280_v15 = vmul.f32 %v340_v13, %v279_v49 }
 0x30e   :  { %v281_v2 = vadd.f32 %v340_v13, %v280_v15 }
 0x310   :  { %v285_v18 = vsel %vm284_vm4, %v340_v13, %v281_v2 }
 0x311   :  { %v290_v19 = vsel %vm287_vm5, %v289_v17, %v285_v18 }
 0x312   :  { %314 = vpush %v290_v19 }
 0x343   :  { %s315_s21 = spop %314 }
 0x344   :  { %s292_s22 = smul.f32 %s315_s21, %s311_s0 }
 0x346   :  { %294 = sst [smem:[#allocation2]] %s292_s22 }
 0x347   :  { %303 = dma.smem_to_hbm %s358_s23, 16, %s301_s20, [#allocation3]  }
 0x348   :  { %353 = dma.done.wait [#allocation3], 16  }
 0x349   :  { %354 = vsyncadd [#allocation3], 4294967280 }
 0x34a   :  { %308 = sfence }
 0x34b   :  { %309 = vsyncpa [#allocation3], 1 }

</bundles_post_ra>
